<compile_context>
chip_gen: v5e
topology: v5e:2x2
jax: 0.10.0
libtpu: 0.0.40
codegen_flags: <defaults>
</compile_context>

<pallas_src>
from functools import partial

import jax
import jax.numpy as jnp
from jax import lax
from jax.experimental import pallas as pl
from jax.experimental.pallas import tpu as pltpu


# ----------------------------------------------------------------------------
# Tile-size heuristic: biggest token tile that fits a conservative VMEM budget
# (default 2 MiB per buffer -> safe under v5e's 16 MiB scoped / v7x's 64 MiB).
# ----------------------------------------------------------------------------
def _pick_rows(total_rows, row_bytes, budget=2 * 1024 * 1024, max_rows=512):
    cap = min(max_rows, max(8, budget // max(int(row_bytes), 1)))
    cap = max(8, (cap // 8) * 8)           # multiple of 8 (sublane) unless full dim
    return total_rows if cap >= total_rows else cap


# ----------------------------------------------------------------------------
# Fused linear: y = maybe_LN((x [+ pe]) @ w + b), tiled over (batch, tokens).
# Weights/bias/LN params use constant index_maps -> resident across token tiles.
# ----------------------------------------------------------------------------
def _fused_linear(x, w, b, pe=None, ln=None, out_dtype=None):
    """x: (B, T, K) bf16, w: (K, Nout) bf16, b: (Nout,) f32,
    pe: (T, K) f32 or None, ln: (gamma, beta) f32 or None -> (B, T, Nout)."""
    B, T, K = x.shape
    Nout = w.shape[1]
    out_dtype = out_dtype or x.dtype
    has_pe = pe is not None
    has_ln = ln is not None

    tm = _pick_rows(T, row_bytes=2 * K + 6 * Nout)
    n_t = pl.cdiv(T, tm)

    in_arrays = [x]
    in_specs = [pl.BlockSpec((None, tm, K), lambda bi, ti: (bi, ti, 0))]
    if has_pe:
        in_arrays.append(pe.astype(jnp.float32))
        in_specs.append(pl.BlockSpec((tm, K), lambda bi, ti: (ti, 0)))
    in_arrays += [w, b.reshape(1, Nout).astype(jnp.float32)]
    in_specs += [pl.BlockSpec((K, Nout), lambda bi, ti: (0, 0)),
                 pl.BlockSpec((1, Nout), lambda bi, ti: (0, 0))]
    if has_ln:
        in_arrays += [ln[0].reshape(1, Nout).astype(jnp.float32),
                      ln[1].reshape(1, Nout).astype(jnp.float32)]
        in_specs += [pl.BlockSpec((1, Nout), lambda bi, ti: (0, 0)),
                     pl.BlockSpec((1, Nout), lambda bi, ti: (0, 0))]

    def kernel(*refs):
        if has_pe and has_ln:
            x_ref, pe_ref, w_ref, b_ref, g_ref, be_ref, o_ref = refs
        elif has_pe:
            x_ref, pe_ref, w_ref, b_ref, o_ref = refs
            g_ref = be_ref = None
        elif has_ln:
            x_ref, w_ref, b_ref, g_ref, be_ref, o_ref = refs
            pe_ref = None
        else:
            x_ref, w_ref, b_ref, o_ref = refs
            pe_ref = g_ref = be_ref = None

        xv = x_ref[...]
        if pe_ref is not None:
            # PE add in f32 (no bf16 VPU on v5e), bf16 operands into the MXU.
            xv = (xv.astype(jnp.float32) + pe_ref[...]).astype(w_ref.dtype)
        y = jnp.dot(xv, w_ref[...], preferred_element_type=jnp.float32) + b_ref[...]
        if g_ref is not None:                       # fused LayerNorm (eps=1e-5), f32 stats
            mu = jnp.mean(y, axis=-1, keepdims=True)
            var = jnp.mean((y - mu) ** 2, axis=-1, keepdims=True)
            y = (y - mu) * lax.rsqrt(var + 1e-5)
            y = y * g_ref[...] + be_ref[...]
        o_ref[...] = y.astype(o_ref.dtype)

    return pl.pallas_call(
        kernel,
        out_shape=jax.ShapeDtypeStruct((B, T, Nout), out_dtype),
        grid=(B, n_t),
        in_specs=in_specs,
        out_specs=pl.BlockSpec((None, tm, Nout), lambda bi, ti: (bi, ti, 0)),
        compiler_params=pltpu.CompilerParams(
            dimension_semantics=("parallel", "parallel")),
    )(*in_arrays)


# ----------------------------------------------------------------------------
# Attention + fused output projection.
# q/k/v arrive lane-dense as (B, T, C); heads are split in-kernel; the output
# projection accumulates per-head directly into a lane-dense (tq, C) slab.
# ----------------------------------------------------------------------------
def _attention_proj(q, k, v, wp, bp, num_heads, out_dtype):
    """q: (B, Tq, C) bf16 (scale pre-folded), k/v: (B, Tk, C) bf16,
    wp: (C, C) bf16, bp: (C,) f32 -> (B, Tq, C) out_dtype."""
    B, Tq, C = q.shape
    Tk = k.shape[1]
    d = C // num_heads
    tq = _pick_rows(Tq, row_bytes=6 * C + 4 * Tk)
    n_q = pl.cdiv(Tq, tq)

    def kernel(q_ref, k_ref, v_ref, wp_ref, bp_ref, o_ref):
        qb = q_ref[...]                      # (tq, C)  bf16
        kb = k_ref[...]                      # (Tk, C)  bf16 (resident across q tiles)
        vb = v_ref[...]                      # (Tk, C)  bf16
        wpb = wp_ref[...]                    # (C,  C)  bf16 (resident)
        acc = jnp.zeros((qb.shape[0], C), jnp.float32)
        for h in range(num_heads):           # static per-head loop, no relayouts
            sl = slice(h * d, (h + 1) * d)
            s = lax.dot_general(qb[:, sl], kb[:, sl],
                                (((1,), (1,)), ((), ())),
                                preferred_element_type=jnp.float32)       # (tq, Tk)
            m = jnp.max(s, axis=-1, keepdims=True)                        # f32
            p = jnp.exp(s - m)
            l = jnp.sum(p, axis=-1, keepdims=True)
            oh = jnp.dot(p.astype(vb.dtype), vb[:, sl],
                         preferred_element_type=jnp.float32)              # (tq, d)
            oh = oh * pl.reciprocal(l, approx=True)                       # EUP, cheap
            acc = acc + jnp.dot(oh.astype(wpb.dtype), wpb[sl, :],
                                preferred_element_type=jnp.float32)       # fused proj
        o_ref[...] = (acc + bp_ref[...]).astype(o_ref.dtype)              # lane-dense store

    return pl.pallas_call(
        kernel,
        out_shape=jax.ShapeDtypeStruct((B, Tq, C), out_dtype),
        grid=(B, n_q),
        in_specs=[
            pl.BlockSpec((None, tq, C), lambda b, t: (b, t, 0)),
            pl.BlockSpec((None, Tk, C), lambda b, t: (b, 0, 0)),
            pl.BlockSpec((None, Tk, C), lambda b, t: (b, 0, 0)),
            pl.BlockSpec((C, C), lambda b, t: (0, 0)),
            pl.BlockSpec((1, C), lambda b, t: (0, 0)),
        ],
        out_specs=pl.BlockSpec((None, tq, C), lambda b, t: (b, t, 0)),
        compiler_params=pltpu.CompilerParams(
            dimension_semantics=("parallel", "parallel")),
    )(q, k, v, wp, bp.reshape(1, C))


# ----------------------------------------------------------------------------
# Positional encodings (tiny, batch-independent tables -> plain JAX, f32)
# ----------------------------------------------------------------------------
def _coords_2d(ht, wd):
    ys, xs = jnp.meshgrid(jnp.arange(ht, dtype=jnp.float32),
                          jnp.arange(wd, dtype=jnp.float32), indexing="ij")
    return jnp.stack([xs, ys], axis=-1).reshape(ht * wd, 2)


def _linear_pos_embedding_sine(coords, dim):
    freq = jnp.linspace(0.0, dim // 4 - 1, dim // 4, dtype=jnp.float32)
    fx = 3.14 * coords[:, 0:1] * freq / 200.0
    fy = 3.14 * coords[:, 1:2] * freq / 200.0
    return jnp.concatenate([jnp.sin(fx), jnp.cos(fx), jnp.sin(fy), jnp.cos(fy)], axis=-1)


# ----------------------------------------------------------------------------
# Full forward (Pallas path)
# ----------------------------------------------------------------------------
@partial(jax.jit, static_argnums=(1, 4, 5, 6))
def gsa_rpe_context_forward(x, size, context, params, num_heads, sr_ratio, vert_c_dim):
    """Pallas implementation of GlobalSubSampleAttnRPEContext.forward (eval mode)."""
    B, N, C = x.shape
    H, W = size
    C_qk = C + vert_c_dim
    head_dim = C // num_heads
    scale = head_dim ** -0.5
    cdt = jnp.bfloat16          # MXU operand dtype; accumulation stays f32 in-kernel

    # ---- context: project once (no B-fold tile of the raw 256-channel tensor) ----
    Bc = context.shape[0]
    ctx_tok = context.reshape(Bc, -1, H * W).transpose(0, 2, 1).astype(cdt)    # (Bc,N,256)
    ctx_proj = _fused_linear(ctx_tok, params["Wc"].astype(cdt), params["bc"],
                             out_dtype=cdt)                                    # (Bc,N,Vc)
    ctx_proj = jnp.tile(ctx_proj, (B // Bc, 1, 1)).reshape(B, H, W, vert_c_dim)

    xh = x.astype(cdt).reshape(B, H, W, C)
    xqk_h = jnp.concatenate([xh, ctx_proj], axis=-1)

    # ---- pad spatial dims to multiples of sr_ratio (no-op when divisible) ----
    pad_r = (sr_ratio - W % sr_ratio) % sr_ratio
    pad_b = (sr_ratio - H % sr_ratio) % sr_ratio
    if pad_r or pad_b:
        xh = jnp.pad(xh, ((0, 0), (0, pad_b), (0, pad_r), (0, 0)))
        xqk_h = jnp.pad(xqk_h, ((0, 0), (0, pad_b), (0, pad_r), (0, 0)))
    Hp, Wp = H + pad_b, W + pad_r
    Np = Hp * Wp
    Hs, Ws = Hp // sr_ratio, Wp // sr_ratio
    Nkv = Hs * Ws
    sr = sr_ratio

    # ---- Q = Linear(x_qk + PE); softmax scale folded into Wq/bq at trace time ----
    pe_q = _linear_pos_embedding_sine(_coords_2d(Hp, Wp), C_qk)                # (Np, C_qk)
    q = _fused_linear(xqk_h.reshape(B, Np, C_qk),
                      (params["Wq"] * scale).astype(cdt), params["bq"] * scale,
                      pe=pe_q, out_dtype=cdt)                                  # (B,Np,C)

    # ---- sr "convs" (kernel=stride=sr) = patchify + matmul, LayerNorm fused ----
    # TODO(synk): patchify is still a wrapper reshape/transpose (one HBM copy);
    # moving it behind a BlockSpec needs an in-kernel relayout and was left out.
    patch_v = (xh.reshape(B, Hs, sr, Ws, sr, C)
               .transpose(0, 1, 3, 2, 4, 5).reshape(B, Nkv, sr * sr * C))
    patch_k = (xqk_h.reshape(B, Hs, sr, Ws, sr, C_qk)
               .transpose(0, 1, 3, 2, 4, 5).reshape(B, Nkv, sr * sr * C_qk))
    # PyTorch conv weight (Cout, Cin, kh, kw) -> (kh*kw*Cin, Cout), patch order (di,dj,ci)
    Wsrv2 = jnp.transpose(params["Wsrv"], (2, 3, 1, 0)).reshape(sr * sr * C, C).astype(cdt)
    Wsrk2 = jnp.transpose(params["Wsrk"], (2, 3, 1, 0)).reshape(sr * sr * C_qk, C).astype(cdt)
    ln = (params["g"], params["be"])
    v_in = _fused_linear(patch_v, Wsrv2, params["bsrv"], ln=ln, out_dtype=cdt)  # (B,Nkv,C)
    k_in = _fused_linear(patch_k, Wsrk2, params["bsrk"], ln=ln, out_dtype=cdt)  # (B,Nkv,C)

    # ---- K = Linear(norm(sr_key) + PE), V = Linear(norm(sr_value)) ----
    pe_k = _linear_pos_embedding_sine(_coords_2d(Hs, Ws) * sr_ratio, C)
    k = _fused_linear(k_in, params["Wk"].astype(cdt), params["bk"], pe=pe_k, out_dtype=cdt)
    v = _fused_linear(v_in, params["Wv"].astype(cdt), params["bv"], out_dtype=cdt)

    # ---- attention (heads split in-kernel) with the output projection fused ----
    o = _attention_proj(q, k, v, params["Wp"].astype(cdt), params["bp"],
                        num_heads, out_dtype=x.dtype)                           # (B,Np,C) f32
    o = o.reshape(B, Hp, Wp, C)
    if pad_r or pad_b:
        o = o[:, :H, :W, :]
    # TODO(synk): attn_drop / proj_drop are identity at inference (p=0.0); not implemented.
    return o.reshape(B, N, C)


# ----------------------------------------------------------------------------
# Pure-JAX f32 reference (mirrors the PyTorch forward, independent conv via lax.conv)
# ----------------------------------------------------------------------------
def reference_forward(x, size, context, params, num_heads, sr_ratio, vert_c_dim):
    B, N, C = x.shape
    H, W = size
    C_qk = C + vert_c_dim
    head_dim = C // num_heads
    scale = head_dim ** -0.5

    ctx = jnp.tile(context, (B // context.shape[0], 1, 1, 1))
    ctx = ctx.reshape(B, -1, H * W).transpose(0, 2, 1)
    ctx = ctx @ params["Wc"] + params["bc"]
    ctx = ctx.reshape(B, H, W, vert_c_dim)

    xh = x.reshape(B, H, W, C)
    x_qk = jnp.concatenate([xh, ctx], axis=-1)
    pad_r = (sr_ratio - W % sr_ratio) % sr_ratio
    pad_b = (sr_ratio - H % sr_ratio) % sr_ratio
    xh = jnp.pad(xh, ((0, 0), (0, pad_b), (0, pad_r), (0, 0)))
    x_qk = jnp.pad(x_qk, ((0, 0), (0, pad_b), (0, pad_r), (0, 0)))
    Hp, Wp = H + pad_b, W + pad_r
    Np = Hp * Wp
    Hs, Ws = Hp // sr_ratio, Wp // sr_ratio
    Nkv = Hs * Ws

    x_tok = xh.reshape(B, Np, C)
    xqk_tok = x_qk.reshape(B, Np, C_qk)

    pe_q = _linear_pos_embedding_sine(_coords_2d(Hp, Wp), C_qk)
    q = (xqk_tok + pe_q[None]) @ params["Wq"] + params["bq"]
    q = q.reshape(B, Np, num_heads, head_dim).transpose(0, 2, 1, 3)

    x_nchw = x_tok.transpose(0, 2, 1).reshape(B, C, Hp, Wp)
    xqk_nchw = xqk_tok.transpose(0, 2, 1).reshape(B, C_qk, Hp, Wp)
    v_in = lax.conv_general_dilated(x_nchw, params["Wsrv"], (sr_ratio, sr_ratio),
                                    "VALID", dimension_numbers=("NCHW", "OIHW", "NCHW"))
    v_in = v_in + params["bsrv"].reshape(1, C, 1, 1)
    k_in = lax.conv_general_dilated(xqk_nchw, params["Wsrk"], (sr_ratio, sr_ratio),
                                    "VALID", dimension_numbers=("NCHW", "OIHW", "NCHW"))
    k_in = k_in + params["bsrk"].reshape(1, C, 1, 1)
    v_in = v_in.reshape(B, C, Nkv).transpose(0, 2, 1)
    k_in = k_in.reshape(B, C, Nkv).transpose(0, 2, 1)

    def layer_norm(t):
        mu = jnp.mean(t, axis=-1, keepdims=True)
        var = jnp.mean((t - mu) ** 2, axis=-1, keepdims=True)
        return (t - mu) / jnp.sqrt(var + 1e-5) * params["g"] + params["be"]

    v_in = layer_norm(v_in)
    k_in = layer_norm(k_in)

    pe_k = _linear_pos_embedding_sine(_coords_2d(Hs, Ws) * sr_ratio, C)
    k = (k_in + pe_k[None]) @ params["Wk"] + params["bk"]
    v = v_in @ params["Wv"] + params["bv"]
    k = k.reshape(B, Nkv, num_heads, head_dim).transpose(0, 2, 1, 3)
    v = v.reshape(B, Nkv, num_heads, head_dim).transpose(0, 2, 1, 3)

    attn = jnp.einsum("bhqd,bhkd->bhqk", q, k) * scale
    attn = jax.nn.softmax(attn, axis=-1)
    o = jnp.einsum("bhqk,bhkd->bhqd", attn, v)
    o = o.transpose(0, 2, 1, 3).reshape(B, Hp, Wp, C)
    o = o[:, :H, :W, :].reshape(B, N, C)
    return o @ params["Wp"] + params["bp"]


# ----------------------------------------------------------------------------
if __name__ == "__main__":
    B, H, W = 2, 8, 8
    C = 128
    num_heads = 4
    vert_c_dim = 64
    sr_ratio = 2
    N = H * W
    C_qk = C + vert_c_dim

    key = jax.random.PRNGKey(0)
    keys = jax.random.split(key, 20)
    s = 0.05
    x = jax.random.normal(keys[0], (B, N, C), dtype=jnp.float32)
    context = jax.random.normal(keys[1], (1, 256, H, W), dtype=jnp.float32)

    params = dict(
        Wc=jax.random.normal(keys[2], (256, vert_c_dim), jnp.float32) * s,
        bc=jax.random.normal(keys[3], (vert_c_dim,), jnp.float32) * s,
        Wq=jax.random.normal(keys[4], (C_qk, C), jnp.float32) * s,
        bq=jax.random.normal(keys[5], (C,), jnp.float32) * s,
        Wk=jax.random.normal(keys[6], (C, C), jnp.float32) * s,
        bk=jax.random.normal(keys[7], (C,), jnp.float32) * s,
        Wv=jax.random.normal(keys[8], (C, C), jnp.float32) * s,
        bv=jax.random.normal(keys[9], (C,), jnp.float32) * s,
        Wp=jax.random.normal(keys[10], (C, C), jnp.float32) * s,
        bp=jax.random.normal(keys[11], (C,), jnp.float32) * s,
        Wsrk=jax.random.normal(keys[12], (C, C_qk, sr_ratio, sr_ratio), jnp.float32) * s,
        bsrk=jax.random.normal(keys[13], (C,), jnp.float32) * s,
        Wsrv=jax.random.normal(keys[14], (C, C, sr_ratio, sr_ratio), jnp.float32) * s,
        bsrv=jax.random.normal(keys[15], (C,), jnp.float32) * s,
        g=1.0 + 0.1 * jax.random.normal(keys[16], (C,), jnp.float32),
        be=0.1 * jax.random.normal(keys[17], (C,), jnp.float32),
    )

    out = gsa_rpe_context_forward(x, (H, W), context, params,
                                  num_heads, sr_ratio, vert_c_dim)
    out = jax.block_until_ready(out)

    ref = reference_forward(x, (H, W), context, params,
                            num_heads, sr_ratio, vert_c_dim)
    assert out.shape == (B, N, C)
    err = float(jnp.max(jnp.abs(out - ref)))
    # bf16 MXU operands (f32 accumulation) vs pure-f32 reference -> loosened tolerance.
    assert jnp.allclose(out, ref, atol=3e-2, rtol=3e-2), \
        f"mismatch vs reference, max abs err {err}"

    print("KERNEL_OK")
</pallas_src>

<mosaic_0001>
module attributes {stable_mosaic.version = 11 : i64} {
  func.func @kernel(%arg0: i32, %arg1: i32, %arg2: memref<1x64x256xbf16, #tpu.memory_space<vmem>>, %arg3: memref<256x64xbf16, #tpu.memory_space<vmem>>, %arg4: memref<1x64xf32, #tpu.memory_space<vmem>>, %arg5: memref<1x64x64xbf16, #tpu.memory_space<vmem>>) attributes {dimension_semantics = [#tpu.dimension_semantics<parallel>, #tpu.dimension_semantics<parallel>], iteration_bounds = array<i64: 1, 1>, scalar_prefetch = 0 : i64, scratch_operands = 0 : i64, tpu.core_type = #tpu.core_type<tc>, window_params = [{transform_indices = @transform_0, window_bounds = array<i64: 1, 64, 256>}, {pipeline_mode = #tpu.pipeline_mode<synchronous>, transform_indices = @transform_1, window_bounds = array<i64: 256, 64>}, {pipeline_mode = #tpu.pipeline_mode<synchronous>, transform_indices = @transform_2, window_bounds = array<i64: 1, 64>}, {transform_indices = @transform_3, window_bounds = array<i64: 1, 64, 64>}]} {
    %c0 = arith.constant 0 : index
    %c0_0 = arith.constant 0 : index
    %c0_1 = arith.constant 0 : index
    %0 = vector.load %arg2[%c0, %c0_0, %c0_1] : memref<1x64x256xbf16, #tpu.memory_space<vmem>>, vector<1x64x256xbf16>
    %1 = vector.shape_cast %0 : vector<1x64x256xbf16> to vector<64x256xbf16>
    %c0_2 = arith.constant 0 : index
    %c0_3 = arith.constant 0 : index
    %2 = vector.load %arg3[%c0_2, %c0_3] : memref<256x64xbf16, #tpu.memory_space<vmem>>, vector<256x64xbf16>
    %cst = arith.constant dense<0.000000e+00> : vector<64x64xf32>
    %3 = tpu.matmul %1, %2, %cst {dimension_numbers = #tpu.dot_dimension_numbers<[1], [0], [0], [1], [0, 0, 1, 1], [], []>} : vector<64x256xbf16>, vector<256x64xbf16>, vector<64x64xf32> -> vector<64x64xf32>
    %c0_4 = arith.constant 0 : index
    %c0_5 = arith.constant 0 : index
    %4 = vector.load %arg4[%c0_4, %c0_5] : memref<1x64xf32, #tpu.memory_space<vmem>>, vector<1x64xf32>
    %5 = vector.broadcast %4 : vector<1x64xf32> to vector<64x64xf32>
    %6 = arith.addf %3, %5 : vector<64x64xf32>
    %7 = arith.truncf %6 : vector<64x64xf32> to vector<64x64xbf16>
    %c0_6 = arith.constant 0 : index
    %c0_7 = arith.constant 0 : index
    %c0_8 = arith.constant 0 : index
    %8 = vector.load %arg5[%c0_6, %c0_7, %c0_8] : memref<1x64x64xbf16, #tpu.memory_space<vmem>>, vector<1x64x64xbf16>
    %9 = vector.shape_cast %8 : vector<1x64x64xbf16> to vector<64x64xbf16>
    %10 = vector.shape_cast %7 : vector<64x64xbf16> to vector<1x64x64xbf16>
    tpu.vector_store %arg5[%c0_6, %c0_7, %c0_8], %10 {strides = array<i32>} : memref<1x64x64xbf16, #tpu.memory_space<vmem>>, vector<1x64x64xbf16>,
    return
  }
  func.func @transform_0(%arg0: i32, %arg1: i32) -> (i32, i32, i32) {
    %c0_i32 = arith.constant 0 : i32
    %c0_i32_0 = arith.constant 0 : i32
    return %arg0, %arg1, %c0_i32 : i32, i32, i32
  }
  func.func @transform_1(%arg0: i32, %arg1: i32) -> (i32, i32) {
    %c0_i32 = arith.constant 0 : i32
    %c0_i32_0 = arith.constant 0 : i32
    %c0_i32_1 = arith.constant 0 : i32
    return %c0_i32, %c0_i32_0 : i32, i32
  }
  func.func @transform_2(%arg0: i32, %arg1: i32) -> (i32, i32) {
    %c0_i32 = arith.constant 0 : i32
    %c0_i32_0 = arith.constant 0 : i32
    %c0_i32_1 = arith.constant 0 : i32
    return %c0_i32, %c0_i32_0 : i32, i32
  }
  func.func @transform_3(%arg0: i32, %arg1: i32) -> (i32, i32, i32) {
    %c0_i32 = arith.constant 0 : i32
    %c0_i32_0 = arith.constant 0 : i32
    return %arg0, %arg1, %c0_i32 : i32, i32, i32
  }
}

module attributes {stable_mosaic.version = 11 : i64} {
  func.func @kernel(%arg0: i32, %arg1: i32, %arg2: memref<1x64x192xbf16, #tpu.memory_space<vmem>>, %arg3: memref<64x192xf32, #tpu.memory_space<vmem>>, %arg4: memref<192x128xbf16, #tpu.memory_space<vmem>>, %arg5: memref<1x128xf32, #tpu.memory_space<vmem>>, %arg6: memref<1x64x128xbf16, #tpu.memory_space<vmem>>) attributes {dimension_semantics = [#tpu.dimension_semantics<parallel>, #tpu.dimension_semantics<parallel>], iteration_bounds = array<i64: 2, 1>, scalar_prefetch = 0 : i64, scratch_operands = 0 : i64, tpu.core_type = #tpu.core_type<tc>, window_params = [{transform_indices = @transform_0, window_bounds = array<i64: 1, 64, 192>}, {transform_indices = @transform_1, window_bounds = array<i64: 64, 192>}, {pipeline_mode = #tpu.pipeline_mode<synchronous>, transform_indices = @transform_2, window_bounds = array<i64: 192, 128>}, {pipeline_mode = #tpu.pipeline_mode<synchronous>, transform_indices = @transform_3, window_bounds = array<i64: 1, 128>}, {transform_indices = @transform_4, window_bounds = array<i64: 1, 64, 128>}]} {
    %c0 = arith.constant 0 : index
    %c0_0 = arith.constant 0 : index
    %c0_1 = arith.constant 0 : index
    %0 = vector.load %arg2[%c0, %c0_0, %c0_1] : memref<1x64x192xbf16, #tpu.memory_space<vmem>>, vector<1x64x192xbf16>
    %1 = vector.shape_cast %0 : vector<1x64x192xbf16> to vector<64x192xbf16>
    %2 = arith.extf %1 : vector<64x192xbf16> to vector<64x192xf32>
    %c0_2 = arith.constant 0 : index
    %c0_3 = arith.constant 0 : index
    %3 = vector.load %arg3[%c0_2, %c0_3] : memref<64x192xf32, #tpu.memory_space<vmem>>, vector<64x192xf32>
    %4 = arith.addf %2, %3 : vector<64x192xf32>
    %5 = arith.truncf %4 : vector<64x192xf32> to vector<64x192xbf16>
    %c0_4 = arith.constant 0 : index
    %c0_5 = arith.constant 0 : index
    %6 = vector.load %arg4[%c0_4, %c0_5] : memref<192x128xbf16, #tpu.memory_space<vmem>>, vector<192x128xbf16>
    %cst = arith.constant dense<0.000000e+00> : vector<64x128xf32>
    %7 = tpu.matmul %5, %6, %cst {dimension_numbers = #tpu.dot_dimension_numbers<[1], [0], [0], [1], [0, 0, 1, 1], [], []>} : vector<64x192xbf16>, vector<192x128xbf16>, vector<64x128xf32> -> vector<64x128xf32>
    %c0_6 = arith.constant 0 : index
    %c0_7 = arith.constant 0 : index
    %8 = vector.load %arg5[%c0_6, %c0_7] : memref<1x128xf32, #tpu.memory_space<vmem>>, vector<1x128xf32>
    %9 = vector.broadcast %8 : vector<1x128xf32> to vector<64x128xf32>
    %10 = arith.addf %7, %9 : vector<64x128xf32>
    %11 = arith.truncf %10 : vector<64x128xf32> to vector<64x128xbf16>
    %c0_8 = arith.constant 0 : index
    %c0_9 = arith.constant 0 : index
    %c0_10 = arith.constant 0 : index
    %12 = vector.load %arg6[%c0_8, %c0_9, %c0_10] : memref<1x64x128xbf16, #tpu.memory_space<vmem>>, vector<1x64x128xbf16>
    %13 = vector.shape_cast %12 : vector<1x64x128xbf16> to vector<64x128xbf16>
    %14 = vector.shape_cast %11 : vector<64x128xbf16> to vector<1x64x128xbf16>
    tpu.vector_store %arg6[%c0_8, %c0_9, %c0_10], %14 {strides = array<i32>} : memref<1x64x128xbf16, #tpu.memory_space<vmem>>, vector<1x64x128xbf16>,
    return
  }
  func.func @transform_0(%arg0: i32, %arg1: i32) -> (i32, i32, i32) {
    %c0_i32 = arith.constant 0 : i32
    %c0_i32_0 = arith.constant 0 : i32
    return %arg0, %arg1, %c0_i32 : i32, i32, i32
  }
  func.func @transform_1(%arg0: i32, %arg1: i32) -> (i32, i32) {
    %c0_i32 = arith.constant 0 : i32
    %c0_i32_0 = arith.constant 0 : i32
    return %arg1, %c0_i32 : i32, i32
  }
  func.func @transform_2(%arg0: i32, %arg1: i32) -> (i32, i32) {
    %c0_i32 = arith.constant 0 : i32
    %c0_i32_0 = arith.constant 0 : i32
    %c0_i32_1 = arith.constant 0 : i32
    return %c0_i32, %c0_i32_0 : i32, i32
  }
  func.func @transform_3(%arg0: i32, %arg1: i32) -> (i32, i32) {
    %c0_i32 = arith.constant 0 : i32
    %c0_i32_0 = arith.constant 0 : i32
    %c0_i32_1 = arith.constant 0 : i32
    return %c0_i32, %c0_i32_0 : i32, i32
  }
  func.func @transform_4(%arg0: i32, %arg1: i32) -> (i32, i32, i32) {
    %c0_i32 = arith.constant 0 : i32
    %c0_i32_0 = arith.constant 0 : i32
    return %arg0, %arg1, %c0_i32 : i32, i32, i32
  }
}

module attributes {stable_mosaic.version = 11 : i64} {
  func.func @kernel(%arg0: i32, %arg1: i32, %arg2: memref<1x16x768xbf16, #tpu.memory_space<vmem>>, %arg3: memref<768x128xbf16, #tpu.memory_space<vmem>>, %arg4: memref<1x128xf32, #tpu.memory_space<vmem>>, %arg5: memref<1x128xf32, #tpu.memory_space<vmem>>, %arg6: memref<1x128xf32, #tpu.memory_space<vmem>>, %arg7: memref<1x16x128xbf16, #tpu.memory_space<vmem>>) attributes {dimension_semantics = [#tpu.dimension_semantics<parallel>, #tpu.dimension_semantics<parallel>], iteration_bounds = array<i64: 2, 1>, scalar_prefetch = 0 : i64, scratch_operands = 0 : i64, tpu.core_type = #tpu.core_type<tc>, window_params = [{transform_indices = @transform_0, window_bounds = array<i64: 1, 16, 768>}, {pipeline_mode = #tpu.pipeline_mode<synchronous>, transform_indices = @transform_1, window_bounds = array<i64: 768, 128>}, {pipeline_mode = #tpu.pipeline_mode<synchronous>, transform_indices = @transform_2, window_bounds = array<i64: 1, 128>}, {pipeline_mode = #tpu.pipeline_mode<synchronous>, transform_indices = @transform_3, window_bounds = array<i64: 1, 128>}, {pipeline_mode = #tpu.pipeline_mode<synchronous>, transform_indices = @transform_4, window_bounds = array<i64: 1, 128>}, {transform_indices = @transform_5, window_bounds = array<i64: 1, 16, 128>}]} {
    %c0 = arith.constant 0 : index
    %c0_0 = arith.constant 0 : index
    %c0_1 = arith.constant 0 : index
    %0 = vector.load %arg2[%c0, %c0_0, %c0_1] : memref<1x16x768xbf16, #tpu.memory_space<vmem>>, vector<1x16x768xbf16>
    %1 = vector.shape_cast %0 : vector<1x16x768xbf16> to vector<16x768xbf16>
    %c0_2 = arith.constant 0 : index
    %c0_3 = arith.constant 0 : index
    %2 = vector.load %arg3[%c0_2, %c0_3] : memref<768x128xbf16, #tpu.memory_space<vmem>>, vector<768x128xbf16>
    %cst = arith.constant dense<0.000000e+00> : vector<16x128xf32>
    %3 = tpu.matmul %1, %2, %cst {dimension_numbers = #tpu.dot_dimension_numbers<[1], [0], [0], [1], [0, 0, 1, 1], [], []>} : vector<16x768xbf16>, vector<768x128xbf16>, vector<16x128xf32> -> vector<16x128xf32>
    %c0_4 = arith.constant 0 : index
    %c0_5 = arith.constant 0 : index
    %4 = vector.load %arg4[%c0_4, %c0_5] : memref<1x128xf32, #tpu.memory_space<vmem>>, vector<1x128xf32>
    %5 = vector.broadcast %4 : vector<1x128xf32> to vector<16x128xf32>
    %6 = arith.addf %3, %5 : vector<16x128xf32>
    %cst_6 = arith.constant dense<0.000000e+00> : vector<16xf32>
    %7 = vector.multi_reduction <add>, %6, %cst_6 [1] : vector<16x128xf32> to vector<16xf32>
    %8 = vector.shape_cast %7 : vector<16xf32> to vector<16x1xf32>
    %cst_7 = arith.constant 1.280000e+02 : f32
    %9 = vector.broadcast %cst_7 : f32 to vector<16x1xf32>
    %10 = arith.divf %8, %9 : vector<16x1xf32>
    %11 = vector.broadcast %10 : vector<16x1xf32> to vector<16x128xf32>
    %12 = arith.subf %6, %11 : vector<16x128xf32>
    %13 = arith.mulf %12, %12 : vector<16x128xf32>
    %cst_8 = arith.constant dense<0.000000e+00> : vector<16xf32>
    %14 = vector.multi_reduction <add>, %13, %cst_8 [1] : vector<16x128xf32> to vector<16xf32>
    %15 = vector.shape_cast %14 : vector<16xf32> to vector<16x1xf32>
    %cst_9 = arith.constant 1.280000e+02 : f32
    %16 = vector.broadcast %cst_9 : f32 to vector<16x1xf32>
    %17 = arith.divf %15, %16 : vector<16x1xf32>
    %18 = vector.broadcast %10 : vector<16x1xf32> to vector<16x128xf32>
    %19 = arith.subf %6, %18 : vector<16x128xf32>
    %cst_10 = arith.constant 9.99999974E-6 : f32
    %20 = vector.broadcast %cst_10 : f32 to vector<16x1xf32>
    %21 = arith.addf %17, %20 : vector<16x1xf32>
    %22 = math.rsqrt %21 : vector<16x1xf32>
    %23 = vector.broadcast %22 : vector<16x1xf32> to vector<16x128xf32>
    %24 = arith.mulf %19, %23 : vector<16x128xf32>
    %c0_11 = arith.constant 0 : index
    %c0_12 = arith.constant 0 : index
    %25 = vector.load %arg5[%c0_11, %c0_12] : memref<1x128xf32, #tpu.memory_space<vmem>>, vector<1x128xf32>
    %26 = vector.broadcast %25 : vector<1x128xf32> to vector<16x128xf32>
    %27 = arith.mulf %24, %26 : vector<16x128xf32>
    %c0_13 = arith.constant 0 : index
    %c0_14 = arith.constant 0 : index
    %28 = vector.load %arg6[%c0_13, %c0_14] : memref<1x128xf32, #tpu.memory_space<vmem>>, vector<1x128xf32>
    %29 = vector.broadcast %28 : vector<1x128xf32> to vector<16x128xf32>
    %30 = arith.addf %27, %29 : vector<16x128xf32>
    %31 = arith.truncf %30 : vector<16x128xf32> to vector<16x128xbf16>
    %c0_15 = arith.constant 0 : index
    %c0_16 = arith.constant 0 : index
    %c0_17 = arith.constant 0 : index
    %32 = vector.load %arg7[%c0_15, %c0_16, %c0_17] : memref<1x16x128xbf16, #tpu.memory_space<vmem>>, vector<1x16x128xbf16>
    %33 = vector.shape_cast %32 : vector<1x16x128xbf16> to vector<16x128xbf16>
    %34 = vector.shape_cast %31 : vector<16x128xbf16> to vector<1x16x128xbf16>
    tpu.vector_store %arg7[%c0_15, %c0_16, %c0_17], %34 {strides = array<i32>} : memref<1x16x128xbf16, #tpu.memory_space<vmem>>, vector<1x16x128xbf16>,
    return
  }
  func.func @transform_0(%arg0: i32, %arg1: i32) -> (i32, i32, i32) {
    %c0_i32 = arith.constant 0 : i32
    %c0_i32_0 = arith.constant 0 : i32
    return %arg0, %arg1, %c0_i32 : i32, i32, i32
  }
  func.func @transform_1(%arg0: i32, %arg1: i32) -> (i32, i32) {
    %c0_i32 = arith.constant 0 : i32
    %c0_i32_0 = arith.constant 0 : i32
    %c0_i32_1 = arith.constant 0 : i32
    return %c0_i32, %c0_i32_0 : i32, i32
  }
  func.func @transform_2(%arg0: i32, %arg1: i32) -> (i32, i32) {
    %c0_i32 = arith.constant 0 : i32
    %c0_i32_0 = arith.constant 0 : i32
    %c0_i32_1 = arith.constant 0 : i32
    return %c0_i32, %c0_i32_0 : i32, i32
  }
  func.func @transform_3(%arg0: i32, %arg1: i32) -> (i32, i32) {
    %c0_i32 = arith.constant 0 : i32
    %c0_i32_0 = arith.constant 0 : i32
    %c0_i32_1 = arith.constant 0 : i32
    return %c0_i32, %c0_i32_0 : i32, i32
  }
  func.func @transform_4(%arg0: i32, %arg1: i32) -> (i32, i32) {
    %c0_i32 = arith.constant 0 : i32
    %c0_i32_0 = arith.constant 0 : i32
    %c0_i32_1 = arith.constant 0 : i32
    return %c0_i32, %c0_i32_0 : i32, i32
  }
  func.func @transform_5(%arg0: i32, %arg1: i32) -> (i32, i32, i32) {
    %c0_i32 = arith.constant 0 : i32
    %c0_i32_0 = arith.constant 0 : i32
    return %arg0, %arg1, %c0_i32 : i32, i32, i32
  }
}

module attributes {stable_mosaic.version = 11 : i64} {
  func.func @kernel(%arg0: i32, %arg1: i32, %arg2: memref<1x16x128xbf16, #tpu.memory_space<vmem>>, %arg3: memref<16x128xf32, #tpu.memory_space<vmem>>, %arg4: memref<128x128xbf16, #tpu.memory_space<vmem>>, %arg5: memref<1x128xf32, #tpu.memory_space<vmem>>, %arg6: memref<1x16x128xbf16, #tpu.memory_space<vmem>>) attributes {dimension_semantics = [#tpu.dimension_semantics<parallel>, #tpu.dimension_semantics<parallel>], iteration_bounds = array<i64: 2, 1>, scalar_prefetch = 0 : i64, scratch_operands = 0 : i64, tpu.core_type = #tpu.core_type<tc>, window_params = [{transform_indices = @transform_0, window_bounds = array<i64: 1, 16, 128>}, {transform_indices = @transform_1, window_bounds = array<i64: 16, 128>}, {pipeline_mode = #tpu.pipeline_mode<synchronous>, transform_indices = @transform_2, window_bounds = array<i64: 128, 128>}, {pipeline_mode = #tpu.pipeline_mode<synchronous>, transform_indices = @transform_3, window_bounds = array<i64: 1, 128>}, {transform_indices = @transform_4, window_bounds = array<i64: 1, 16, 128>}]} {
    %c0 = arith.constant 0 : index
    %c0_0 = arith.constant 0 : index
    %c0_1 = arith.constant 0 : index
    %0 = vector.load %arg2[%c0, %c0_0, %c0_1] : memref<1x16x128xbf16, #tpu.memory_space<vmem>>, vector<1x16x128xbf16>
    %1 = vector.shape_cast %0 : vector<1x16x128xbf16> to vector<16x128xbf16>
    %2 = arith.extf %1 : vector<16x128xbf16> to vector<16x128xf32>
    %c0_2 = arith.constant 0 : index
    %c0_3 = arith.constant 0 : index
    %3 = vector.load %arg3[%c0_2, %c0_3] : memref<16x128xf32, #tpu.memory_space<vmem>>, vector<16x128xf32>
    %4 = arith.addf %2, %3 : vector<16x128xf32>
    %5 = arith.truncf %4 : vector<16x128xf32> to vector<16x128xbf16>
    %c0_4 = arith.constant 0 : index
    %c0_5 = arith.constant 0 : index
    %6 = vector.load %arg4[%c0_4, %c0_5] : memref<128x128xbf16, #tpu.memory_space<vmem>>, vector<128x128xbf16>
    %cst = arith.constant dense<0.000000e+00> : vector<16x128xf32>
    %7 = tpu.matmul %5, %6, %cst {dimension_numbers = #tpu.dot_dimension_numbers<[1], [0], [0], [1], [0, 0, 1, 1], [], []>} : vector<16x128xbf16>, vector<128x128xbf16>, vector<16x128xf32> -> vector<16x128xf32>
    %c0_6 = arith.constant 0 : index
    %c0_7 = arith.constant 0 : index
    %8 = vector.load %arg5[%c0_6, %c0_7] : memref<1x128xf32, #tpu.memory_space<vmem>>, vector<1x128xf32>
    %9 = vector.broadcast %8 : vector<1x128xf32> to vector<16x128xf32>
    %10 = arith.addf %7, %9 : vector<16x128xf32>
    %11 = arith.truncf %10 : vector<16x128xf32> to vector<16x128xbf16>
    %c0_8 = arith.constant 0 : index
    %c0_9 = arith.constant 0 : index
    %c0_10 = arith.constant 0 : index
    %12 = vector.load %arg6[%c0_8, %c0_9, %c0_10] : memref<1x16x128xbf16, #tpu.memory_space<vmem>>, vector<1x16x128xbf16>
    %13 = vector.shape_cast %12 : vector<1x16x128xbf16> to vector<16x128xbf16>
    %14 = vector.shape_cast %11 : vector<16x128xbf16> to vector<1x16x128xbf16>
    tpu.vector_store %arg6[%c0_8, %c0_9, %c0_10], %14 {strides = array<i32>} : memref<1x16x128xbf16, #tpu.memory_space<vmem>>, vector<1x16x128xbf16>,
    return
  }
  func.func @transform_0(%arg0: i32, %arg1: i32) -> (i32, i32, i32) {
    %c0_i32 = arith.constant 0 : i32
    %c0_i32_0 = arith.constant 0 : i32
    return %arg0, %arg1, %c0_i32 : i32, i32, i32
  }
  func.func @transform_1(%arg0: i32, %arg1: i32) -> (i32, i32) {
    %c0_i32 = arith.constant 0 : i32
    %c0_i32_0 = arith.constant 0 : i32
    return %arg1, %c0_i32 : i32, i32
  }
  func.func @transform_2(%arg0: i32, %arg1: i32) -> (i32, i32) {
    %c0_i32 = arith.constant 0 : i32
    %c0_i32_0 = arith.constant 0 : i32
    %c0_i32_1 = arith.constant 0 : i32
    return %c0_i32, %c0_i32_0 : i32, i32
  }
  func.func @transform_3(%arg0: i32, %arg1: i32) -> (i32, i32) {
    %c0_i32 = arith.constant 0 : i32
    %c0_i32_0 = arith.constant 0 : i32
    %c0_i32_1 = arith.constant 0 : i32
    return %c0_i32, %c0_i32_0 : i32, i32
  }
  func.func @transform_4(%arg0: i32, %arg1: i32) -> (i32, i32, i32) {
    %c0_i32 = arith.constant 0 : i32
    %c0_i32_0 = arith.constant 0 : i32
    return %arg0, %arg1, %c0_i32 : i32, i32, i32
  }
}

module attributes {stable_mosaic.version = 11 : i64} {
  func.func @kernel(%arg0: i32, %arg1: i32, %arg2: memref<1x16x128xbf16, #tpu.memory_space<vmem>>, %arg3: memref<128x128xbf16, #tpu.memory_space<vmem>>, %arg4: memref<1x128xf32, #tpu.memory_space<vmem>>, %arg5: memref<1x16x128xbf16, #tpu.memory_space<vmem>>) attributes {dimension_semantics = [#tpu.dimension_semantics<parallel>, #tpu.dimension_semantics<parallel>], iteration_bounds = array<i64: 2, 1>, scalar_prefetch = 0 : i64, scratch_operands = 0 : i64, tpu.core_type = #tpu.core_type<tc>, window_params = [{transform_indices = @transform_0, window_bounds = array<i64: 1, 16, 128>}, {pipeline_mode = #tpu.pipeline_mode<synchronous>, transform_indices = @transform_1, window_bounds = array<i64: 128, 128>}, {pipeline_mode = #tpu.pipeline_mode<synchronous>, transform_indices = @transform_2, window_bounds = array<i64: 1, 128>}, {transform_indices = @transform_3, window_bounds = array<i64: 1, 16, 128>}]} {
    %c0 = arith.constant 0 : index
    %c0_0 = arith.constant 0 : index
    %c0_1 = arith.constant 0 : index
    %0 = vector.load %arg2[%c0, %c0_0, %c0_1] : memref<1x16x128xbf16, #tpu.memory_space<vmem>>, vector<1x16x128xbf16>
    %1 = vector.shape_cast %0 : vector<1x16x128xbf16> to vector<16x128xbf16>
    %c0_2 = arith.constant 0 : index
    %c0_3 = arith.constant 0 : index
    %2 = vector.load %arg3[%c0_2, %c0_3] : memref<128x128xbf16, #tpu.memory_space<vmem>>, vector<128x128xbf16>
    %cst = arith.constant dense<0.000000e+00> : vector<16x128xf32>
    %3 = tpu.matmul %1, %2, %cst {dimension_numbers = #tpu.dot_dimension_numbers<[1], [0], [0], [1], [0, 0, 1, 1], [], []>} : vector<16x128xbf16>, vector<128x128xbf16>, vector<16x128xf32> -> vector<16x128xf32>
    %c0_4 = arith.constant 0 : index
    %c0_5 = arith.constant 0 : index
    %4 = vector.load %arg4[%c0_4, %c0_5] : memref<1x128xf32, #tpu.memory_space<vmem>>, vector<1x128xf32>
    %5 = vector.broadcast %4 : vector<1x128xf32> to vector<16x128xf32>
    %6 = arith.addf %3, %5 : vector<16x128xf32>
    %7 = arith.truncf %6 : vector<16x128xf32> to vector<16x128xbf16>
    %c0_6 = arith.constant 0 : index
    %c0_7 = arith.constant 0 : index
    %c0_8 = arith.constant 0 : index
    %8 = vector.load %arg5[%c0_6, %c0_7, %c0_8] : memref<1x16x128xbf16, #tpu.memory_space<vmem>>, vector<1x16x128xbf16>
    %9 = vector.shape_cast %8 : vector<1x16x128xbf16> to vector<16x128xbf16>
    %10 = vector.shape_cast %7 : vector<16x128xbf16> to vector<1x16x128xbf16>
    tpu.vector_store %arg5[%c0_6, %c0_7, %c0_8], %10 {strides = array<i32>} : memref<1x16x128xbf16, #tpu.memory_space<vmem>>, vector<1x16x128xbf16>,
    return
  }
  func.func @transform_0(%arg0: i32, %arg1: i32) -> (i32, i32, i32) {
    %c0_i32 = arith.constant 0 : i32
    %c0_i32_0 = arith.constant 0 : i32
    return %arg0, %arg1, %c0_i32 : i32, i32, i32
  }
  func.func @transform_1(%arg0: i32, %arg1: i32) -> (i32, i32) {
    %c0_i32 = arith.constant 0 : i32
    %c0_i32_0 = arith.constant 0 : i32
    %c0_i32_1 = arith.constant 0 : i32
    return %c0_i32, %c0_i32_0 : i32, i32
  }
  func.func @transform_2(%arg0: i32, %arg1: i32) -> (i32, i32) {
    %c0_i32 = arith.constant 0 : i32
    %c0_i32_0 = arith.constant 0 : i32
    %c0_i32_1 = arith.constant 0 : i32
    return %c0_i32, %c0_i32_0 : i32, i32
  }
  func.func @transform_3(%arg0: i32, %arg1: i32) -> (i32, i32, i32) {
    %c0_i32 = arith.constant 0 : i32
    %c0_i32_0 = arith.constant 0 : i32
    return %arg0, %arg1, %c0_i32 : i32, i32, i32
  }
}

module attributes {stable_mosaic.version = 11 : i64} {
  func.func @kernel(%arg0: i32, %arg1: i32, %arg2: memref<1x16x512xbf16, #tpu.memory_space<vmem>>, %arg3: memref<512x128xbf16, #tpu.memory_space<vmem>>, %arg4: memref<1x128xf32, #tpu.memory_space<vmem>>, %arg5: memref<1x128xf32, #tpu.memory_space<vmem>>, %arg6: memref<1x128xf32, #tpu.memory_space<vmem>>, %arg7: memref<1x16x128xbf16, #tpu.memory_space<vmem>>) attributes {dimension_semantics = [#tpu.dimension_semantics<parallel>, #tpu.dimension_semantics<parallel>], iteration_bounds = array<i64: 2, 1>, scalar_prefetch = 0 : i64, scratch_operands = 0 : i64, tpu.core_type = #tpu.core_type<tc>, window_params = [{transform_indices = @transform_0, window_bounds = array<i64: 1, 16, 512>}, {pipeline_mode = #tpu.pipeline_mode<synchronous>, transform_indices = @transform_1, window_bounds = array<i64: 512, 128>}, {pipeline_mode = #tpu.pipeline_mode<synchronous>, transform_indices = @transform_2, window_bounds = array<i64: 1, 128>}, {pipeline_mode = #tpu.pipeline_mode<synchronous>, transform_indices = @transform_3, window_bounds = array<i64: 1, 128>}, {pipeline_mode = #tpu.pipeline_mode<synchronous>, transform_indices = @transform_4, window_bounds = array<i64: 1, 128>}, {transform_indices = @transform_5, window_bounds = array<i64: 1, 16, 128>}]} {
    %c0 = arith.constant 0 : index
    %c0_0 = arith.constant 0 : index
    %c0_1 = arith.constant 0 : index
    %0 = vector.load %arg2[%c0, %c0_0, %c0_1] : memref<1x16x512xbf16, #tpu.memory_space<vmem>>, vector<1x16x512xbf16>
    %1 = vector.shape_cast %0 : vector<1x16x512xbf16> to vector<16x512xbf16>
    %c0_2 = arith.constant 0 : index
    %c0_3 = arith.constant 0 : index
    %2 = vector.load %arg3[%c0_2, %c0_3] : memref<512x128xbf16, #tpu.memory_space<vmem>>, vector<512x128xbf16>
    %cst = arith.constant dense<0.000000e+00> : vector<16x128xf32>
    %3 = tpu.matmul %1, %2, %cst {dimension_numbers = #tpu.dot_dimension_numbers<[1], [0], [0], [1], [0, 0, 1, 1], [], []>} : vector<16x512xbf16>, vector<512x128xbf16>, vector<16x128xf32> -> vector<16x128xf32>
    %c0_4 = arith.constant 0 : index
    %c0_5 = arith.constant 0 : index
    %4 = vector.load %arg4[%c0_4, %c0_5] : memref<1x128xf32, #tpu.memory_space<vmem>>, vector<1x128xf32>
    %5 = vector.broadcast %4 : vector<1x128xf32> to vector<16x128xf32>
    %6 = arith.addf %3, %5 : vector<16x128xf32>
    %cst_6 = arith.constant dense<0.000000e+00> : vector<16xf32>
    %7 = vector.multi_reduction <add>, %6, %cst_6 [1] : vector<16x128xf32> to vector<16xf32>
    %8 = vector.shape_cast %7 : vector<16xf32> to vector<16x1xf32>
    %cst_7 = arith.constant 1.280000e+02 : f32
    %9 = vector.broadcast %cst_7 : f32 to vector<16x1xf32>
    %10 = arith.divf %8, %9 : vector<16x1xf32>
    %11 = vector.broadcast %10 : vector<16x1xf32> to vector<16x128xf32>
    %12 = arith.subf %6, %11 : vector<16x128xf32>
    %13 = arith.mulf %12, %12 : vector<16x128xf32>
    %cst_8 = arith.constant dense<0.000000e+00> : vector<16xf32>
    %14 = vector.multi_reduction <add>, %13, %cst_8 [1] : vector<16x128xf32> to vector<16xf32>
    %15 = vector.shape_cast %14 : vector<16xf32> to vector<16x1xf32>
    %cst_9 = arith.constant 1.280000e+02 : f32
    %16 = vector.broadcast %cst_9 : f32 to vector<16x1xf32>
    %17 = arith.divf %15, %16 : vector<16x1xf32>
    %18 = vector.broadcast %10 : vector<16x1xf32> to vector<16x128xf32>
    %19 = arith.subf %6, %18 : vector<16x128xf32>
    %cst_10 = arith.constant 9.99999974E-6 : f32
    %20 = vector.broadcast %cst_10 : f32 to vector<16x1xf32>
    %21 = arith.addf %17, %20 : vector<16x1xf32>
    %22 = math.rsqrt %21 : vector<16x1xf32>
    %23 = vector.broadcast %22 : vector<16x1xf32> to vector<16x128xf32>
    %24 = arith.mulf %19, %23 : vector<16x128xf32>
    %c0_11 = arith.constant 0 : index
    %c0_12 = arith.constant 0 : index
    %25 = vector.load %arg5[%c0_11, %c0_12] : memref<1x128xf32, #tpu.memory_space<vmem>>, vector<1x128xf32>
    %26 = vector.broadcast %25 : vector<1x128xf32> to vector<16x128xf32>
    %27 = arith.mulf %24, %26 : vector<16x128xf32>
    %c0_13 = arith.constant 0 : index
    %c0_14 = arith.constant 0 : index
    %28 = vector.load %arg6[%c0_13, %c0_14] : memref<1x128xf32, #tpu.memory_space<vmem>>, vector<1x128xf32>
    %29 = vector.broadcast %28 : vector<1x128xf32> to vector<16x128xf32>
    %30 = arith.addf %27, %29 : vector<16x128xf32>
    %31 = arith.truncf %30 : vector<16x128xf32> to vector<16x128xbf16>
    %c0_15 = arith.constant 0 : index
    %c0_16 = arith.constant 0 : index
    %c0_17 = arith.constant 0 : index
    %32 = vector.load %arg7[%c0_15, %c0_16, %c0_17] : memref<1x16x128xbf16, #tpu.memory_space<vmem>>, vector<1x16x128xbf16>
    %33 = vector.shape_cast %32 : vector<1x16x128xbf16> to vector<16x128xbf16>
    %34 = vector.shape_cast %31 : vector<16x128xbf16> to vector<1x16x128xbf16>
    tpu.vector_store %arg7[%c0_15, %c0_16, %c0_17], %34 {strides = array<i32>} : memref<1x16x128xbf16, #tpu.memory_space<vmem>>, vector<1x16x128xbf16>,
    return
  }
  func.func @transform_0(%arg0: i32, %arg1: i32) -> (i32, i32, i32) {
    %c0_i32 = arith.constant 0 : i32
    %c0_i32_0 = arith.constant 0 : i32
    return %arg0, %arg1, %c0_i32 : i32, i32, i32
  }
  func.func @transform_1(%arg0: i32, %arg1: i32) -> (i32, i32) {
    %c0_i32 = arith.constant 0 : i32
    %c0_i32_0 = arith.constant 0 : i32
    %c0_i32_1 = arith.constant 0 : i32
    return %c0_i32, %c0_i32_0 : i32, i32
  }
  func.func @transform_2(%arg0: i32, %arg1: i32) -> (i32, i32) {
    %c0_i32 = arith.constant 0 : i32
    %c0_i32_0 = arith.constant 0 : i32
    %c0_i32_1 = arith.constant 0 : i32
    return %c0_i32, %c0_i32_0 : i32, i32
  }
  func.func @transform_3(%arg0: i32, %arg1: i32) -> (i32, i32) {
    %c0_i32 = arith.constant 0 : i32
    %c0_i32_0 = arith.constant 0 : i32
    %c0_i32_1 = arith.constant 0 : i32
    return %c0_i32, %c0_i32_0 : i32, i32
  }
  func.func @transform_4(%arg0: i32, %arg1: i32) -> (i32, i32) {
    %c0_i32 = arith.constant 0 : i32
    %c0_i32_0 = arith.constant 0 : i32
    %c0_i32_1 = arith.constant 0 : i32
    return %c0_i32, %c0_i32_0 : i32, i32
  }
  func.func @transform_5(%arg0: i32, %arg1: i32) -> (i32, i32, i32) {
    %c0_i32 = arith.constant 0 : i32
    %c0_i32_0 = arith.constant 0 : i32
    return %arg0, %arg1, %c0_i32 : i32, i32, i32
  }
}

module attributes {stable_mosaic.version = 11 : i64} {
  func.func @kernel(%arg0: i32, %arg1: i32, %arg2: memref<1x64x128xbf16, #tpu.memory_space<vmem>>, %arg3: memref<1x16x128xbf16, #tpu.memory_space<vmem>>, %arg4: memref<1x16x128xbf16, #tpu.memory_space<vmem>>, %arg5: memref<128x128xbf16, #tpu.memory_space<vmem>>, %arg6: memref<1x128xf32, #tpu.memory_space<vmem>>, %arg7: memref<1x64x128xf32, #tpu.memory_space<vmem>>) attributes {dimension_semantics = [#tpu.dimension_semantics<parallel>, #tpu.dimension_semantics<parallel>], iteration_bounds = array<i64: 2, 1>, scalar_prefetch = 0 : i64, scratch_operands = 0 : i64, tpu.core_type = #tpu.core_type<tc>, window_params = [{transform_indices = @transform_0, window_bounds = array<i64: 1, 64, 128>}, {transform_indices = @transform_1, window_bounds = array<i64: 1, 16, 128>}, {transform_indices = @transform_2, window_bounds = array<i64: 1, 16, 128>}, {pipeline_mode = #tpu.pipeline_mode<synchronous>, transform_indices = @transform_3, window_bounds = array<i64: 128, 128>}, {pipeline_mode = #tpu.pipeline_mode<synchronous>, transform_indices = @transform_4, window_bounds = array<i64: 1, 128>}, {transform_indices = @transform_5, window_bounds = array<i64: 1, 64, 128>}]} {
    %c0 = arith.constant 0 : index
    %c0_0 = arith.constant 0 : index
    %c0_1 = arith.constant 0 : index
    %0 = vector.load %arg2[%c0, %c0_0, %c0_1] : memref<1x64x128xbf16, #tpu.memory_space<vmem>>, vector<1x64x128xbf16>
    %1 = vector.shape_cast %0 : vector<1x64x128xbf16> to vector<64x128xbf16>
    %c0_2 = arith.constant 0 : index
    %c0_3 = arith.constant 0 : index
    %c0_4 = arith.constant 0 : index
    %2 = vector.load %arg3[%c0_2, %c0_3, %c0_4] : memref<1x16x128xbf16, #tpu.memory_space<vmem>>, vector<1x16x128xbf16>
    %3 = vector.shape_cast %2 : vector<1x16x128xbf16> to vector<16x128xbf16>
    %c0_5 = arith.constant 0 : index
    %c0_6 = arith.constant 0 : index
    %c0_7 = arith.constant 0 : index
    %4 = vector.load %arg4[%c0_5, %c0_6, %c0_7] : memref<1x16x128xbf16, #tpu.memory_space<vmem>>, vector<1x16x128xbf16>
    %5 = vector.shape_cast %4 : vector<1x16x128xbf16> to vector<16x128xbf16>
    %c0_8 = arith.constant 0 : index
    %c0_9 = arith.constant 0 : index
    %6 = vector.load %arg5[%c0_8, %c0_9] : memref<128x128xbf16, #tpu.memory_space<vmem>>, vector<128x128xbf16>
    %cst = arith.constant 0.000000e+00 : f32
    %7 = vector.broadcast %cst : f32 to vector<64x128xf32>
    %8 = vector.extract_strided_slice %1 {offsets = [0, 0], sizes = [64, 32], strides = [1, 1]} : vector<64x128xbf16> to vector<64x32xbf16>
    %9 = vector.extract_strided_slice %3 {offsets = [0, 0], sizes = [16, 32], strides = [1, 1]} : vector<16x128xbf16> to vector<16x32xbf16>
    %cst_10 = arith.constant dense<0.000000e+00> : vector<64x16xf32>
    %10 = tpu.matmul %8, %9, %cst_10 {dimension_numbers = #tpu.dot_dimension_numbers<[1], [1], [0], [0], [0, 0, 1, 0], [], []>} : vector<64x32xbf16>, vector<16x32xbf16>, vector<64x16xf32> -> vector<64x16xf32>
    %cst_11 = arith.constant dense<0xFF800000> : vector<64xf32>
    %11 = vector.multi_reduction <maximumf>, %10, %cst_11 [1] : vector<64x16xf32> to vector<64xf32>
    %12 = vector.shape_cast %11 : vector<64xf32> to vector<64x1xf32>
    %13 = vector.broadcast %12 : vector<64x1xf32> to vector<64x16xf32>
    %14 = arith.subf %10, %13 : vector<64x16xf32>
    %15 = math.exp %14 : vector<64x16xf32>
    %cst_12 = arith.constant dense<0.000000e+00> : vector<64xf32>
    %16 = vector.multi_reduction <add>, %15, %cst_12 [1] : vector<64x16xf32> to vector<64xf32>
    %17 = vector.shape_cast %16 : vector<64xf32> to vector<64x1xf32>
    %18 = arith.truncf %15 : vector<64x16xf32> to vector<64x16xbf16>
    %19 = vector.extract_strided_slice %5 {offsets = [0, 0], sizes = [16, 32], strides = [1, 1]} : vector<16x128xbf16> to vector<16x32xbf16>
    %cst_13 = arith.constant dense<0.000000e+00> : vector<64x32xf32>
    %20 = tpu.matmul %18, %19, %cst_13 {dimension_numbers = #tpu.dot_dimension_numbers<[1], [0], [0], [1], [0, 0, 1, 1], [], []>} : vector<64x16xbf16>, vector<16x32xbf16>, vector<64x32xf32> -> vector<64x32xf32>
    %21 = tpu.reciprocal %17 {approx = true} : vector<64x1xf32> -> vector<64x1xf32>
    %22 = vector.broadcast %21 : vector<64x1xf32> to vector<64x32xf32>
    %23 = arith.mulf %20, %22 : vector<64x32xf32>
    %24 = arith.truncf %23 : vector<64x32xf32> to vector<64x32xbf16>
    %25 = vector.extract_strided_slice %6 {offsets = [0, 0], sizes = [32, 128], strides = [1, 1]} : vector<128x128xbf16> to vector<32x128xbf16>
    %cst_14 = arith.constant dense<0.000000e+00> : vector<64x128xf32>
    %26 = tpu.matmul %24, %25, %cst_14 {dimension_numbers = #tpu.dot_dimension_numbers<[1], [0], [0], [1], [0, 0, 1, 1], [], []>} : vector<64x32xbf16>, vector<32x128xbf16>, vector<64x128xf32> -> vector<64x128xf32>
    %27 = arith.addf %7, %26 : vector<64x128xf32>
    %28 = vector.extract_strided_slice %1 {offsets = [0, 32], sizes = [64, 32], strides = [1, 1]} : vector<64x128xbf16> to vector<64x32xbf16>
    %29 = vector.extract_strided_slice %3 {offsets = [0, 32], sizes = [16, 32], strides = [1, 1]} : vector<16x128xbf16> to vector<16x32xbf16>
    %cst_15 = arith.constant dense<0.000000e+00> : vector<64x16xf32>
    %30 = tpu.matmul %28, %29, %cst_15 {dimension_numbers = #tpu.dot_dimension_numbers<[1], [1], [0], [0], [0, 0, 1, 0], [], []>} : vector<64x32xbf16>, vector<16x32xbf16>, vector<64x16xf32> -> vector<64x16xf32>
    %cst_16 = arith.constant dense<0xFF800000> : vector<64xf32>
    %31 = vector.multi_reduction <maximumf>, %30, %cst_16 [1] : vector<64x16xf32> to vector<64xf32>
    %32 = vector.shape_cast %31 : vector<64xf32> to vector<64x1xf32>
    %33 = vector.broadcast %32 : vector<64x1xf32> to vector<64x16xf32>
    %34 = arith.subf %30, %33 : vector<64x16xf32>
    %35 = math.exp %34 : vector<64x16xf32>
    %cst_17 = arith.constant dense<0.000000e+00> : vector<64xf32>
    %36 = vector.multi_reduction <add>, %35, %cst_17 [1] : vector<64x16xf32> to vector<64xf32>
    %37 = vector.shape_cast %36 : vector<64xf32> to vector<64x1xf32>
    %38 = arith.truncf %35 : vector<64x16xf32> to vector<64x16xbf16>
    %39 = vector.extract_strided_slice %5 {offsets = [0, 32], sizes = [16, 32], strides = [1, 1]} : vector<16x128xbf16> to vector<16x32xbf16>
    %cst_18 = arith.constant dense<0.000000e+00> : vector<64x32xf32>
    %40 = tpu.matmul %38, %39, %cst_18 {dimension_numbers = #tpu.dot_dimension_numbers<[1], [0], [0], [1], [0, 0, 1, 1], [], []>} : vector<64x16xbf16>, vector<16x32xbf16>, vector<64x32xf32> -> vector<64x32xf32>
    %41 = tpu.reciprocal %37 {approx = true} : vector<64x1xf32> -> vector<64x1xf32>
    %42 = vector.broadcast %41 : vector<64x1xf32> to vector<64x32xf32>
    %43 = arith.mulf %40, %42 : vector<64x32xf32>
    %44 = arith.truncf %43 : vector<64x32xf32> to vector<64x32xbf16>
    %45 = vector.extract_strided_slice %6 {offsets = [32, 0], sizes = [32, 128], strides = [1, 1]} : vector<128x128xbf16> to vector<32x128xbf16>
    %cst_19 = arith.constant dense<0.000000e+00> : vector<64x128xf32>
    %46 = tpu.matmul %44, %45, %cst_19 {dimension_numbers = #tpu.dot_dimension_numbers<[1], [0], [0], [1], [0, 0, 1, 1], [], []>} : vector<64x32xbf16>, vector<32x128xbf16>, vector<64x128xf32> -> vector<64x128xf32>
    %47 = arith.addf %27, %46 : vector<64x128xf32>
    %48 = vector.extract_strided_slice %1 {offsets = [0, 64], sizes = [64, 32], strides = [1, 1]} : vector<64x128xbf16> to vector<64x32xbf16>
    %49 = vector.extract_strided_slice %3 {offsets = [0, 64], sizes = [16, 32], strides = [1, 1]} : vector<16x128xbf16> to vector<16x32xbf16>
    %cst_20 = arith.constant dense<0.000000e+00> : vector<64x16xf32>
    %50 = tpu.matmul %48, %49, %cst_20 {dimension_numbers = #tpu.dot_dimension_numbers<[1], [1], [0], [0], [0, 0, 1, 0], [], []>} : vector<64x32xbf16>, vector<16x32xbf16>, vector<64x16xf32> -> vector<64x16xf32>
    %cst_21 = arith.constant dense<0xFF800000> : vector<64xf32>
    %51 = vector.multi_reduction <maximumf>, %50, %cst_21 [1] : vector<64x16xf32> to vector<64xf32>
    %52 = vector.shape_cast %51 : vector<64xf32> to vector<64x1xf32>
    %53 = vector.broadcast %52 : vector<64x1xf32> to vector<64x16xf32>
    %54 = arith.subf %50, %53 : vector<64x16xf32>
    %55 = math.exp %54 : vector<64x16xf32>
    %cst_22 = arith.constant dense<0.000000e+00> : vector<64xf32>
    %56 = vector.multi_reduction <add>, %55, %cst_22 [1] : vector<64x16xf32> to vector<64xf32>
    %57 = vector.shape_cast %56 : vector<64xf32> to vector<64x1xf32>
    %58 = arith.truncf %55 : vector<64x16xf32> to vector<64x16xbf16>
    %59 = vector.extract_strided_slice %5 {offsets = [0, 64], sizes = [16, 32], strides = [1, 1]} : vector<16x128xbf16> to vector<16x32xbf16>
    %cst_23 = arith.constant dense<0.000000e+00> : vector<64x32xf32>
    %60 = tpu.matmul %58, %59, %cst_23 {dimension_numbers = #tpu.dot_dimension_numbers<[1], [0], [0], [1], [0, 0, 1, 1], [], []>} : vector<64x16xbf16>, vector<16x32xbf16>, vector<64x32xf32> -> vector<64x32xf32>
    %61 = tpu.reciprocal %57 {approx = true} : vector<64x1xf32> -> vector<64x1xf32>
    %62 = vector.broadcast %61 : vector<64x1xf32> to vector<64x32xf32>
    %63 = arith.mulf %60, %62 : vector<64x32xf32>
    %64 = arith.truncf %63 : vector<64x32xf32> to vector<64x32xbf16>
    %65 = vector.extract_strided_slice %6 {offsets = [64, 0], sizes = [32, 128], strides = [1, 1]} : vector<128x128xbf16> to vector<32x128xbf16>
    %cst_24 = arith.constant dense<0.000000e+00> : vector<64x128xf32>
    %66 = tpu.matmul %64, %65, %cst_24 {dimension_numbers = #tpu.dot_dimension_numbers<[1], [0], [0], [1], [0, 0, 1, 1], [], []>} : vector<64x32xbf16>, vector<32x128xbf16>, vector<64x128xf32> -> vector<64x128xf32>
    %67 = arith.addf %47, %66 : vector<64x128xf32>
    %68 = vector.extract_strided_slice %1 {offsets = [0, 96], sizes = [64, 32], strides = [1, 1]} : vector<64x128xbf16> to vector<64x32xbf16>
    %69 = vector.extract_strided_slice %3 {offsets = [0, 96], sizes = [16, 32], strides = [1, 1]} : vector<16x128xbf16> to vector<16x32xbf16>
    %cst_25 = arith.constant dense<0.000000e+00> : vector<64x16xf32>
    %70 = tpu.matmul %68, %69, %cst_25 {dimension_numbers = #tpu.dot_dimension_numbers<[1], [1], [0], [0], [0, 0, 1, 0], [], []>} : vector<64x32xbf16>, vector<16x32xbf16>, vector<64x16xf32> -> vector<64x16xf32>
    %cst_26 = arith.constant dense<0xFF800000> : vector<64xf32>
    %71 = vector.multi_reduction <maximumf>, %70, %cst_26 [1] : vector<64x16xf32> to vector<64xf32>
    %72 = vector.shape_cast %71 : vector<64xf32> to vector<64x1xf32>
    %73 = vector.broadcast %72 : vector<64x1xf32> to vector<64x16xf32>
    %74 = arith.subf %70, %73 : vector<64x16xf32>
    %75 = math.exp %74 : vector<64x16xf32>
    %cst_27 = arith.constant dense<0.000000e+00> : vector<64xf32>
    %76 = vector.multi_reduction <add>, %75, %cst_27 [1] : vector<64x16xf32> to vector<64xf32>
    %77 = vector.shape_cast %76 : vector<64xf32> to vector<64x1xf32>
    %78 = arith.truncf %75 : vector<64x16xf32> to vector<64x16xbf16>
    %79 = vector.extract_strided_slice %5 {offsets = [0, 96], sizes = [16, 32], strides = [1, 1]} : vector<16x128xbf16> to vector<16x32xbf16>
    %cst_28 = arith.constant dense<0.000000e+00> : vector<64x32xf32>
    %80 = tpu.matmul %78, %79, %cst_28 {dimension_numbers = #tpu.dot_dimension_numbers<[1], [0], [0], [1], [0, 0, 1, 1], [], []>} : vector<64x16xbf16>, vector<16x32xbf16>, vector<64x32xf32> -> vector<64x32xf32>
    %81 = tpu.reciprocal %77 {approx = true} : vector<64x1xf32> -> vector<64x1xf32>
    %82 = vector.broadcast %81 : vector<64x1xf32> to vector<64x32xf32>
    %83 = arith.mulf %80, %82 : vector<64x32xf32>
    %84 = arith.truncf %83 : vector<64x32xf32> to vector<64x32xbf16>
    %85 = vector.extract_strided_slice %6 {offsets = [96, 0], sizes = [32, 128], strides = [1, 1]} : vector<128x128xbf16> to vector<32x128xbf16>
    %cst_29 = arith.constant dense<0.000000e+00> : vector<64x128xf32>
    %86 = tpu.matmul %84, %85, %cst_29 {dimension_numbers = #tpu.dot_dimension_numbers<[1], [0], [0], [1], [0, 0, 1, 1], [], []>} : vector<64x32xbf16>, vector<32x128xbf16>, vector<64x128xf32> -> vector<64x128xf32>
    %87 = arith.addf %67, %86 : vector<64x128xf32>
    %c0_30 = arith.constant 0 : index
    %c0_31 = arith.constant 0 : index
    %88 = vector.load %arg6[%c0_30, %c0_31] : memref<1x128xf32, #tpu.memory_space<vmem>>, vector<1x128xf32>
    %89 = vector.broadcast %88 : vector<1x128xf32> to vector<64x128xf32>
    %90 = arith.addf %87, %89 : vector<64x128xf32>
    %c0_32 = arith.constant 0 : index
    %c0_33 = arith.constant 0 : index
    %c0_34 = arith.constant 0 : index
    %91 = vector.load %arg7[%c0_32, %c0_33, %c0_34] : memref<1x64x128xf32, #tpu.memory_space<vmem>>, vector<1x64x128xf32>
    %92 = vector.shape_cast %91 : vector<1x64x128xf32> to vector<64x128xf32>
    %93 = vector.shape_cast %90 : vector<64x128xf32> to vector<1x64x128xf32>
    tpu.vector_store %arg7[%c0_32, %c0_33, %c0_34], %93 {strides = array<i32>} : memref<1x64x128xf32, #tpu.memory_space<vmem>>, vector<1x64x128xf32>,
    return
  }
  func.func @transform_0(%arg0: i32, %arg1: i32) -> (i32, i32, i32) {
    %c0_i32 = arith.constant 0 : i32
    %c0_i32_0 = arith.constant 0 : i32
    return %arg0, %arg1, %c0_i32 : i32, i32, i32
  }
  func.func @transform_1(%arg0: i32, %arg1: i32) -> (i32, i32, i32) {
    %c0_i32 = arith.constant 0 : i32
    %c0_i32_0 = arith.constant 0 : i32
    %c0_i32_1 = arith.constant 0 : i32
    return %arg0, %c0_i32, %c0_i32_0 : i32, i32, i32
  }
  func.func @transform_2(%arg0: i32, %arg1: i32) -> (i32, i32, i32) {
    %c0_i32 = arith.constant 0 : i32
    %c0_i32_0 = arith.constant 0 : i32
    %c0_i32_1 = arith.constant 0 : i32
    return %arg0, %c0_i32, %c0_i32_0 : i32, i32, i32
  }
  func.func @transform_3(%arg0: i32, %arg1: i32) -> (i32, i32) {
    %c0_i32 = arith.constant 0 : i32
    %c0_i32_0 = arith.constant 0 : i32
    %c0_i32_1 = arith.constant 0 : i32
    return %c0_i32, %c0_i32_0 : i32, i32
  }
  func.func @transform_4(%arg0: i32, %arg1: i32) -> (i32, i32) {
    %c0_i32 = arith.constant 0 : i32
    %c0_i32_0 = arith.constant 0 : i32
    %c0_i32_1 = arith.constant 0 : i32
    return %c0_i32, %c0_i32_0 : i32, i32
  }
  func.func @transform_5(%arg0: i32, %arg1: i32) -> (i32, i32, i32) {
    %c0_i32 = arith.constant 0 : i32
    %c0_i32_0 = arith.constant 0 : i32
    return %arg0, %arg1, %c0_i32 : i32, i32, i32
  }
}

</mosaic_0001>

<bundles_post_ra>
// kernel: gsa_rpe_context_forward.7
= control target key start
LH: loop header
LB: loop body
LE: loop exit
PB: predicated region body
PF: predicated region fallthrough
CT: control target
= control target key end

     0   :  { %vm260_vm0 = vcmask 519168   ;;  %s561_s1 = inlined_call_operand.vmem [shape: bf16[256,64], index: 1, kind: input, shape index: {}]   ;;  %s562_s2 = inlined_call_operand.vmem [shape: f32[1,64], index: 2, kind: input, shape index: {}]   ;;  %s563_s0 = inlined_call_operand.vmem [shape: bf16[1,64,256], index: 0, kind: input, shape index: {}]   ;;  %s564_s3 = inlined_call_operand.vmem [shape: bf16[1,64,64], index: 3, kind: output, shape index: {}]  }
   0x1   :  { %v384_v0 = vld [vmem:[%s561_s1 + $0x38] sm:$0xff]  ;;  %v383_v2 = vld [vmem:[%s561_s1 + $0x30] sm:$0xff]  ;;  %v382_v4 = vld [vmem:[%s561_s1 + $0x28] sm:$0xff] }
   0x2   :  { %v392_v1 = vld [vmem:[%s561_s1 + $0x78] sm:$0xff]  ;;  %194 = vmatpush.bf16.msra.mxu0 %v384_v0  ;;  %393 = vmatpush.bf16.msra.mxu2 %v384_v0  ;;  %v391_v3 = vld [vmem:[%s561_s1 + $0x70] sm:$0xff]  ;;  %v390_v5 = vld [vmem:[%s561_s1 + $0x68] sm:$0xff] }
   0x3   :  { %223 = vmatpush.bf16.msra.mxu1 %v392_v1  ;;  %401 = vmatpush.bf16.msra.mxu3 %v392_v1  ;;  %v381_v6 = vld [vmem:[%s561_s1 + $0x20] sm:$0xff]  ;;  %v380_v8 = vld [vmem:[%s561_s1 + $0x18] sm:$0xff]  ;;  %v379_v10 = vld [vmem:[%s561_s1 + $0x10] sm:$0xff] }
   0x4   :  { %v389_v7 = vld [vmem:[%s561_s1 + $0x60] sm:$0xff]  ;;  %v388_v9 = vld [vmem:[%s561_s1 + $0x58] sm:$0xff]  ;;  %v387_v11 = vld [vmem:[%s561_s1 + $0x50] sm:$0xff] }
   0x5   :  { %v378_v12 = vld [vmem:[%s561_s1 + $0x8] sm:$0xff]  ;;  %v377_v14 = vld [vmem:[%s561_s1] sm:$0xff]  ;;  %v283_v28 = vld [vmem:[%s563_s0 + $0x10] sm:$0xf] }
   0x6   :  { %195 = vmatpush.bf16.msra.mxu0 %v383_v2  ;;  %394 = vmatpush.bf16.msra.mxu2 %v383_v2  ;;  %v386_v13 = vld [vmem:[%s561_s1 + $0x48] sm:$0xff]  ;;  %v385_v15 = vld [vmem:[%s561_s1 + $0x40] sm:$0xff]  ;;  %v372_v29 = vld [vmem:[%s563_s0 + $0x14] sm:$0xf0] }
   0x7   :  { %224 = vmatpush.bf16.msra.mxu1 %v391_v3  ;;  %402 = vmatpush.bf16.msra.mxu3 %v391_v3  ;;  %v275_v16 = vld [vmem:[%s563_s0] sm:$0xf]  ;;  %v370_v17 = vld [vmem:[%s563_s0 + $0x4] sm:$0xf0]  ;;  %v369_v20 = vld [vmem:[%s563_s0 + $0x4] sm:$0xf]  ;;  %v284_v36 = vor.u32 %v372_v29, %v283_v28 }
   0x8   :  { %v291_v18 = vld [vmem:[%s563_s0 + $0x20] sm:$0xf]  ;;  %v374_v19 = vld [vmem:[%s563_s0 + $0x24] sm:$0xf0]  ;;  %v277_v21 = vld [vmem:[%s563_s0 + $0x8] sm:$0xf0]  ;;  %v276_v24 = vor.u32 %v370_v17, %v275_v16 }
   0x9   :  { %v373_v22 = vld [vmem:[%s563_s0 + $0x24] sm:$0xf]  ;;  %v293_v23 = vld [vmem:[%s563_s0 + $0x28] sm:$0xf0]  ;;  %v292_v25 = vor.u32 %v374_v19, %v291_v18  ;;  %v280_v26 = vor.u32 %v369_v20, %v277_v21  ;;  %v299_v30 = vld [vmem:[%s563_s0 + $0x30] sm:$0xf] }
   0xa   :  { %196 = vmatpush.bf16.msra.mxu0 %v382_v4  ;;  %395 = vmatpush.bf16.msra.mxu2 %v382_v4  ;;  %v296_v27 = vor.u32 %v373_v22, %v293_v23  ;;  %v376_v31 = vld [vmem:[%s563_s0 + $0x34] sm:$0xf0]  ;;  %v371_v32 = vld [vmem:[%s563_s0 + $0x14] sm:$0xf]  ;;  %v285_v33 = vld [vmem:[%s563_s0 + $0x18] sm:$0xf0] }
   0xb   :  { %225 = vmatpush.bf16.msra.mxu1 %v390_v5  ;;  %403 = vmatpush.bf16.msra.mxu3 %v390_v5  ;;  %v375_v34 = vld [vmem:[%s563_s0 + $0x34] sm:$0xf]  ;;  %v301_v35 = vld [vmem:[%s563_s0 + $0x38] sm:$0xf0]  ;;  %v300_v37 = vor.u32 %v376_v31, %v299_v30  ;;  %v288_v38 = vor.u32 %v371_v32, %v285_v33  ;;  %v409_v40 = vld [vmem:[%s562_s2] ss:$0 sm:$0xff] }
   0xc   :  { %v304_v39 = vor.u32 %v375_v34, %v301_v35 }
   0xe   :  { %197 = vmatpush.bf16.msra.mxu0 %v381_v6  ;;  %396 = vmatpush.bf16.msra.mxu2 %v381_v6 }
   0xf   :  { %226 = vmatpush.bf16.msra.mxu1 %v389_v7  ;;  %404 = vmatpush.bf16.msra.mxu3 %v389_v7 }
  0x12   :  { %198 = vmatpush.bf16.msra.mxu0 %v380_v8  ;;  %397 = vmatpush.bf16.msra.mxu2 %v380_v8 }
  0x13   :  { %227 = vmatpush.bf16.msra.mxu1 %v388_v9  ;;  %405 = vmatpush.bf16.msra.mxu3 %v388_v9 }
  0x16   :  { %199 = vmatpush.bf16.msra.mxu0 %v379_v10  ;;  %398 = vmatpush.bf16.msra.mxu2 %v379_v10 }
  0x17   :  { %228 = vmatpush.bf16.msra.mxu1 %v387_v11  ;;  %406 = vmatpush.bf16.msra.mxu3 %v387_v11 }
  0x1a   :  { %200 = vmatpush.bf16.msra.mxu0 %v378_v12  ;;  %399 = vmatpush.bf16.msra.mxu2 %v378_v12 }
  0x1b   :  { %229 = vmatpush.bf16.msra.mxu1 %v386_v13  ;;  %407 = vmatpush.bf16.msra.mxu3 %v386_v13 }
  0x1e   :  { %201 = vmatpush.bf16.msra.mxu0 %v377_v14  ;;  %400 = vmatpush.bf16.msra.mxu2 %v377_v14 }
  0x1f   :  { %230 = vmatpush.bf16.msra.mxu1 %v385_v15  ;;  %408 = vmatpush.bf16.msra.mxu3 %v385_v15 }
  0x21   :  { %202 = vmatmul.bf16.vlgmr.msra.gmra.mxu0 %v276_v24  ;;  %212 = vmatmul.bf16.vlgmr.msra.gmra.mxu2 %v292_v25 }
  0x22   :  { %231 = vmatmul.bf16.vlgmr.msra.gmra.mxu1 %v280_v26  ;;  %241 = vmatmul.bf16.vlgmr.msra.gmra.mxu3 %v296_v27 }
  0x31   :  { %207 = vmatmul.bf16.gmra.mxu0 %v284_v36  ;;  %217 = vmatmul.bf16.gmra.mxu2 %v300_v37 }
  0x32   :  { %236 = vmatmul.bf16.gmra.mxu1 %v288_v38  ;;  %246 = vmatmul.bf16.gmra.mxu3 %v304_v39 }
  0x9e   :  { %v203_v41 = vpop.f32.mrf.mxu0 }
  0x9f   :  { %v204_v42 = vadd.f32 %v409_v40, %v203_v41  ;;  %v232_v43 = vpop.f32.mrf.mxu1 }
  0xa1   :  { %v233_v44 = vadd.f32 %v232_v43, %v204_v42 }
  0xa3   :  { %v252_v45 = vpack.c.bf16 %v233_v44, %v233_v44 }
  0xa4   :  { %v213_v46 = vpop.f32.mrf.mxu2 }
  0xa5   :  { %261 = vst.msk [vmem:[%s564_s3] sm:$0xf] %vm260_vm0, %v252_v45  ;;  %v214_v47 = vadd.f32 %v409_v40, %v213_v46  ;;  %v242_v48 = vpop.f32.mrf.mxu3 }
  0xa6   :  { %v205_v49 = vpop.f32.mrf.mxu0 }
  0xa7   :  { %v243_v50 = vadd.f32 %v242_v48, %v214_v47  ;;  %v206_v51 = vadd.f32 %v409_v40, %v205_v49  ;;  %v234_v52 = vpop.f32.mrf.mxu1 }
  0xa9   :  { %v256_v53 = vpack.c.bf16 %v243_v50, %v243_v50  ;;  %v235_v54 = vadd.f32 %v234_v52, %v206_v51 }
  0xab   :  { %265 = vst.msk [vmem:[%s564_s3 + $0x10] sm:$0xf] %vm260_vm0, %v256_v53  ;;  %v253_v55 = vpack.c.bf16 %v235_v54, %v235_v54 }
  0xac   :  { %v215_v56 = vpop.f32.mrf.mxu2 }
  0xad   :  { %262 = vst.msk [vmem:[%s564_s3 + $0x4] sm:$0xf] %vm260_vm0, %v253_v55  ;;  %v216_v57 = vadd.f32 %v409_v40, %v215_v56  ;;  %v244_v58 = vpop.f32.mrf.mxu3 }
  0xae   :  { %v208_v59 = vpop.f32.mrf.mxu0 }
  0xaf   :  { %v245_v60 = vadd.f32 %v244_v58, %v216_v57  ;;  %v209_v61 = vadd.f32 %v409_v40, %v208_v59  ;;  %v237_v62 = vpop.f32.mrf.mxu1 }
  0xb1   :  { %v257_v63 = vpack.c.bf16 %v245_v60, %v245_v60  ;;  %v238_v0 = vadd.f32 %v237_v62, %v209_v61 }
  0xb3   :  { %266 = vst.msk [vmem:[%s564_s3 + $0x14] sm:$0xf] %vm260_vm0, %v257_v63  ;;  %v254_v1 = vpack.c.bf16 %v238_v0, %v238_v0 }
  0xb4   :  { %v218_v2 = vpop.f32.mrf.mxu2 }
  0xb5   :  { %263 = vst.msk [vmem:[%s564_s3 + $0x8] sm:$0xf] %vm260_vm0, %v254_v1  ;;  %v219_v3 = vadd.f32 %v409_v40, %v218_v2  ;;  %v247_v4 = vpop.f32.mrf.mxu3 }
  0xb6   :  { %v210_v5 = vpop.f32.mrf.mxu0 }
  0xb7   :  { %v248_v6 = vadd.f32 %v247_v4, %v219_v3  ;;  %v211_v7 = vadd.f32 %v409_v40, %v210_v5  ;;  %v239_v8 = vpop.f32.mrf.mxu1 }
  0xb9   :  { %v258_v9 = vpack.c.bf16 %v248_v6, %v248_v6  ;;  %v240_v10 = vadd.f32 %v239_v8, %v211_v7 }
  0xbb   :  { %267 = vst.msk [vmem:[%s564_s3 + $0x18] sm:$0xf] %vm260_vm0, %v258_v9  ;;  %v255_v11 = vpack.c.bf16 %v240_v10, %v240_v10 }
  0xbc   :  { %v220_v12 = vpop.f32.mrf.mxu2 }
  0xbd   :  { %264 = vst.msk [vmem:[%s564_s3 + $0xc] sm:$0xf] %vm260_vm0, %v255_v11  ;;  %v221_v13 = vadd.f32 %v409_v40, %v220_v12  ;;  %v249_v14 = vpop.f32.mrf.mxu3 }
  0xbf   :  { %v250_v15 = vadd.f32 %v249_v14, %v221_v13 }
  0xc1   :  { %v259_v16 = vpack.c.bf16 %v250_v15, %v250_v15 }
  0xc3   :  { %268 = vst.msk [vmem:[%s564_s3 + $0x1c] sm:$0xf] %vm260_vm0, %v259_v16 }

// kernel: gsa_rpe_context_forward.8
= control target key start
LH: loop header
LB: loop body
LE: loop exit
PB: predicated region body
PF: predicated region fallthrough
CT: control target
= control target key end

     0   :  { %s809_s15 = smov 0   ;;  %s811_s16 = smov 0   ;;  %s955_s0 = inlined_call_operand.vmem [shape: bf16[2,64,192], index: 0, kind: input, shape index: {}]   ;;  %s956_s1 = inlined_call_operand.vmem [shape: f32[64,192], index: 1, kind: input, shape index: {}]   ;;  %s957_s2 = inlined_call_operand.vmem [shape: bf16[192,128], index: 2, kind: input, shape index: {}]   ;;  %s958_s3 = inlined_call_operand.vmem [shape: f32[1,128], index: 3, kind: input, shape index: {}]   ;;  %s959_s4 = inlined_call_operand.vmem [shape: bf16[2,64,128], index: 4, kind: output, shape index: {}]  }
   0x1   :  { %s813_s17 = smov 0  }
   0x2 LB: > { %s26_s18 = sadd.s32 1, %s778_s16  ;;  %p627_p0 = scmp.ge.s32.totalorder %s782_s17, 1  ;;  %s782_s17 = sphi %s813_s17, %s14_s17   ;;  %s778_s16 = sphi %s811_s16, %s961_s16   ;;  %s774_s15 = sphi %s809_s15, %s960_s15  }
   0x3   : > { %p28_p1 = scmp.ge.s32.totalorder %s26_s18, 2  ;;  %p196_p2 = scmp.lt.s32.totalorder %s782_s17, 3 }
   0x5   : > { %s963_s18 = smov (%p28_p1, %s26_s18), 0  ;;  %p197_p3 = pnand %p627_p0, %p196_p2 }
   0x6   : > { %p238_p4 = scmp.lt.s32.totalorder (!%p197_p3), %s774_s15, 1 }
   0x7   : > { %200 = sbr.rel (%p197_p3) target bundleno = 208 (0xd0), region = 36 }
   0xc   : > { %v695_v0 = vld [vmem:[%s957_s2 + $0x38] sm:$0xff]  ;;  %v694_v2 = vld [vmem:[%s957_s2 + $0x30] sm:$0xff]  ;;  %s965_s15 = smov (!%p238_p4, %s774_s15), 1  ;;  %v693_v4 = vld [vmem:[%s957_s2 + $0x28] sm:$0xff]  ;;  %vm430_vm0 = vcmask 523264  }
   0xd   : > { %v699_v1 = vld [vmem:[%s957_s2 + $0x58] sm:$0xff]  ;;  %443 = vmatpush.bf16.msra.mxu0 %v695_v0  ;;  %723 = vmatpush.bf16.msra.mxu2 %v695_v0  ;;  %v698_v3 = vld [vmem:[%s957_s2 + $0x50] sm:$0xff]  ;;  %s686_s27 = sshll.u32 %s965_s15, 6  ;;  %v697_v5 = vld [vmem:[%s957_s2 + $0x48] sm:$0xff]  ;;  %s687_s12 = sshll.u32 %s965_s15, 5 }
   0xe   : > { %731 = vmatpush.bf16.msra.mxu3 %v699_v1  ;;  %476 = vmatpush.bf16.msra.mxu1 %v699_v1  ;;  %s851_s8 = scalar_lea.vmem %s955_s0, %s686_s27  ;;  %v295_v11 = vld [vmem:[%s956_s1 + $0x28] sm:$0xff]  ;;  %v297_v12 = vld [vmem:[%s956_s1 + $0x38] sm:$0xff]  ;;  %v692_v18 = vld [vmem:[%s957_s2 + $0x20] sm:$0xff]  ;;  %s263_s19 = scalar_lea.vmem %s959_s4, %s687_s12 }
   0xf   : > { %v854_v6 = vld [vmem:[%s851_s8 + $0x10] sm:$0xff]  ;;  %v857_v7 = vld [vmem:[%s851_s8 + $0x18] sm:$0xff]  ;;  %v266_v8 = vld [vmem:[%s851_s8] sm:$0xff] }
  0x10   : > { %v279_v9 = vunpack.c.h.bf16 %v854_v6  ;;  %v281_v10 = vunpack.c.h.bf16 %v857_v7  ;;  %v267_v13 = vld [vmem:[%s851_s8 + $0x8] sm:$0xff]  ;;  %v275_v14 = vunpack.c.h.bf16 %v266_v8  ;;  %v293_v17 = vld [vmem:[%s956_s1 + $0x18] sm:$0xff]  ;;  %v696_v21 = vld [vmem:[%s957_s2 + $0x40] sm:$0xff]  ;;  %v274_v31 = vunpack.c.l.bf16 %v266_v8 }
  0x11   : > { %444 = vmatpush.bf16.msra.mxu0 %v694_v2  ;;  %724 = vmatpush.bf16.msra.mxu2 %v694_v2  ;;  %v277_v15 = vunpack.c.h.bf16 %v267_v13  ;;  %v291_v16 = vld [vmem:[%s956_s1 + $0x8] sm:$0xff]  ;;  %v691_v25 = vld [vmem:[%s957_s2 + $0x18] sm:$0xff]  ;;  %v690_v27 = vld [vmem:[%s957_s2 + $0x10] sm:$0xff]  ;;  %v276_v32 = vunpack.c.l.bf16 %v267_v13  ;;  %v278_v55 = vunpack.c.l.bf16 %v854_v6  ;;  %v280_v56 = vunpack.c.l.bf16 %v857_v7 }
  0x12   : > { %732 = vmatpush.bf16.msra.mxu3 %v698_v3  ;;  %477 = vmatpush.bf16.msra.mxu1 %v698_v3  ;;  %v311_v19 = vadd.f32 %v295_v11, %v279_v9  ;;  %v313_v20 = vadd.f32 %v297_v12, %v281_v10  ;;  %v307_v22 = vadd.f32 %v291_v16, %v275_v14  ;;  %v270_v28 = vld [vmem:[%s851_s8 + $0x20] sm:$0xff]  ;;  %v271_v29 = vld [vmem:[%s851_s8 + $0x28] sm:$0xff]  ;;  %v292_v34 = vld [vmem:[%s956_s1 + $0x10] sm:$0xff] }
  0x13   : > { %v309_v23 = vadd.f32 %v293_v17, %v277_v15  ;;  %v689_v30 = vld [vmem:[%s957_s2 + $0x8] sm:$0xff]  ;;  %v290_v33 = vld [vmem:[%s956_s1] sm:$0xff]  ;;  %v282_v35 = vunpack.c.l.bf16 %v270_v28  ;;  %v283_v36 = vunpack.c.h.bf16 %v270_v28  ;;  %v284_v37 = vunpack.c.l.bf16 %v271_v29  ;;  %v300_v40 = vld [vmem:[%s956_s1 + $0x50] sm:$0xff] }
  0x14   : > { %v325_v24 = vpack.c.bf16 %v313_v20, %v311_v19  ;;  %v285_v38 = vunpack.c.h.bf16 %v271_v29  ;;  %v298_v39 = vld [vmem:[%s956_s1 + $0x40] sm:$0xff]  ;;  %v299_v41 = vld [vmem:[%s956_s1 + $0x48] sm:$0xff]  ;;  %v301_v42 = vld [vmem:[%s956_s1 + $0x58] sm:$0xff]  ;;  %v306_v43 = vadd.f32 %v290_v33, %v274_v31  ;;  %v308_v44 = vadd.f32 %v292_v34, %v276_v32 }
  0x15   : > { %445 = vmatpush.bf16.msra.mxu0 %v693_v4  ;;  %725 = vmatpush.bf16.msra.mxu2 %v693_v4  ;;  %v323_v26 = vpack.c.bf16 %v309_v23, %v307_v22  ;;  %v688_v45 = vld [vmem:[%s957_s2] sm:$0xff]  ;;  %v314_v46 = vadd.f32 %v298_v39, %v282_v35  ;;  %v316_v47 = vadd.f32 %v300_v40, %v284_v37  ;;  %v272_v53 = vld [vmem:[%s851_s8 + $0x30] sm:$0xff]  ;;  %v273_v54 = vld [vmem:[%s851_s8 + $0x38] sm:$0xff] }
  0x16   : > { %733 = vmatpush.bf16.msra.mxu3 %v697_v5  ;;  %478 = vmatpush.bf16.msra.mxu1 %v697_v5  ;;  %v315_v48 = vadd.f32 %v299_v41, %v283_v36  ;;  %v317_v49 = vadd.f32 %v301_v42, %v285_v38  ;;  %v322_v50 = vpack.c.bf16 %v308_v44, %v306_v43  ;;  %v294_v57 = vld [vmem:[%s956_s1 + $0x20] sm:$0xff]  ;;  %v296_v58 = vld [vmem:[%s956_s1 + $0x30] sm:$0xff]  ;;  %v286_v59 = vunpack.c.l.bf16 %v272_v53  ;;  %v303_v1 = vld [vmem:[%s956_s1 + $0x68] sm:$0xff] }
  0x17   : > { %v326_v51 = vpack.c.bf16 %v316_v47, %v314_v46  ;;  %v287_v60 = vunpack.c.h.bf16 %v272_v53  ;;  %v288_v61 = vunpack.c.l.bf16 %v273_v54  ;;  %v289_v62 = vunpack.c.h.bf16 %v273_v54  ;;  %v302_v63 = vld [vmem:[%s956_s1 + $0x60] sm:$0xff]  ;;  %v304_v0 = vld [vmem:[%s956_s1 + $0x70] sm:$0xff]  ;;  %v305_v2 = vld [vmem:[%s956_s1 + $0x78] sm:$0xff] }
  0x18   : > { %v327_v52 = vpack.c.bf16 %v317_v49, %v315_v48  ;;  %v310_v3 = vadd.f32 %v294_v57, %v278_v55  ;;  %v312_v4 = vadd.f32 %v296_v58, %v280_v56  ;;  %v318_v5 = vadd.f32 %v302_v63, %v286_v59  ;;  %v759_v16 = vld [vmem:[%s958_s3] ss:$0 sm:$0xff] }
  0x19   : > { %446 = vmatpush.bf16.msra.mxu0 %v692_v18  ;;  %726 = vmatpush.bf16.msra.mxu2 %v692_v18  ;;  %v320_v6 = vadd.f32 %v304_v0, %v288_v61  ;;  %v319_v7 = vadd.f32 %v303_v1, %v287_v60  ;;  %v321_v8 = vadd.f32 %v305_v2, %v289_v62 }
  0x1a   : > { %734 = vmatpush.bf16.msra.mxu3 %v696_v21  ;;  %479 = vmatpush.bf16.msra.mxu1 %v696_v21  ;;  %v324_v9 = vpack.c.bf16 %v312_v4, %v310_v3 }
  0x1b   : > { %v328_v10 = vpack.c.bf16 %v320_v6, %v318_v5  ;;  %v329_v11 = vpack.c.bf16 %v321_v8, %v319_v7 }
  0x1d   : > { %681 = vmatmul.msk.bf16.vlgmr.msra.gmra.mxu3 %vm430_vm0, %v325_v24  ;;  %447 = vmatpush.bf16.msra.mxu0 %v691_v25 }
  0x1e   : > { %727 = vmatpush.bf16.msra.mxu2 %v691_v25  ;;  %680 = vmatmul.msk.bf16.vlgmr.msra.gmra.mxu1 %vm430_vm0, %v323_v26 }
  0x21   : > { %448 = vmatpush.bf16.msra.mxu0 %v690_v27 }
  0x22   : > { %728 = vmatpush.bf16.msra.mxu2 %v690_v27 }
  0x25   : > { %449 = vmatpush.bf16.msra.mxu0 %v689_v30 }
  0x26   : > { %729 = vmatpush.bf16.msra.mxu2 %v689_v30 }
  0x29   : > { %450 = vmatpush.bf16.msra.mxu0 %v688_v45 }
  0x2a   : > { %730 = vmatpush.bf16.msra.mxu2 %v688_v45 }
  0x2c   : > { %451 = vmatmul.bf16.vlgmr.msra.gmra.mxu0 %v322_v50 }
  0x2d   : > { %461 = vmatmul.bf16.vlgmr.msra.gmra.mxu2 %v326_v51  ;;  %682 = vmatmul.msk.bf16.gmra.mxu3 %vm430_vm0, %v327_v52 }
  0x3c   : > { %456 = vmatmul.bf16.gmra.mxu0 %v324_v9 }
  0x3d   : > { %466 = vmatmul.bf16.gmra.mxu2 %v328_v10  ;;  %683 = vmatmul.msk.bf16.gmra.mxu3 %vm430_vm0, %v329_v11 }
  0x9b   : > { %v481_v13 = vpop.f32.mrf.mxu1 }
  0xa0   : > { %v486_v12 = vpop.f32.mrf.mxu3 }
  0xa3   : > { %v483_v21 = vpop.f32.mrf.mxu1 }
  0xa8   : > { %v488_v14 = vpop.f32.mrf.mxu3 }
  0xa9   : > { %v452_v15 = vpop.f32.mrf.mxu0 }
  0xaa   : > { %v453_v17 = vadd.f32 %v759_v16, %v452_v15 }
  0xac   : > { %v482_v23 = vadd.f32 %v481_v13, %v453_v17 }
  0xb0   : > { %v462_v18 = vpop.f32.mrf.mxu2  ;;  %v491_v19 = vpop.f32.mrf.mxu3 }
  0xb1   : > { %v454_v20 = vpop.f32.mrf.mxu0  ;;  %v463_v26 = vadd.f32 %v759_v16, %v462_v18 }
  0xb2   : > { %v455_v22 = vadd.f32 %v759_v16, %v454_v20 }
  0xb3   : > { %v492_v31 = vadd.f32 %v491_v19, %v463_v26 }
  0xb4   : > { %v484_v24 = vadd.f32 %v483_v21, %v455_v22 }
  0xb6   : > { %v703_v25 = vpack.c.bf16 %v484_v24, %v482_v23 }
  0xb8   : > { %704 = vst [vmem:[%s263_s19] sm:$0xff] %v703_v25   ;;  %v464_v27 = vpop.f32.mrf.mxu2  ;;  %v493_v28 = vpop.f32.mrf.mxu3 }
  0xb9   : > { %v465_v29 = vadd.f32 %v759_v16, %v464_v27  ;;  %v457_v30 = vpop.f32.mrf.mxu0 }
  0xba   : > { %v458_v34 = vadd.f32 %v759_v16, %v457_v30 }
  0xbb   : > { %v494_v32 = vadd.f32 %v493_v28, %v465_v29 }
  0xbc   : > { %v487_v39 = vadd.f32 %v486_v12, %v458_v34 }
  0xbd   : > { %v713_v33 = vpack.c.bf16 %v494_v32, %v492_v31 }
  0xbf   : > { %721 = vst [vmem:[%s263_s19 + $0x10] sm:$0xff] %v713_v33  }
  0xc0   : > { %v467_v35 = vpop.f32.mrf.mxu2  ;;  %v496_v36 = vpop.f32.mrf.mxu3 }
  0xc1   : > { %v459_v37 = vpop.f32.mrf.mxu0  ;;  %v468_v42 = vadd.f32 %v759_v16, %v467_v35 }
  0xc2   : > { %v460_v38 = vadd.f32 %v759_v16, %v459_v37 }
  0xc3   : > { %v497_v46 = vadd.f32 %v496_v36, %v468_v42 }
  0xc4   : > { %v489_v40 = vadd.f32 %v488_v14, %v460_v38 }
  0xc6   : > { %v708_v41 = vpack.c.bf16 %v489_v40, %v487_v39 }
  0xc8   : > { %720 = vst [vmem:[%s263_s19 + $0x8] sm:$0xff] %v708_v41   ;;  %v469_v43 = vpop.f32.mrf.mxu2  ;;  %v498_v45 = vpop.f32.mrf.mxu3 }
  0xc9   : > { %v470_v44 = vadd.f32 %v759_v16, %v469_v43 }
  0xcb   : > { %v499_v47 = vadd.f32 %v498_v45, %v470_v44 }
  0xcd   : > { %v718_v48 = vpack.c.bf16 %v499_v47, %v497_v46 }
  0xcf   : > { %722 = vst [vmem:[%s263_s19 + $0x18] sm:$0xff] %v718_v48  }
  0xd0 PF: > { %s14_s17 = sadd.s32 1, %s782_s17   ;;  %s960_s15 = smov %s778_s16 }
  0xd1   : > { %p11_p5 = scmp.ge.s32.totalorder %s14_s17, 4   ;;  %s961_s16 = smov %s963_s18 }
  0xd3   :  { %13 = sbr.rel (!%p11_p5) target bundleno = 2 (0x2), region = 69 }

// kernel: gsa_rpe_context_forward.10
= control target key start
LH: loop header
LB: loop body
LE: loop exit
PB: predicated region body
PF: predicated region fallthrough
CT: control target
= control target key end

     0   :  { %s1304_s18 = smov 0   ;;  %s1306_s19 = smov 0   ;;  %s1512_s0 = inlined_call_operand.vmem [shape: bf16[2,16,768], index: 0, kind: input, shape index: {}]   ;;  %s1513_s1 = inlined_call_operand.vmem [shape: bf16[768,128], index: 1, kind: input, shape index: {}]   ;;  %s1514_s2 = inlined_call_operand.vmem [shape: f32[1,128], index: 2, kind: input, shape index: {}]   ;;  %s1515_s3 = inlined_call_operand.vmem [shape: f32[1,128], index: 3, kind: input, shape index: {}]   ;;  %s1516_s4 = inlined_call_operand.vmem [shape: f32[1,128], index: 4, kind: input, shape index: {}]   ;;  %s1517_s5 = inlined_call_operand.vmem [shape: bf16[2,16,128], index: 5, kind: output, shape index: {}]  }
   0x1   :  { %s1308_s20 = smov 0  }
   0x2 LB: > { %s27_s21 = sadd.s32 1, %s1267_s19  ;;  %p932_p0 = scmp.ge.s32.totalorder %s1271_s20, 1  ;;  %s1271_s20 = sphi %s1308_s20, %s15_s20   ;;  %s1267_s19 = sphi %s1306_s19, %s1519_s19   ;;  %s1263_s18 = sphi %s1304_s18, %s1518_s18  }
   0x3   : > { %p29_p1 = scmp.ge.s32.totalorder %s27_s21, 2  ;;  %p209_p2 = scmp.lt.s32.totalorder %s1271_s20, 3 }
   0x5   : > { %s1521_s21 = smov (%p29_p1, %s27_s21), 0  ;;  %p210_p3 = pnand %p932_p0, %p209_p2 }
   0x6   : > { %p247_p4 = scmp.lt.s32.totalorder (!%p210_p3), %s1263_s18, 1 }
   0x7   : > { %213 = sbr.rel (%p210_p3) target bundleno = 483 (0x1e3), region = 40 }
   0xc   : > { %v1168_v0 = vld [vmem:[%s1513_s1 + $0x38] sm:$0xff]  ;;  %v1167_v4 = vld [vmem:[%s1513_s1 + $0x30] sm:$0xff]  ;;  %v1166_v8 = vld [vmem:[%s1513_s1 + $0x28] sm:$0xff]  ;;  %s1523_s18 = smov (!%p247_p4, %s1263_s18), 1 }
   0xd   : > { %v1176_v1 = vld [vmem:[%s1513_s1 + $0x78] sm:$0xff]  ;;  %691 = vmatpush.bf16.msra.mxu0 %v1168_v0  ;;  %v1175_v5 = vld [vmem:[%s1513_s1 + $0x70] sm:$0xff]  ;;  %v1174_v9 = vld [vmem:[%s1513_s1 + $0x68] sm:$0xff]  ;;  %s1214_s28 = smul.u32 48, %s1523_s18  ;;  %s1154_s24 = sshll.u32 %s1523_s18, 3 }
   0xe   : > { %v1184_v2 = vld [vmem:[%s1513_s1 + $0xb8] sm:$0xff]  ;;  %705 = vmatpush.bf16.msra.mxu1 %v1176_v1  ;;  %v1183_v6 = vld [vmem:[%s1513_s1 + $0xb0] sm:$0xff]  ;;  %v1182_v10 = vld [vmem:[%s1513_s1 + $0xa8] sm:$0xff]  ;;  %s265_s27 = scalar_lea.vmem %s1517_s5, %s1154_s24 }
   0xf   : > { %v1192_v3 = vld [vmem:[%s1513_s1 + $0xf8] sm:$0xff]  ;;  %719 = vmatpush.bf16.msra.mxu2 %v1184_v2  ;;  %v1191_v7 = vld [vmem:[%s1513_s1 + $0xf0] sm:$0xff]  ;;  %v1190_v11 = vld [vmem:[%s1513_s1 + $0xe8] sm:$0xff]  ;;  %s1416_s14 = scalar_lea.vmem %s1512_s0, %s1214_s28 }
  0x10   : > { %733 = vmatpush.bf16.msra.mxu3 %v1192_v3  ;;  %v1165_v12 = vld [vmem:[%s1513_s1 + $0x20] sm:$0xff]  ;;  %v1164_v16 = vld [vmem:[%s1513_s1 + $0x18] sm:$0xff]  ;;  %v1163_v20 = vld [vmem:[%s1513_s1 + $0x10] sm:$0xff] }
  0x11   : > { %692 = vmatpush.bf16.msra.mxu0 %v1167_v4  ;;  %v1173_v13 = vld [vmem:[%s1513_s1 + $0x60] sm:$0xff]  ;;  %v1172_v17 = vld [vmem:[%s1513_s1 + $0x58] sm:$0xff]  ;;  %v1171_v21 = vld [vmem:[%s1513_s1 + $0x50] sm:$0xff] }
  0x12   : > { %706 = vmatpush.bf16.msra.mxu1 %v1175_v5  ;;  %v1181_v14 = vld [vmem:[%s1513_s1 + $0xa0] sm:$0xff]  ;;  %v1180_v18 = vld [vmem:[%s1513_s1 + $0x98] sm:$0xff]  ;;  %v1179_v22 = vld [vmem:[%s1513_s1 + $0x90] sm:$0xff] }
  0x13   : > { %720 = vmatpush.bf16.msra.mxu2 %v1183_v6  ;;  %v1189_v15 = vld [vmem:[%s1513_s1 + $0xe0] sm:$0xff]  ;;  %v1188_v19 = vld [vmem:[%s1513_s1 + $0xd8] sm:$0xff]  ;;  %v1187_v23 = vld [vmem:[%s1513_s1 + $0xd0] sm:$0xff] }
  0x14   : > { %734 = vmatpush.bf16.msra.mxu3 %v1191_v7  ;;  %v1162_v24 = vld [vmem:[%s1513_s1 + $0x8] sm:$0xff]  ;;  %v1161_v28 = vld [vmem:[%s1513_s1] sm:$0xff]  ;;  %v1158_v31 = vld [vmem:[%s1416_s14 + $0x14] sm:$0xf0] }
  0x15   : > { %693 = vmatpush.bf16.msra.mxu0 %v1166_v8  ;;  %v1170_v25 = vld [vmem:[%s1513_s1 + $0x48] sm:$0xff]  ;;  %v1169_v29 = vld [vmem:[%s1513_s1 + $0x40] sm:$0xff]  ;;  %v940_v33 = vld [vmem:[%s1416_s14 + $0x18] sm:$0xf0] }
  0x16   : > { %707 = vmatpush.bf16.msra.mxu1 %v1174_v9  ;;  %v1178_v26 = vld [vmem:[%s1513_s1 + $0x88] sm:$0xff]  ;;  %v938_v30 = vld [vmem:[%s1416_s14] sm:$0xf]  ;;  %v1155_v32 = vld [vmem:[%s1416_s14 + $0x4] sm:$0xf] }
  0x17   : > { %721 = vmatpush.bf16.msra.mxu2 %v1182_v10  ;;  %v1186_v27 = vld [vmem:[%s1513_s1 + $0xc8] sm:$0xff]  ;;  %v1200_v34 = vld [vmem:[%s1513_s1 + $0x138] sm:$0xff]  ;;  %v1177_v36 = vld [vmem:[%s1513_s1 + $0x80] sm:$0xff]  ;;  %v939_v40 = vor.u32 %v1158_v31, %v938_v30  ;;  %v943_v43 = vor.u32 %v1155_v32, %v940_v33 }
  0x18   : > { %735 = vmatpush.bf16.msra.mxu3 %v1190_v11  ;;  %v1208_v35 = vld [vmem:[%s1513_s1 + $0x178] sm:$0xff]  ;;  %v1185_v37 = vld [vmem:[%s1513_s1 + $0xc0] sm:$0xff]  ;;  %v946_v38 = vld [vmem:[%s1416_s14 + $0x8] sm:$0xf] }
  0x19   : > { %694 = vmatpush.bf16.msra.mxu0 %v1165_v12  ;;  %v1159_v39 = vld [vmem:[%s1416_s14 + $0x1c] sm:$0xf0]  ;;  %v1156_v41 = vld [vmem:[%s1416_s14 + $0xc] sm:$0xf]  ;;  %v948_v42 = vld [vmem:[%s1416_s14 + $0x20] sm:$0xf0] }
  0x1a   : > { %708 = vmatpush.bf16.msra.mxu1 %v1173_v13  ;;  %v1199_v44 = vld [vmem:[%s1513_s1 + $0x130] sm:$0xff]  ;;  %v947_v46 = vor.u32 %v1159_v39, %v946_v38  ;;  %v951_v47 = vor.u32 %v1156_v41, %v948_v42  ;;  %v1198_v48 = vld [vmem:[%s1513_s1 + $0x128] sm:$0xff]  ;;  %v1197_v50 = vld [vmem:[%s1513_s1 + $0x120] sm:$0xff] }
  0x1b   : > { %722 = vmatpush.bf16.msra.mxu2 %v1181_v14  ;;  %v1207_v45 = vld [vmem:[%s1513_s1 + $0x170] sm:$0xff]  ;;  %v1206_v49 = vld [vmem:[%s1513_s1 + $0x168] sm:$0xff]  ;;  %v1205_v51 = vld [vmem:[%s1513_s1 + $0x160] sm:$0xff] }
  0x1c   : > { %736 = vmatpush.bf16.msra.mxu3 %v1189_v15  ;;  %v1196_v52 = vld [vmem:[%s1513_s1 + $0x118] sm:$0xff]  ;;  %v1195_v54 = vld [vmem:[%s1513_s1 + $0x110] sm:$0xff]  ;;  %v1194_v56 = vld [vmem:[%s1513_s1 + $0x108] sm:$0xff] }
  0x1d   : > { %695 = vmatpush.bf16.msra.mxu0 %v1164_v16  ;;  %v1204_v53 = vld [vmem:[%s1513_s1 + $0x158] sm:$0xff]  ;;  %v1203_v55 = vld [vmem:[%s1513_s1 + $0x150] sm:$0xff]  ;;  %v1202_v57 = vld [vmem:[%s1513_s1 + $0x148] sm:$0xff] }
  0x1e   : > { %709 = vmatpush.bf16.msra.mxu1 %v1172_v17  ;;  %v1193_v58 = vld [vmem:[%s1513_s1 + $0x100] sm:$0xff]  ;;  %v954_v60 = vld [vmem:[%s1416_s14 + $0x10] sm:$0xf]  ;;  %v1160_v61 = vld [vmem:[%s1416_s14 + $0x24] sm:$0xf0] }
  0x1f   : > { %723 = vmatpush.bf16.msra.mxu2 %v1180_v18  ;;  %v1201_v59 = vld [vmem:[%s1513_s1 + $0x140] sm:$0xff]  ;;  %v1157_v62 = vld [vmem:[%s1416_s14 + $0x14] sm:$0xf]  ;;  %v956_v63 = vld [vmem:[%s1416_s14 + $0x28] sm:$0xf0]  ;;  %v955_v0 = vor.u32 %v1160_v61, %v954_v60 }
  0x20   : > { %737 = vmatpush.bf16.msra.mxu3 %v1188_v19  ;;  %v959_v1 = vor.u32 %v1157_v62, %v956_v63  ;;  %v1240_v4 = vld [vmem:[%s1514_s2] ss:$0 sm:$0xff] }
  0x21   : > { %696 = vmatpush.bf16.msra.mxu0 %v1163_v20  ;;  %v1241_v60 = vld [vmem:[%s1515_s3] ss:$0 sm:$0xff] }
  0x22   : > { %710 = vmatpush.bf16.msra.mxu1 %v1171_v21 }
  0x23   : > { %724 = vmatpush.bf16.msra.mxu2 %v1179_v22 }
  0x24   : > { %738 = vmatpush.bf16.msra.mxu3 %v1187_v23 }
  0x25   : > { %697 = vmatpush.bf16.msra.mxu0 %v1162_v24 }
  0x26   : > { %711 = vmatpush.bf16.msra.mxu1 %v1170_v25 }
  0x27   : > { %725 = vmatpush.bf16.msra.mxu2 %v1178_v26 }
  0x28   : > { %739 = vmatpush.bf16.msra.mxu3 %v1186_v27  ;;  %v1273_v27 = vmov 128.0  }
  0x29   : > { %698 = vmatpush.bf16.msra.mxu0 %v1161_v28  ;;  %1243 = vrcp.f32 %v1273_v27 }
  0x2a   : > { %712 = vmatpush.bf16.msra.mxu1 %v1169_v29 }
  0x2b   : > { %726 = vmatpush.bf16.msra.mxu2 %v1177_v36 }
  0x2c   : > { %740 = vmatpush.bf16.msra.mxu3 %v1185_v37  ;;  %699 = vmatmul.bf16.vlgmr.msra.gmra.mxu0 %v939_v40 }
  0x2d   : > { %747 = vmatpush.bf16.msrb.mxu0 %v1200_v34  ;;  %713 = vmatmul.bf16.vlgmr.msra.gmra.mxu1 %v943_v43 }
  0x2e   : > { %761 = vmatpush.bf16.msrb.mxu1 %v1208_v35  ;;  %727 = vmatmul.bf16.vlgmr.msra.gmra.mxu2 %v947_v46 }
  0x2f   : > { %741 = vmatmul.bf16.vlgmr.msra.gmra.mxu3 %v951_v47  ;;  %v1244_v28 = vpop.eup %1243 }
  0x30   : > { %v780_v29 = vmul.f32 128.0, %v1244_v28  ;;  %vm784_vm0 = vweird.f32 %v1244_v28 }
  0x31   : > { %748 = vmatpush.bf16.msrb.mxu0 %v1199_v44 }
  0x32   : > { %762 = vmatpush.bf16.msrb.mxu1 %v1207_v45  ;;  %v781_v30 = vsub.f32 1.0, %v780_v29 }
  0x34   : > { %v782_v31 = vmul.f32 %v1244_v28, %v781_v30 }
  0x35   : > { %749 = vmatpush.bf16.msrb.mxu0 %v1198_v48 }
  0x36   : > { %763 = vmatpush.bf16.msrb.mxu1 %v1206_v49  ;;  %v783_v32 = vadd.f32 %v1244_v28, %v782_v31 }
  0x38   : > { %v785_v33 = vsel %vm784_vm0, %v1244_v28, %v783_v32 }
  0x39   : > { %750 = vmatpush.bf16.msrb.mxu0 %v1197_v50 }
  0x3a   : > { %764 = vmatpush.bf16.msrb.mxu1 %v1205_v51 }
  0x3d   : > { %751 = vmatpush.bf16.msrb.mxu0 %v1196_v52 }
  0x3e   : > { %765 = vmatpush.bf16.msrb.mxu1 %v1204_v53 }
  0x41   : > { %752 = vmatpush.bf16.msrb.mxu0 %v1195_v54 }
  0x42   : > { %766 = vmatpush.bf16.msrb.mxu1 %v1203_v55 }
  0x45   : > { %753 = vmatpush.bf16.msrb.mxu0 %v1194_v56 }
  0x46   : > { %767 = vmatpush.bf16.msrb.mxu1 %v1202_v57 }
  0x49   : > { %754 = vmatpush.bf16.msrb.mxu0 %v1193_v58 }
  0x4a   : > { %768 = vmatpush.bf16.msrb.mxu1 %v1201_v59 }
  0x4c   : > { %755 = vmatmul.bf16.vlgmr.msrb.gmra.mxu0 %v955_v0  ;;  %v1242_v0 = vld [vmem:[%s1516_s4] ss:$0 sm:$0xff] }
  0x4d   : > { %769 = vmatmul.bf16.vlgmr.msrb.gmra.mxu1 %v959_v1 }
  0xa9   : > { %v700_v2 = vpop.f32.mrf.mxu0 }
  0xaa   : > { %v714_v3 = vpop.f32.mrf.mxu1  ;;  %v701_v5 = vadd.f32 %v1240_v4, %v700_v2 }
  0xac   : > { %v715_v7 = vadd.f32 %v714_v3, %v701_v5 }
  0xb1   : > { %v728_v6 = vpop.f32.mrf.mxu2  ;;  %v702_v8 = vpop.f32.mrf.mxu0 }
  0xb2   : > { %v716_v9 = vpop.f32.mrf.mxu1  ;;  %v742_v10 = vpop.f32.mrf.mxu3  ;;  %v729_v11 = vadd.f32 %v728_v6, %v715_v7  ;;  %v703_v12 = vadd.f32 %v1240_v4, %v702_v8 }
  0xb4   : > { %v743_v13 = vadd.f32 %v742_v10, %v729_v11  ;;  %v717_v14 = vadd.f32 %v716_v9, %v703_v12 }
  0xb9   : > { %v730_v15 = vpop.f32.mrf.mxu2 }
  0xba   : > { %v731_v19 = vadd.f32 %v730_v15, %v717_v14  ;;  %v744_v21 = vpop.f32.mrf.mxu3 }
  0xbc   : > { %v745_v22 = vadd.f32 %v744_v21, %v731_v19 }
  0xc9   : > { %v756_v16 = vpop.f32.mrf.mxu0 }
  0xca   : > { %v770_v17 = vpop.f32.mrf.mxu1  ;;  %v757_v18 = vadd.f32 %v756_v16, %v743_v13 }
  0xcc   : > { %v771_v20 = vadd.f32 %v770_v17, %v757_v18 }
  0xce   : > { %775 = vadd.xlane.f32.xlu0 %v771_v20 }
  0xd1   : > { %v758_v23 = vpop.f32.mrf.mxu0 }
  0xd2   : > { %v759_v24 = vadd.f32 %v758_v23, %v745_v22  ;;  %v772_v25 = vpop.f32.mrf.mxu1 }
  0xd4   : > { %v773_v26 = vadd.f32 %v772_v25, %v759_v24 }
  0xd6   : > { %777 = vadd.xlane.f32.xlu0 %v773_v26 }
 0x141   : > { %v776_v34 = vpop.xlane.xlu0 %775 }
 0x142   : > { %v786_v35 = vmul.f32 %v785_v33, %v776_v34 }
 0x144   : > { %v788_v36 = vsub.f32 %v771_v20, %v786_v35 }
 0x146   : > { %v790_v37 = vmul.f32 %v788_v36, %v788_v36 }
 0x148   : > { %792 = vadd.xlane.f32.xlu1 %v790_v37 }
 0x149   : > { %v778_v38 = vpop.xlane.xlu0 %777 }
 0x14a   : > { %v787_v39 = vmul.f32 %v785_v33, %v778_v38 }
 0x14c   : > { %v789_v40 = vsub.f32 %v773_v26, %v787_v39 }
 0x14e   : > { %v791_v41 = vmul.f32 %v789_v40, %v789_v40 }
 0x150   : > { %794 = vadd.xlane.f32.xlu1 %v791_v41 }
 0x1bb   : > { %v793_v42 = vpop.xlane.xlu1 %792 }
 0x1bc   : > { %v796_v43 = vmul.f32 %v793_v42, %v785_v33 }
 0x1be   : > { %v798_v44 = vadd.f32 1e-05, %v796_v43 }
 0x1c0   : > { %1245 = vrsqrt.f32 %v798_v44  ;;  %vm806_vm2 = vweird.f32 %v798_v44 }
 0x1c3   : > { %v795_v45 = vpop.xlane.xlu1 %794 }
 0x1c4   : > { %v797_v46 = vmul.f32 %v795_v45, %v785_v33 }
 0x1c6   : > { %v1246_v47 = vpop.eup %1245  ;;  %v799_v48 = vadd.f32 1e-05, %v797_v46 }
 0x1c7   : > { %v801_v49 = vmul.f32 %v1246_v47, %v798_v44  ;;  %vm807_vm1 = vweird.f32 %v1246_v47 }
 0x1c8   : > { %1247 = vrsqrt.f32 %v799_v48  ;;  %vm808_vm3 = vmor %vm806_vm2, %vm807_vm1  ;;  %vm816_vm5 = vweird.f32 %v799_v48 }
 0x1c9   : > { %v802_v50 = vmul.f32 %v1246_v47, %v801_v49 }
 0x1cb   : > { %v803_v51 = vmul.f32 0.5, %v802_v50 }
 0x1cd   : > { %v804_v52 = vsub.f32 1.5, %v803_v51 }
 0x1ce   : > { %v1248_v53 = vpop.eup %1247 }
 0x1cf   : > { %v805_v54 = vmul.f32 %v1246_v47, %v804_v52  ;;  %v811_v55 = vmul.f32 %v1248_v53, %v799_v48  ;;  %vm817_vm4 = vweird.f32 %v1248_v53 }
 0x1d0   : > { %vm818_vm6 = vmor %vm816_vm5, %vm817_vm4 }
 0x1d1   : > { %v812_v56 = vmul.f32 %v1248_v53, %v811_v55  ;;  %v809_v57 = vsel %vm808_vm3, %v1246_v47, %v805_v54 }
 0x1d2   : > { %v820_v61 = vmul.f32 %v809_v57, %v788_v36 }
 0x1d3   : > { %v813_v58 = vmul.f32 0.5, %v812_v56 }
 0x1d4   : > { %v826_v1 = vmul.f32 %v1241_v60, %v820_v61 }
 0x1d5   : > { %v814_v59 = vsub.f32 1.5, %v813_v58 }
 0x1d6   : > { %v832_v4 = vadd.f32 %v1242_v0, %v826_v1 }
 0x1d7   : > { %v815_v62 = vmul.f32 %v1248_v53, %v814_v59 }
 0x1d9   : > { %v819_v63 = vsel %vm818_vm6, %v1248_v53, %v815_v62 }
 0x1da   : > { %v821_v2 = vmul.f32 %v819_v63, %v789_v40 }
 0x1dc   : > { %v827_v3 = vmul.f32 %v1241_v60, %v821_v2 }
 0x1de   : > { %v833_v5 = vadd.f32 %v1242_v0, %v827_v3 }
 0x1e0   : > { %v1212_v6 = vpack.c.bf16 %v833_v5, %v832_v4 }
 0x1e2   : > { %1213 = vst [vmem:[%s265_s27] sm:$0xff] %v1212_v6  }
 0x1e3 PF: > { %s15_s20 = sadd.s32 1, %s1271_s20   ;;  %s1518_s18 = smov %s1267_s19 }
 0x1e4   : > { %p12_p5 = scmp.ge.s32.totalorder %s15_s20, 4   ;;  %s1519_s19 = smov %s1521_s21 }
 0x1e6   :  { %14 = sbr.rel (!%p12_p5) target bundleno = 2 (0x2), region = 70 }

// kernel: gsa_rpe_context_forward.11
= control target key start
LH: loop header
LB: loop body
LE: loop exit
PB: predicated region body
PF: predicated region fallthrough
CT: control target
= control target key end

     0   :  { %s593_s15 = smov 0   ;;  %s595_s16 = smov 0   ;;  %s662_s0 = inlined_call_operand.vmem [shape: bf16[2,16,128], index: 0, kind: input, shape index: {}]   ;;  %s663_s1 = inlined_call_operand.vmem [shape: f32[16,128], index: 1, kind: input, shape index: {}]   ;;  %s664_s2 = inlined_call_operand.vmem [shape: bf16[128,128], index: 2, kind: input, shape index: {}]   ;;  %s665_s3 = inlined_call_operand.vmem [shape: f32[1,128], index: 3, kind: input, shape index: {}]   ;;  %s666_s4 = inlined_call_operand.vmem [shape: bf16[2,16,128], index: 4, kind: output, shape index: {}]  }
   0x1   :  { %s597_s17 = smov 0  }
   0x2 LB: > { %s26_s18 = sadd.s32 1, %s562_s16  ;;  %p461_p0 = scmp.ge.s32.totalorder %s566_s17, 1  ;;  %s566_s17 = sphi %s597_s17, %s14_s17   ;;  %s562_s16 = sphi %s595_s16, %s668_s16   ;;  %s558_s15 = sphi %s593_s15, %s667_s15  }
   0x3   : > { %p28_p1 = scmp.ge.s32.totalorder %s26_s18, 2  ;;  %p194_p2 = scmp.lt.s32.totalorder %s566_s17, 3 }
   0x5   : > { %s670_s18 = smov (%p28_p1, %s26_s18), 0  ;;  %p195_p3 = pnand %p461_p0, %p194_p2 }
   0x6   : > { %p234_p4 = scmp.lt.s32.totalorder (!%p195_p3), %s558_s15, 1 }
   0x7   : > { %198 = sbr.rel (%p195_p3) target bundleno = 183 (0xb7), region = 36 }
   0xc   : > { %v509_v0 = vld [vmem:[%s664_s2 + $0x38] sm:$0xff]  ;;  %v508_v1 = vld [vmem:[%s664_s2 + $0x30] sm:$0xff]  ;;  %v507_v2 = vld [vmem:[%s664_s2 + $0x28] sm:$0xff]  ;;  %s672_s15 = smov (!%p234_p4, %s558_s15), 1 }
   0xd   : > { %336 = vmatpush.bf16.msra.mxu0 %v509_v0  ;;  %v506_v3 = vld [vmem:[%s664_s2 + $0x20] sm:$0xff]  ;;  %s500_s27 = sshll.u32 %s672_s15, 3  ;;  %v505_v4 = vld [vmem:[%s664_s2 + $0x18] sm:$0xff]  ;;  %v504_v5 = vld [vmem:[%s664_s2 + $0x10] sm:$0xff] }
   0xe   : > { %s241_s6 = scalar_lea.vmem %s662_s0, %s500_s27  ;;  %v503_v9 = vld [vmem:[%s664_s2 + $0x8] sm:$0xff]  ;;  %v263_v10 = vld [vmem:[%s663_s1] sm:$0xff]  ;;  %s257_s24 = scalar_lea.vmem %s666_s4, %s500_s27 }
   0xf   : > { %v511_v6 = vld [vmem:[%s241_s6] sm:$0xff]   ;;  %v264_v11 = vld [vmem:[%s663_s1 + $0x8] sm:$0xff] }
  0x10   : > { %v512_v7 = vunpack.c.l.bf16 %v511_v6  ;;  %v513_v8 = vunpack.c.h.bf16 %v511_v6  ;;  %v502_v14 = vld [vmem:[%s664_s2] sm:$0xff] }
  0x11   : > { %337 = vmatpush.bf16.msra.mxu0 %v508_v1  ;;  %v543_v17 = vld [vmem:[%s665_s3] ss:$0 sm:$0xff] }
  0x12   : > { %v265_v12 = vadd.f32 %v512_v7, %v263_v10  ;;  %v266_v13 = vadd.f32 %v513_v8, %v264_v11 }
  0x14   : > { %v267_v15 = vpack.c.bf16 %v266_v13, %v265_v12 }
  0x15   : > { %338 = vmatpush.bf16.msra.mxu0 %v507_v2 }
  0x19   : > { %339 = vmatpush.bf16.msra.mxu0 %v506_v3 }
  0x1d   : > { %340 = vmatpush.bf16.msra.mxu0 %v505_v4 }
  0x21   : > { %341 = vmatpush.bf16.msra.mxu0 %v504_v5 }
  0x25   : > { %342 = vmatpush.bf16.msra.mxu0 %v503_v9 }
  0x29   : > { %343 = vmatpush.bf16.msra.mxu0 %v502_v14 }
  0x2c   : > { %344 = vmatmul.bf16.vlgmr.msra.gmra.mxu0 %v267_v15 }
  0xa9   : > { %v345_v16 = vpop.f32.mrf.mxu0 }
  0xaa   : > { %v346_v19 = vadd.f32 %v543_v17, %v345_v16 }
  0xb1   : > { %v347_v18 = vpop.f32.mrf.mxu0 }
  0xb2   : > { %v348_v20 = vadd.f32 %v543_v17, %v347_v18 }
  0xb4   : > { %v517_v21 = vpack.c.bf16 %v348_v20, %v346_v19 }
  0xb6   : > { %518 = vst [vmem:[%s257_s24] sm:$0xff] %v517_v21  }
  0xb7 PF: > { %s14_s17 = sadd.s32 1, %s566_s17   ;;  %s667_s15 = smov %s562_s16 }
  0xb8   : > { %p11_p5 = scmp.ge.s32.totalorder %s14_s17, 4   ;;  %s668_s16 = smov %s670_s18 }
  0xba   :  { %13 = sbr.rel (!%p11_p5) target bundleno = 2 (0x2), region = 69 }

// kernel: gsa_rpe_context_forward.12
= control target key start
LH: loop header
LB: loop body
LE: loop exit
PB: predicated region body
PF: predicated region fallthrough
CT: control target
= control target key end

     0   :  { %s523_s12 = smov 0   ;;  %s525_s13 = smov 0   ;;  %s583_s0 = inlined_call_operand.vmem [shape: bf16[2,16,128], index: 0, kind: input, shape index: {}]   ;;  %s584_s1 = inlined_call_operand.vmem [shape: bf16[128,128], index: 1, kind: input, shape index: {}]   ;;  %s585_s2 = inlined_call_operand.vmem [shape: f32[1,128], index: 2, kind: input, shape index: {}]   ;;  %s586_s3 = inlined_call_operand.vmem [shape: bf16[2,16,128], index: 3, kind: output, shape index: {}]  }
   0x1   :  { %s527_s14 = smov 0  }
   0x2 LB: > { %s25_s15 = sadd.s32 1, %s497_s13  ;;  %p395_p0 = scmp.ge.s32.totalorder %s501_s14, 1  ;;  %s501_s14 = sphi %s527_s14, %s13_s14   ;;  %s497_s13 = sphi %s525_s13, %s588_s13   ;;  %s493_s12 = sphi %s523_s12, %s587_s12  }
   0x3   : > { %p27_p1 = scmp.ge.s32.totalorder %s25_s15, 2  ;;  %p158_p2 = scmp.lt.s32.totalorder %s501_s14, 3 }
   0x5   : > { %s590_s15 = smov (%p27_p1, %s25_s15), 0  ;;  %p159_p3 = pnand %p395_p0, %p158_p2 }
   0x6   : > { %p191_p4 = scmp.lt.s32.totalorder (!%p159_p3), %s493_s12, 1 }
   0x7   : > { %162 = sbr.rel (%p159_p3) target bundleno = 183 (0xb7), region = 32 }
   0xc   : > { %v448_v0 = vld [vmem:[%s584_s1 + $0x38] sm:$0xff]  ;;  %v447_v1 = vld [vmem:[%s584_s1 + $0x30] sm:$0xff]  ;;  %v446_v2 = vld [vmem:[%s584_s1 + $0x28] sm:$0xff]  ;;  %s592_s12 = smov (!%p191_p4, %s493_s12), 1 }
   0xd   : > { %286 = vmatpush.bf16.msra.mxu0 %v448_v0  ;;  %v445_v3 = vld [vmem:[%s584_s1 + $0x20] sm:$0xff]  ;;  %v444_v4 = vld [vmem:[%s584_s1 + $0x18] sm:$0xff]  ;;  %v443_v5 = vld [vmem:[%s584_s1 + $0x10] sm:$0xff]  ;;  %s438_s30 = sshll.u32 %s592_s12, 3 }
   0xe   : > { %v442_v6 = vld [vmem:[%s584_s1 + $0x8] sm:$0xff]  ;;  %v441_v7 = vld [vmem:[%s584_s1] sm:$0xff]  ;;  %s198_s8 = scalar_lea.vmem %s583_s0, %s438_s30  ;;  %s208_s16 = scalar_lea.vmem %s586_s3, %s438_s30 }
   0xf   : > { %v440_v8 = vld [vmem:[%s198_s8] sm:$0xff] }
  0x10   : > { %v478_v10 = vld [vmem:[%s585_s2] ss:$0 sm:$0xff] }
  0x11   : > { %287 = vmatpush.bf16.msra.mxu0 %v447_v1 }
  0x15   : > { %288 = vmatpush.bf16.msra.mxu0 %v446_v2 }
  0x19   : > { %289 = vmatpush.bf16.msra.mxu0 %v445_v3 }
  0x1d   : > { %290 = vmatpush.bf16.msra.mxu0 %v444_v4 }
  0x21   : > { %291 = vmatpush.bf16.msra.mxu0 %v443_v5 }
  0x25   : > { %292 = vmatpush.bf16.msra.mxu0 %v442_v6 }
  0x29   : > { %293 = vmatpush.bf16.msra.mxu0 %v441_v7 }
  0x2c   : > { %294 = vmatmul.bf16.vlgmr.msra.gmra.mxu0 %v440_v8 }
  0xa9   : > { %v295_v9 = vpop.f32.mrf.mxu0 }
  0xaa   : > { %v296_v12 = vadd.f32 %v478_v10, %v295_v9 }
  0xb1   : > { %v297_v11 = vpop.f32.mrf.mxu0 }
  0xb2   : > { %v298_v13 = vadd.f32 %v478_v10, %v297_v11 }
  0xb4   : > { %v452_v14 = vpack.c.bf16 %v298_v13, %v296_v12 }
  0xb6   : > { %453 = vst [vmem:[%s208_s16] sm:$0xff] %v452_v14  }
  0xb7 PF: > { %s13_s14 = sadd.s32 1, %s501_s14   ;;  %s587_s12 = smov %s497_s13 }
  0xb8   : > { %p10_p5 = scmp.ge.s32.totalorder %s13_s14, 4   ;;  %s588_s13 = smov %s590_s15 }
  0xba   :  { %12 = sbr.rel (!%p10_p5) target bundleno = 2 (0x2), region = 62 }

// kernel: gsa_rpe_context_forward.9
= control target key start
LH: loop header
LB: loop body
LE: loop exit
PB: predicated region body
PF: predicated region fallthrough
CT: control target
= control target key end

     0   :  { %s1047_s18 = smov 0   ;;  %s1049_s19 = smov 0   ;;  %s1193_s0 = inlined_call_operand.vmem [shape: bf16[2,16,512], index: 0, kind: input, shape index: {}]   ;;  %s1194_s1 = inlined_call_operand.vmem [shape: bf16[512,128], index: 1, kind: input, shape index: {}]   ;;  %s1195_s2 = inlined_call_operand.vmem [shape: f32[1,128], index: 2, kind: input, shape index: {}]   ;;  %s1196_s3 = inlined_call_operand.vmem [shape: f32[1,128], index: 3, kind: input, shape index: {}]   ;;  %s1197_s4 = inlined_call_operand.vmem [shape: f32[1,128], index: 4, kind: input, shape index: {}]   ;;  %s1198_s5 = inlined_call_operand.vmem [shape: bf16[2,16,128], index: 5, kind: output, shape index: {}]  }
   0x1   :  { %s1051_s20 = smov 0  }
   0x2 LB: > { %s27_s21 = sadd.s32 1, %s1010_s19  ;;  %p764_p0 = scmp.ge.s32.totalorder %s1014_s20, 1  ;;  %s1014_s20 = sphi %s1051_s20, %s15_s20   ;;  %s1010_s19 = sphi %s1049_s19, %s1200_s19   ;;  %s1006_s18 = sphi %s1047_s18, %s1199_s18  }
   0x3   : > { %p29_p1 = scmp.ge.s32.totalorder %s27_s21, 2  ;;  %p209_p2 = scmp.lt.s32.totalorder %s1014_s20, 3 }
   0x5   : > { %s1202_s21 = smov (%p29_p1, %s27_s21), 0  ;;  %p210_p3 = pnand %p764_p0, %p209_p2 }
   0x6   : > { %p247_p4 = scmp.lt.s32.totalorder (!%p210_p3), %s1006_s18, 1 }
   0x7   : > { %213 = sbr.rel (%p210_p3) target bundleno = 459 (0x1cb), region = 40 }
   0xc   : > { %v928_v0 = vld [vmem:[%s1194_s1 + $0x38] sm:$0xff]  ;;  %v927_v4 = vld [vmem:[%s1194_s1 + $0x30] sm:$0xff]  ;;  %v926_v8 = vld [vmem:[%s1194_s1 + $0x28] sm:$0xff]  ;;  %s1204_s18 = smov (!%p247_p4, %s1006_s18), 1  ;;  %v1016_v61 = vmov 128.0  }
   0xd   : > { %v936_v1 = vld [vmem:[%s1194_s1 + $0x78] sm:$0xff]  ;;  %551 = vmatpush.bf16.msra.mxu0 %v928_v0  ;;  %v935_v5 = vld [vmem:[%s1194_s1 + $0x70] sm:$0xff]  ;;  %v934_v9 = vld [vmem:[%s1194_s1 + $0x68] sm:$0xff]  ;;  %s915_s28 = sshll.u32 %s1204_s18, 5  ;;  %986 = vrcp.f32 %v1016_v61  ;;  %s916_s8 = sshll.u32 %s1204_s18, 3 }
   0xe   : > { %v944_v2 = vld [vmem:[%s1194_s1 + $0xb8] sm:$0xff]  ;;  %565 = vmatpush.bf16.msra.mxu1 %v936_v1  ;;  %v943_v6 = vld [vmem:[%s1194_s1 + $0xb0] sm:$0xff]  ;;  %v942_v10 = vld [vmem:[%s1194_s1 + $0xa8] sm:$0xff]  ;;  %s255_s10 = scalar_lea.vmem %s1193_s0, %s915_s28  ;;  %s265_s11 = scalar_lea.vmem %s1198_s5, %s916_s8 }
   0xf   : > { %v952_v3 = vld [vmem:[%s1194_s1 + $0xf8] sm:$0xff]  ;;  %579 = vmatpush.bf16.msra.mxu2 %v944_v2  ;;  %v951_v7 = vld [vmem:[%s1194_s1 + $0xf0] sm:$0xff]  ;;  %v950_v11 = vld [vmem:[%s1194_s1 + $0xe8] sm:$0xff] }
  0x10   : > { %593 = vmatpush.bf16.msra.mxu3 %v952_v3  ;;  %v925_v12 = vld [vmem:[%s1194_s1 + $0x20] sm:$0xff]  ;;  %v924_v16 = vld [vmem:[%s1194_s1 + $0x18] sm:$0xff]  ;;  %v923_v20 = vld [vmem:[%s1194_s1 + $0x10] sm:$0xff] }
  0x11   : > { %552 = vmatpush.bf16.msra.mxu0 %v927_v4  ;;  %v933_v13 = vld [vmem:[%s1194_s1 + $0x60] sm:$0xff]  ;;  %v932_v17 = vld [vmem:[%s1194_s1 + $0x58] sm:$0xff]  ;;  %v931_v21 = vld [vmem:[%s1194_s1 + $0x50] sm:$0xff] }
  0x12   : > { %566 = vmatpush.bf16.msra.mxu1 %v935_v5  ;;  %v941_v14 = vld [vmem:[%s1194_s1 + $0xa0] sm:$0xff]  ;;  %v940_v18 = vld [vmem:[%s1194_s1 + $0x98] sm:$0xff]  ;;  %v939_v22 = vld [vmem:[%s1194_s1 + $0x90] sm:$0xff] }
  0x13   : > { %580 = vmatpush.bf16.msra.mxu2 %v943_v6  ;;  %v949_v15 = vld [vmem:[%s1194_s1 + $0xe0] sm:$0xff]  ;;  %v948_v19 = vld [vmem:[%s1194_s1 + $0xd8] sm:$0xff]  ;;  %v947_v23 = vld [vmem:[%s1194_s1 + $0xd0] sm:$0xff]  ;;  %v987_v62 = vpop.eup %986 }
  0x14   : > { %594 = vmatpush.bf16.msra.mxu3 %v951_v7  ;;  %v922_v24 = vld [vmem:[%s1194_s1 + $0x8] sm:$0xff]  ;;  %v921_v28 = vld [vmem:[%s1194_s1] sm:$0xff]  ;;  %v919_v33 = vld [vmem:[%s255_s10 + $0xc] sm:$0xf0]  ;;  %v612_v63 = vmul.f32 128.0, %v987_v62  ;;  %vm616_vm0 = vweird.f32 %v987_v62 }
  0x15   : > { %553 = vmatpush.bf16.msra.mxu0 %v926_v8  ;;  %v930_v25 = vld [vmem:[%s1194_s1 + $0x48] sm:$0xff]  ;;  %v929_v29 = vld [vmem:[%s1194_s1 + $0x40] sm:$0xff]  ;;  %v773_v35 = vld [vmem:[%s255_s10 + $0x10] sm:$0xf0] }
  0x16   : > { %567 = vmatpush.bf16.msra.mxu1 %v934_v9  ;;  %v938_v26 = vld [vmem:[%s1194_s1 + $0x88] sm:$0xff]  ;;  %v937_v30 = vld [vmem:[%s1194_s1 + $0x80] sm:$0xff]  ;;  %v920_v37 = vld [vmem:[%s255_s10 + $0x14] sm:$0xf0]  ;;  %v613_v0 = vsub.f32 1.0, %v612_v63 }
  0x17   : > { %581 = vmatpush.bf16.msra.mxu2 %v942_v10  ;;  %v946_v27 = vld [vmem:[%s1194_s1 + $0xc8] sm:$0xff]  ;;  %v945_v31 = vld [vmem:[%s1194_s1 + $0xc0] sm:$0xff]  ;;  %v781_v39 = vld [vmem:[%s255_s10 + $0x18] sm:$0xf0] }
  0x18   : > { %595 = vmatpush.bf16.msra.mxu3 %v950_v11  ;;  %v771_v32 = vld [vmem:[%s255_s10] sm:$0xf]  ;;  %v917_v34 = vld [vmem:[%s255_s10 + $0x4] sm:$0xf]  ;;  %v779_v36 = vld [vmem:[%s255_s10 + $0x8] sm:$0xf]  ;;  %v614_v1 = vmul.f32 %v987_v62, %v613_v0 }
  0x19   : > { %554 = vmatpush.bf16.msra.mxu0 %v925_v12  ;;  %v918_v38 = vld [vmem:[%s255_s10 + $0xc] sm:$0xf]  ;;  %v772_v40 = vor.u32 %v919_v33, %v771_v32  ;;  %v776_v41 = vor.u32 %v917_v34, %v773_v35  ;;  %v780_v42 = vor.u32 %v920_v37, %v779_v36  ;;  %v983_v44 = vld [vmem:[%s1195_s2] ss:$0 sm:$0xff] }
  0x1a   : > { %568 = vmatpush.bf16.msra.mxu1 %v933_v13  ;;  %v784_v43 = vor.u32 %v918_v38, %v781_v39  ;;  %v615_v2 = vadd.f32 %v987_v62, %v614_v1  ;;  %v985_v34 = vld [vmem:[%s1197_s4] ss:$0 sm:$0xff] }
  0x1b   : > { %582 = vmatpush.bf16.msra.mxu2 %v941_v14 }
  0x1c   : > { %596 = vmatpush.bf16.msra.mxu3 %v949_v15  ;;  %v617_v3 = vsel %vm616_vm0, %v987_v62, %v615_v2 }
  0x1d   : > { %555 = vmatpush.bf16.msra.mxu0 %v924_v16 }
  0x1e   : > { %569 = vmatpush.bf16.msra.mxu1 %v932_v17 }
  0x1f   : > { %583 = vmatpush.bf16.msra.mxu2 %v940_v18 }
  0x20   : > { %597 = vmatpush.bf16.msra.mxu3 %v948_v19 }
  0x21   : > { %556 = vmatpush.bf16.msra.mxu0 %v923_v20 }
  0x22   : > { %570 = vmatpush.bf16.msra.mxu1 %v931_v21 }
  0x23   : > { %584 = vmatpush.bf16.msra.mxu2 %v939_v22 }
  0x24   : > { %598 = vmatpush.bf16.msra.mxu3 %v947_v23 }
  0x25   : > { %557 = vmatpush.bf16.msra.mxu0 %v922_v24 }
  0x26   : > { %571 = vmatpush.bf16.msra.mxu1 %v930_v25 }
  0x27   : > { %585 = vmatpush.bf16.msra.mxu2 %v938_v26 }
  0x28   : > { %599 = vmatpush.bf16.msra.mxu3 %v946_v27 }
  0x29   : > { %558 = vmatpush.bf16.msra.mxu0 %v921_v28 }
  0x2a   : > { %572 = vmatpush.bf16.msra.mxu1 %v929_v29 }
  0x2b   : > { %586 = vmatpush.bf16.msra.mxu2 %v937_v30  ;;  %v984_v30 = vld [vmem:[%s1196_s3] ss:$0 sm:$0xff] }
  0x2c   : > { %600 = vmatpush.bf16.msra.mxu3 %v945_v31  ;;  %559 = vmatmul.bf16.vlgmr.msra.gmra.mxu0 %v772_v40 }
  0x2d   : > { %573 = vmatmul.bf16.vlgmr.msra.gmra.mxu1 %v776_v41 }
  0x2e   : > { %587 = vmatmul.bf16.vlgmr.msra.gmra.mxu2 %v780_v42 }
  0x2f   : > { %601 = vmatmul.bf16.vlgmr.msra.gmra.mxu3 %v784_v43 }
  0xa9   : > { %v560_v45 = vpop.f32.mrf.mxu0 }
  0xaa   : > { %v561_v46 = vadd.f32 %v983_v44, %v560_v45  ;;  %v574_v47 = vpop.f32.mrf.mxu1 }
  0xac   : > { %v575_v48 = vadd.f32 %v574_v47, %v561_v46 }
  0xb1   : > { %v588_v49 = vpop.f32.mrf.mxu2  ;;  %v562_v52 = vpop.f32.mrf.mxu0 }
  0xb2   : > { %v602_v50 = vpop.f32.mrf.mxu3  ;;  %v589_v51 = vadd.f32 %v588_v49, %v575_v48  ;;  %v563_v54 = vadd.f32 %v983_v44, %v562_v52  ;;  %v576_v55 = vpop.f32.mrf.mxu1 }
  0xb4   : > { %v603_v53 = vadd.f32 %v602_v50, %v589_v51  ;;  %v577_v56 = vadd.f32 %v576_v55, %v563_v54 }
  0xb6   : > { %607 = vadd.xlane.f32.xlu0 %v603_v53 }
  0xb9   : > { %v590_v57 = vpop.f32.mrf.mxu2 }
  0xba   : > { %v591_v58 = vadd.f32 %v590_v57, %v577_v56  ;;  %v604_v59 = vpop.f32.mrf.mxu3 }
  0xbc   : > { %v605_v60 = vadd.f32 %v604_v59, %v591_v58 }
  0xbe   : > { %609 = vadd.xlane.f32.xlu0 %v605_v60 }
 0x129   : > { %v608_v4 = vpop.xlane.xlu0 %607 }
 0x12a   : > { %v618_v5 = vmul.f32 %v617_v3, %v608_v4 }
 0x12c   : > { %v620_v6 = vsub.f32 %v603_v53, %v618_v5 }
 0x12e   : > { %v622_v7 = vmul.f32 %v620_v6, %v620_v6 }
 0x130   : > { %624 = vadd.xlane.f32.xlu1 %v622_v7 }
 0x131   : > { %v610_v8 = vpop.xlane.xlu0 %609 }
 0x132   : > { %v619_v9 = vmul.f32 %v617_v3, %v610_v8 }
 0x134   : > { %v621_v10 = vsub.f32 %v605_v60, %v619_v9 }
 0x136   : > { %v623_v11 = vmul.f32 %v621_v10, %v621_v10 }
 0x138   : > { %626 = vadd.xlane.f32.xlu1 %v623_v11 }
 0x1a3   : > { %v625_v12 = vpop.xlane.xlu1 %624 }
 0x1a4   : > { %v628_v13 = vmul.f32 %v625_v12, %v617_v3 }
 0x1a6   : > { %v630_v14 = vadd.f32 1e-05, %v628_v13 }
 0x1a8   : > { %988 = vrsqrt.f32 %v630_v14  ;;  %vm638_vm2 = vweird.f32 %v630_v14 }
 0x1ab   : > { %v627_v15 = vpop.xlane.xlu1 %626 }
 0x1ac   : > { %v629_v16 = vmul.f32 %v627_v15, %v617_v3 }
 0x1ae   : > { %v989_v17 = vpop.eup %988  ;;  %v631_v18 = vadd.f32 1e-05, %v629_v16 }
 0x1af   : > { %v633_v19 = vmul.f32 %v989_v17, %v630_v14  ;;  %vm639_vm1 = vweird.f32 %v989_v17 }
 0x1b0   : > { %990 = vrsqrt.f32 %v631_v18  ;;  %vm640_vm3 = vmor %vm638_vm2, %vm639_vm1  ;;  %vm648_vm5 = vweird.f32 %v631_v18 }
 0x1b1   : > { %v634_v20 = vmul.f32 %v989_v17, %v633_v19 }
 0x1b3   : > { %v635_v21 = vmul.f32 0.5, %v634_v20 }
 0x1b5   : > { %v636_v22 = vsub.f32 1.5, %v635_v21 }
 0x1b6   : > { %v991_v23 = vpop.eup %990 }
 0x1b7   : > { %v637_v24 = vmul.f32 %v989_v17, %v636_v22  ;;  %v643_v25 = vmul.f32 %v991_v23, %v631_v18  ;;  %vm649_vm4 = vweird.f32 %v991_v23 }
 0x1b8   : > { %vm650_vm6 = vmor %vm648_vm5, %vm649_vm4 }
 0x1b9   : > { %v644_v26 = vmul.f32 %v991_v23, %v643_v25  ;;  %v641_v27 = vsel %vm640_vm3, %v989_v17, %v637_v24 }
 0x1ba   : > { %v652_v31 = vmul.f32 %v641_v27, %v620_v6 }
 0x1bb   : > { %v645_v28 = vmul.f32 0.5, %v644_v26 }
 0x1bc   : > { %v658_v35 = vmul.f32 %v984_v30, %v652_v31 }
 0x1bd   : > { %v646_v29 = vsub.f32 1.5, %v645_v28 }
 0x1be   : > { %v664_v38 = vadd.f32 %v985_v34, %v658_v35 }
 0x1bf   : > { %v647_v32 = vmul.f32 %v991_v23, %v646_v29 }
 0x1c1   : > { %v651_v33 = vsel %vm650_vm6, %v991_v23, %v647_v32 }
 0x1c2   : > { %v653_v36 = vmul.f32 %v651_v33, %v621_v10 }
 0x1c4   : > { %v659_v37 = vmul.f32 %v984_v30, %v653_v36 }
 0x1c6   : > { %v665_v39 = vadd.f32 %v985_v34, %v659_v37 }
 0x1c8   : > { %v956_v40 = vpack.c.bf16 %v665_v39, %v664_v38 }
 0x1ca   : > { %957 = vst [vmem:[%s265_s11] sm:$0xff] %v956_v40  }
 0x1cb PF: > { %s15_s20 = sadd.s32 1, %s1014_s20   ;;  %s1199_s18 = smov %s1010_s19 }
 0x1cc   : > { %p12_p5 = scmp.ge.s32.totalorder %s15_s20, 4   ;;  %s1200_s19 = smov %s1202_s21 }
 0x1ce   :  { %14 = sbr.rel (!%p12_p5) target bundleno = 2 (0x2), region = 70 }

// kernel: gsa_rpe_context_forward.13
= control target key start
LH: loop header
LB: loop body
LE: loop exit
PB: predicated region body
PF: predicated region fallthrough
CT: control target
= control target key end

     0   :  { %10 = vsyncpa [#allocation3], 0  ;;  %s2450_s0 = inlined_call_operand.vmem [shape: bf16[2,64,128], index: 0, kind: input, shape index: {}]   ;;  %s2451_s1 = inlined_call_operand.vmem [shape: bf16[2,16,128], index: 1, kind: input, shape index: {}]   ;;  %s2452_s2 = inlined_call_operand.vmem [shape: bf16[2,16,128], index: 2, kind: input, shape index: {}]   ;;  %s2453_s3 = inlined_call_operand.vmem [shape: bf16[128,128], index: 3, kind: input, shape index: {}]   ;;  %s2454_s4 = inlined_call_operand.vmem [shape: f32[1,128], index: 4, kind: input, shape index: {}]   ;;  %s2455_s5 = inlined_call_operand.hbm [shape: f32[2,64,128], index: 5, kind: output, shape index: {}]  }
   0x1   :  { %12 = vsyncpa [#allocation3 + $0x1], 0  ;;  %s1931_s18 = smov 0   ;;  %s1933_s19 = smov 0  }
   0x2   :  { %s1935_s20 = smov 0   ;;  %s1937_s21 = smov 0  }
   0x3   :  { %s1939_s22 = smov 0   ;;  %s1941_s23 = smov 0  }
   0x4 LB: > { %s1488_s24 = sadd.s32 4294967295, %s1894_s23   ;;  %s1489_s25 = sadd.s32 4294967294, %s1894_s23   ;;  %s1894_s23 = sphi %s1941_s23, %s18_s23   ;;  %s1890_s22 = sphi %s1939_s22, %s2462_s22   ;;  %s1886_s21 = sphi %s1937_s21, %s2461_s21   ;;  %s1882_s20 = sphi %s1935_s20, %s2460_s20   ;;  %s1878_s19 = sphi %s1933_s19, %s2459_s19   ;;  %s1874_s18 = sphi %s1931_s18, %s2458_s18  }
   0x5   : > { %s30_s26 = sadd.s32 1, %s1890_s22  ;;  %s161_s27 = sadd.s32 1, %s1882_s20 }
   0x6   : > { %p32_p0 = scmp.ge.s32.totalorder %s30_s26, 2  ;;  %p171_p1 = scmp.ne.s32.totalorder %s1882_s20, %s1878_s19 }
   0x7   : > { %p172_p2 = scmp.eq.s32.totalorder %s1488_s24, 1  ;;  %p177_p3 = scmp.ne.s32.totalorder %s1878_s19, %s1874_s18 }
   0x8   : > { %s2464_s26 = smov (%p32_p0, %s30_s26), 0  ;;  %p178_p5 = scmp.eq.s32.totalorder %s1489_s25, 1 }
   0x9   : > { %p1971_p4 = por %p172_p2, %p171_p1  ;;  %s156_s29 = ssub.s32 %s1890_s22, %s2464_s26 }
   0xa   : > { %p1492_p6 = scmp.ge.s32.totalorder %s1894_s23, 1  ;;  %p159_p7 = scmp.eq.s32.totalorder %s156_s29, 0 }
   0xb   : > { %p1978_p8 = por %p178_p5, %p177_p3  ;;  %p231_p9 = scmp.lt.s32.totalorder %s1894_s23, 3 }
   0xc   : > { %s1984_s6 = scalar_select %p159_p7, %s1882_s20, %s161_s27  }
   0xd   : > { %p232_p10 = pnand %p1492_p6, %p231_p9 }
   0xe   : > { %p274_p11 = scmp.lt.s32.totalorder (!%p232_p10), %s1886_s21, 1  ;;  %s1896_s16 = smov (!%p232_p10), 96  }
   0xf   : > { %235 = sbr.rel (%p232_p10) target bundleno = 1188 (0x4a4), region = 40  ;;  %s1897_s27 = smov (!%p232_p10), 32  }
  0x10   : > { %s1898_s29 = smov (!%p232_p10), 64   ;;  %s1626_s13 = sshll.u32 (!%p232_p10), %s1886_s21, 6 }
  0x14   : > { %s1988_s7 = scalar_select %p274_p11, %s1886_s21, 1  ;;  %vm348_vm0 = vcmask 261120   ;;  %vm393_vm1 = vcmask 130048  }
  0x16   : > { %s1610_s8 = sshll.u32 %s1988_s7, 3  ;;  %s1609_s9 = sshll.u32 %s1988_s7, 5 }
  0x17   : > { %s287_s12 = scalar_lea.vmem %s2451_s1, %s1610_s8  ;;  %s281_s15 = scalar_lea.vmem %s2450_s0, %s1609_s9 }
  0x18   : > { %v2000_v0 = vld [vmem:[%s287_s12] sm:$0xff]  ;;  %v2002_v1 = vld [vmem:[%s281_s15 + $0x8] sm:$0xff]  ;;  %v2012_v4 = vld [vmem:[%s281_s15 + $0x10] sm:$0xff]  ;;  %s292_s25 = scalar_lea.vmem %s2452_s2, %s1610_s8  ;;  %s270_s8 = sand.u32 1, %s1878_s19  }
  0x19   : > { %545 = vrot.lane.b32.xlu0 %v2000_v0, %s1896_s16  ;;  %v362_v2 = vsel %vm348_vm0, %v2000_v0, 0  ;;  %539 = vrot.lane.b32.xlu1 %v2002_v1, %s1896_s16  ;;  %v2010_v3 = vld [vmem:[%s281_s15] sm:$0xff]  ;;  %v2018_v5 = vld [vmem:[%s281_s15 + $0x18] sm:$0xff]  ;;  %s1493_s9 = sshll.u32 %s270_s8, 6  ;;  %s1368_s21 = scalar_lea.sflag [#allocation3], %s270_s8 }
  0x1a   : > { %371 = vmatpush.bf16.xpose.msra.mxu0 %v362_v2  ;;  %543 = vrot.lane.b32.xlu2 %v2018_v5, %s1896_s16  ;;  %v2043_v19 = vld [vmem:[%s292_s25] sm:$0xff]  ;;  %s2395_s12 = scalar_lea.vmem [#allocation2], %s1493_s9  ;;  %s1836_s9 = scalar_lea.hbm %s2455_s5, 128 }
  0x1b   : > { %495 = vmatpush.bf16.msra.mxu1 %v2043_v19  ;;  %s1382_s17 = sshll.u32 %s2395_s12, 4  ;;  %s1383_s17 = int_to_ptr.vmem [resolvable:$true] %s1382_s17 }
  0x21   : > { %537 = vrot.lane.b32.xlu0 %v2010_v3, %s1896_s16  ;;  %1520 = vmatmul.msk.bf16.vlgmr.msra.gmra.mxu0 %vm348_vm0, %v2010_v3 }
  0x22   : > { %541 = vrot.lane.b32.xlu1 %v2012_v4, %s1896_s16 }
  0x31   : > { %1521 = vmatmul.msk.bf16.gmra.mxu0 %vm348_vm0, %v2002_v1 }
  0x41   : > { %1522 = vmatmul.msk.bf16.gmra.mxu0 %vm348_vm0, %v2012_v4 }
  0x51   : > { %1523 = vmatmul.msk.bf16.gmra.mxu0 %vm348_vm0, %v2018_v5 }
  0x74   : > { %v544_v22 = vpop.permute.xlu2 %543 }
  0x8b   : > { %v546_v6 = vpop.permute.xlu0 %545  ;;  %v540_v11 = vpop.permute.xlu1 %539 }
  0x8c   : > { %v560_v7 = vsel %vm348_vm0, %v546_v6, 0 }
  0x8d   : > { %569 = vmatpush.bf16.xpose.msra.mxu2 %v560_v7 }
  0x93   : > { %v538_v8 = vpop.permute.xlu0 %537 }
  0x94   : > { %1532 = vmatmul.msk.bf16.vlgmr.msra.gmra.mxu2 %vm348_vm0, %v538_v8  ;;  %v542_v16 = vpop.permute.xlu1 %541 }
  0x9e   : > { %v373_v9 = vpop.f32.mrf.mxu0 }
  0x9f   : > { %v394_v10 = vsel %vm393_vm1, %v373_v9, -inf }
  0xa0   : > { %395 = vmax.xlane.f32.xlu2 %v394_v10 }
  0xa4   : > { %1533 = vmatmul.msk.bf16.gmra.mxu2 %vm348_vm0, %v540_v11 }
  0xa6   : > { %v375_v12 = vpop.f32.mrf.mxu0 }
  0xa7   : > { %v397_v13 = vsel %vm393_vm1, %v375_v12, -inf }
  0xa8   : > { %398 = vmax.xlane.f32.xlu0 %v397_v13 }
  0xae   : > { %v378_v14 = vpop.f32.mrf.mxu0 }
  0xaf   : > { %v400_v15 = vsel %vm393_vm1, %v378_v14, -inf }
  0xb0   : > { %401 = vmax.xlane.f32.xlu1 %v400_v15 }
  0xb4   : > { %1534 = vmatmul.msk.bf16.gmra.mxu2 %vm348_vm0, %v542_v16 }
  0xb6   : > { %v380_v17 = vpop.f32.mrf.mxu0 }
  0xb7   : > { %v403_v18 = vsel %vm393_vm1, %v380_v17, -inf }
  0xb8   : > { %404 = vmax.xlane.f32.xlu2 %v403_v18 }
  0xbe   : > { %v383_v20 = vpop.f32.mrf.mxu0 }
  0xbf   : > { %v406_v21 = vsel %vm393_vm1, %v383_v20, -inf }
  0xc0   : > { %407 = vmax.xlane.f32.xlu2 %v406_v21 }
  0xc4   : > { %1535 = vmatmul.msk.bf16.gmra.mxu2 %vm348_vm0, %v544_v22 }
  0xc6   : > { %v385_v23 = vpop.f32.mrf.mxu0 }
  0xc7   : > { %v409_v24 = vsel %vm393_vm1, %v385_v23, -inf }
  0xc8   : > { %410 = vmax.xlane.f32.xlu0 %v409_v24 }
  0xce   : > { %v2049_v25 = vpop.f32.mrf.mxu0 }
  0xcf   : > { %v412_v26 = vsel %vm393_vm1, %v2049_v25, -inf }
  0xd0   : > { %413 = vmax.xlane.f32.xlu1 %v412_v26 }
  0xd6   : > { %v2053_v27 = vpop.f32.mrf.mxu0 }
  0xd7   : > { %v415_v28 = vsel %vm393_vm1, %v2053_v27, -inf }
  0xd8   : > { %416 = vmax.xlane.f32.xlu2 %v415_v28 }
  0xf0   : > { %667 = vrot.lane.b32.xlu2 %v2043_v19, %s1896_s16  ;;  %s1381_s16 = scalar_lea.hbm %s2455_s5, %s1626_s13 }
  0xf1   : > { %s1384_s24 = sshll.u32 %s1381_s16, 4  ;;  %s1385_s24 = int_to_ptr.hbm [resolvable:$true] %s1384_s24 }
  0xf2   : > { %s1830_s25 = sshra.s32 %s1385_s24, 4  ;;  %s1831_s25 = int_to_ptr.hbm [resolvable:$true] %s1830_s25 }
  0xf3   : > { %p1837_p1 = scmp.lt.s32.totalorder %s1831_s25, %s2455_s5 }
 0x113   : > { %v396_v29 = vpop.xlane.xlu2 %395 }
 0x114   : > { %v418_v30 = vsub.f32 %v373_v9, %v396_v29 }
 0x116   : > { %v426_v31 = vmul.f32 1.442695, %v418_v30 }
 0x117   : > { %v2059_v32 = vpop.f32.mrf.mxu2 }
 0x118   : > { %1688 = vpow2.f32 %v426_v31  ;;  %v591_v33 = vsel %vm393_vm1, %v2059_v32, -inf }
 0x119   : > { %592 = vmax.xlane.f32.xlu0 %v591_v33 }
 0x11b   : > { %v399_v34 = vpop.xlane.xlu0 %398 }
 0x11c   : > { %v419_v35 = vsub.f32 %v375_v12, %v399_v34 }
 0x11e   : > { %v1689_v36 = vpop.eup %1688  ;;  %v428_v37 = vmul.f32 1.442695, %v419_v35 }
 0x11f   : > { %v2063_v38 = vpop.f32.mrf.mxu2  ;;  %v442_v39 = vsel %vm393_vm1, %v1689_v36, 0.0 }
 0x120   : > { %1690 = vpow2.f32 %v428_v37  ;;  %443 = vadd.xlane.f32.xlu2 %v442_v39  ;;  %v594_v40 = vsel %vm393_vm1, %v2063_v38, -inf }
 0x121   : > { %595 = vmax.xlane.f32.xlu1 %v594_v40 }
 0x123   : > { %v402_v41 = vpop.xlane.xlu1 %401 }
 0x124   : > { %v420_v43 = vsub.f32 %v378_v14, %v402_v41 }
 0x126   : > { %v1691_v42 = vpop.eup %1690  ;;  %v430_v47 = vmul.f32 1.442695, %v420_v43 }
 0x127   : > { %v2068_v44 = vpop.f32.mrf.mxu2  ;;  %v466_v45 = vpack.c.bf16 %v1691_v42, %v1689_v36 }
 0x128   : > { %v597_v46 = vsel %vm393_vm1, %v2068_v44, -inf  ;;  %1692 = vpow2.f32 %v430_v47 }
 0x129   : > { %1528 = vmatmul.msk.bf16.vlgmr.msra.gmra.mxu1 %vm393_vm1, %v466_v45  ;;  %598 = vmax.xlane.f32.xlu0 %v597_v46 }
 0x12b   : > { %v405_v48 = vpop.xlane.xlu2 %404 }
 0x12c   : > { %v421_v49 = vsub.f32 %v380_v17, %v405_v48 }
 0x12e   : > { %v432_v50 = vmul.f32 1.442695, %v421_v49  ;;  %v1693_v54 = vpop.eup %1692 }
 0x12f   : > { %v2073_v51 = vpop.f32.mrf.mxu2  ;;  %v448_v26 = vsel %vm393_vm1, %v1693_v54, 0.0 }
 0x130   : > { %1694 = vpow2.f32 %v432_v50  ;;  %v600_v52 = vsel %vm393_vm1, %v2073_v51, -inf }
 0x131   : > { %601 = vmax.xlane.f32.xlu1 %v600_v52  ;;  %v1618_v52 = vld [vmem:[%s2453_s3] sm:$0xff] }
 0x133   : > { %v408_v53 = vpop.xlane.xlu2 %407 }
 0x134   : > { %v422_v56 = vsub.f32 %v383_v20, %v408_v53  ;;  %v445_v20 = vsel %vm393_vm1, %v1691_v42, 0.0 }
 0x136   : > { %v1695_v55 = vpop.eup %1694  ;;  %v434_v60 = vmul.f32 1.442695, %v422_v56 }
 0x137   : > { %v2077_v57 = vpop.f32.mrf.mxu2  ;;  %v467_v58 = vpack.c.bf16 %v1695_v55, %v1693_v54 }
 0x138   : > { %v603_v59 = vsel %vm393_vm1, %v2077_v57, -inf  ;;  %1092 = vrot.lane.b32.xlu2 %v2010_v3, %s1897_s27  ;;  %1696 = vpow2.f32 %v434_v60 }
 0x139   : > { %1529 = vmatmul.msk.bf16.gmra.mxu1 %vm393_vm1, %v467_v58  ;;  %604 = vmax.xlane.f32.xlu0 %v603_v59 }
 0x13b   : > { %v411_v61 = vpop.xlane.xlu0 %410 }
 0x13c   : > { %v423_v62 = vsub.f32 %v385_v23, %v411_v61 }
 0x13e   : > { %v436_v63 = vmul.f32 1.442695, %v423_v62  ;;  %v1697_v8 = vpop.eup %1696 }
 0x13f   : > { %v2084_v2 = vpop.f32.mrf.mxu2  ;;  %v454_v28 = vsel %vm393_vm1, %v1697_v8, 0.0 }
 0x140   : > { %1698 = vpow2.f32 %v436_v63  ;;  %v606_v6 = vsel %vm393_vm1, %v2084_v2, -inf  ;;  %841 = vrot.lane.b32.xlu2 %v2012_v4, %s1898_s29 }
 0x141   : > { %607 = vmax.xlane.f32.xlu1 %v606_v6 }
 0x143   : > { %v414_v7 = vpop.xlane.xlu1 %413 }
 0x144   : > { %v424_v10 = vsub.f32 %v2049_v25, %v414_v7  ;;  %v451_v25 = vsel %vm393_vm1, %v1695_v55, 0.0 }
 0x146   : > { %v1699_v9 = vpop.eup %1698  ;;  %v438_v14 = vmul.f32 1.442695, %v424_v10 }
 0x147   : > { %v2091_v11 = vpop.f32.mrf.mxu2  ;;  %v468_v12 = vpack.c.bf16 %v1699_v9, %v1697_v8 }
 0x148   : > { %v609_v13 = vsel %vm393_vm1, %v2091_v11, -inf  ;;  %1700 = vpow2.f32 %v438_v14 }
 0x149   : > { %610 = vmax.xlane.f32.xlu0 %v609_v13  ;;  %1530 = vmatmul.msk.bf16.gmra.mxu1 %vm393_vm1, %v468_v12 }
 0x14b   : > { %v417_v15 = vpop.xlane.xlu2 %416 }
 0x14c   : > { %v425_v16 = vsub.f32 %v2053_v27, %v417_v15  ;;  %v457_v27 = vsel %vm393_vm1, %v1699_v9, 0.0 }
 0x14e   : > { %v440_v17 = vmul.f32 1.442695, %v425_v16  ;;  %v1701_v22 = vpop.eup %1700 }
 0x14f   : > { %v2097_v18 = vpop.f32.mrf.mxu2  ;;  %v460_v29 = vsel %vm393_vm1, %v1701_v22, 0.0 }
 0x150   : > { %1702 = vpow2.f32 %v440_v17  ;;  %v612_v21 = vsel %vm393_vm1, %v2097_v18, -inf }
 0x151   : > { %446 = vadd.xlane.f32.xlu0 %v445_v20  ;;  %613 = vmax.xlane.f32.xlu1 %v612_v21 }
 0x153   : > { %v668_v31 = vpop.permute.xlu2 %667 }
 0x154   : > { %689 = vmatpush.bf16.msra.mxu3 %v668_v31 }
 0x156   : > { %v1703_v23 = vpop.eup %1702 }
 0x157   : > { %v469_v24 = vpack.c.bf16 %v1703_v23, %v1701_v22  ;;  %v463_v30 = vsel %vm393_vm1, %v1703_v23, 0.0 }
 0x159   : > { %452 = vadd.xlane.f32.xlu0 %v451_v25  ;;  %449 = vadd.xlane.f32.xlu1 %v448_v26 }
 0x15a   : > { %1531 = vmatmul.msk.bf16.gmra.mxu1 %vm393_vm1, %v469_v24 }
 0x161   : > { %458 = vadd.xlane.f32.xlu0 %v457_v27  ;;  %455 = vadd.xlane.f32.xlu1 %v454_v28 }
 0x169   : > { %461 = vadd.xlane.f32.xlu1 %v460_v29  ;;  %464 = vadd.xlane.f32.xlu0 %v463_v30 }
 0x17d   : > { %845 = vrot.lane.b32.xlu0 %v2000_v0, %s1898_s29 }
 0x182   : > { %1100 = vrot.lane.b32.xlu1 %v2000_v0, %s1897_s27 }
 0x185   : > { %1094 = vrot.lane.b32.xlu0 %v2002_v1, %s1897_s27 }
 0x18a   : > { %837 = vrot.lane.b32.xlu1 %v2010_v3, %s1898_s29  ;;  %v1619_v3 = vld [vmem:[%s2453_s3 + $0x8] sm:$0xff] }
 0x18b   : > { %814 = vmatpush.bf16.msrb.mxu3 %v1619_v3 }
 0x18c   : > { %v593_v33 = vpop.xlane.xlu0 %592 }
 0x18d   : > { %1096 = vrot.lane.b32.xlu0 %v2012_v4, %s1897_s27  ;;  %v615_v34 = vsub.f32 %v2059_v32, %v593_v33 }
 0x18f   : > { %v623_v35 = vmul.f32 1.442695, %v615_v34  ;;  %815 = vmatpush.bf16.msrb.mxu3 %v1618_v52 }
 0x191   : > { %1704 = vpow2.f32 %v623_v35 }
 0x192   : > { %839 = vrot.lane.b32.xlu1 %v2002_v1, %s1898_s29 }
 0x193   : > { %v444_v10 = vpop.xlane.xlu2 %443 }
 0x194   : > { %v596_v36 = vpop.xlane.xlu1 %595 }
 0x195   : > { %v616_v37 = vsub.f32 %v2063_v38, %v596_v36  ;;  %843 = vrot.lane.b32.xlu0 %v2018_v5, %s1898_s29 }
 0x197   : > { %v625_v0 = vmul.f32 1.442695, %v616_v37  ;;  %v2130_v1 = vpop.eup %1704 }
 0x199   : > { %1706 = vpow2.f32 %v625_v0 }
 0x19a   : > { %1098 = vrot.lane.b32.xlu1 %v2018_v5, %s1897_s27 }
 0x19c   : > { %v599_v4 = vpop.xlane.xlu0 %598 }
 0x19d   : > { %v617_v38 = vsub.f32 %v2068_v44, %v599_v4 }
 0x19f   : > { %v2132_v32 = vpop.eup %1706  ;;  %v627_v40 = vmul.f32 1.442695, %v617_v38 }
 0x1a0   : > { %v663_v39 = vpack.c.bf16 %v2132_v32, %v2130_v1 }
 0x1a1   : > { %1708 = vpow2.f32 %v627_v40 }
 0x1a2   : > { %1536 = vmatmul.msk.bf16.vlgmr.msra.gmra.mxu3 %vm393_vm1, %v663_v39 }
 0x1a4   : > { %v602_v41 = vpop.xlane.xlu1 %601 }
 0x1a5   : > { %v618_v42 = vsub.f32 %v2073_v51, %v602_v41 }
 0x1a6   : > { %v497_v60 = vpop.f32.mrf.mxu1 }
 0x1a7   : > { %v629_v43 = vmul.f32 1.442695, %v618_v42  ;;  %v2139_v45 = vpop.eup %1708 }
 0x1a9   : > { %1710 = vpow2.f32 %v629_v43 }
 0x1ac   : > { %v605_v5 = vpop.xlane.xlu0 %604 }
 0x1ad   : > { %v619_v47 = vsub.f32 %v2077_v57, %v605_v5 }
 0x1ae   : > { %v499_v7 = vpop.f32.mrf.mxu1 }
 0x1af   : > { %v2141_v46 = vpop.eup %1710  ;;  %v631_v48 = vmul.f32 1.442695, %v619_v47 }
 0x1b0   : > { %v664_v44 = vpack.c.bf16 %v2141_v46, %v2139_v45 }
 0x1b1   : > { %1712 = vpow2.f32 %v631_v48  ;;  %v1093_v48 = vpop.permute.xlu2 %1092 }
 0x1b2   : > { %1537 = vmatmul.msk.bf16.gmra.mxu3 %vm393_vm1, %v664_v44 }
 0x1b4   : > { %v608_v49 = vpop.xlane.xlu1 %607 }
 0x1b5   : > { %v620_v50 = vsub.f32 %v2084_v2, %v608_v49 }
 0x1b6   : > { %v502_v13 = vpop.f32.mrf.mxu1 }
 0x1b7   : > { %v633_v51 = vmul.f32 1.442695, %v620_v50  ;;  %v2151_v54 = vpop.eup %1712 }
 0x1b9   : > { %1714 = vpow2.f32 %v633_v51  ;;  %v842_v49 = vpop.permute.xlu2 %841 }
 0x1bc   : > { %v611_v53 = vpop.xlane.xlu0 %610 }
 0x1bd   : > { %v621_v56 = vsub.f32 %v2091_v11, %v611_v53 }
 0x1be   : > { %v504_v21 = vpop.f32.mrf.mxu1 }
 0x1bf   : > { %v2153_v55 = vpop.eup %1714  ;;  %v635_v58 = vmul.f32 1.442695, %v621_v56 }
 0x1c0   : > { %v665_v57 = vpack.c.bf16 %v2153_v55, %v2151_v54 }
 0x1c1   : > { %1716 = vpow2.f32 %v635_v58 }
 0x1c2   : > { %1538 = vmatmul.msk.bf16.gmra.mxu3 %vm393_vm1, %v665_v57 }
 0x1c4   : > { %v614_v59 = vpop.xlane.xlu1 %613  ;;  %v447_v63 = vpop.xlane.xlu0 %446 }
 0x1c5   : > { %v622_v61 = vsub.f32 %v2097_v18, %v614_v59 }
 0x1c6   : > { %v507_v28 = vpop.f32.mrf.mxu1 }
 0x1c7   : > { %v637_v62 = vmul.f32 1.442695, %v622_v61  ;;  %v2160_v2 = vpop.eup %1716 }
 0x1c9   : > { %1718 = vpow2.f32 %v637_v62 }
 0x1ca   : > { %1720 = vrcp.f32 %v447_v63 }
 0x1cb   : > { %1722 = vrcp.f32 %v444_v10 }
 0x1cc   : > { %v453_v9 = vpop.xlane.xlu0 %452  ;;  %v450_v11 = vpop.xlane.xlu1 %449 }
 0x1cd   : > { %1724 = vrcp.f32 %v453_v9 }
 0x1ce   : > { %1726 = vrcp.f32 %v450_v11  ;;  %v509_v35 = vpop.f32.mrf.mxu1 }
 0x1cf   : > { %v2162_v6 = vpop.eup %1718 }
 0x1d0   : > { %v666_v8 = vpack.c.bf16 %v2162_v6, %v2160_v2  ;;  %v1721_v12 = vpop.eup %1720 }
 0x1d1   : > { %v526_v14 = vmul.f32 %v1721_v12, %v499_v7  ;;  %v1723_v15 = vpop.eup %1722 }
 0x1d2   : > { %1539 = vmatmul.msk.bf16.gmra.mxu3 %vm393_vm1, %v666_v8  ;;  %v525_v17 = vmul.f32 %v1723_v15, %v497_v60 }
 0x1d3   : > { %v1725_v23 = vpop.eup %1724 }
 0x1d4   : > { %v459_v16 = vpop.xlane.xlu0 %458  ;;  %v533_v18 = vpack.c.bf16 %v526_v14, %v525_v17  ;;  %v456_v20 = vpop.xlane.xlu1 %455  ;;  %v528_v27 = vmul.f32 %v1725_v23, %v504_v21 }
 0x1d5   : > { %v1727_v24 = vpop.eup %1726  ;;  %1728 = vrcp.f32 %v459_v16 }
 0x1d6   : > { %v527_v26 = vmul.f32 %v1727_v24, %v502_v13  ;;  %1730 = vrcp.f32 %v456_v20 }
 0x1d7   : > { %v512_v39 = vpop.f32.mrf.mxu1 }
 0x1d8   : > { %v534_v30 = vpack.c.bf16 %v528_v27, %v527_v26 }
 0x1db   : > { %v1729_v36 = vpop.eup %1728 }
 0x1dc   : > { %v465_v22 = vpop.xlane.xlu0 %464  ;;  %v462_v25 = vpop.xlane.xlu1 %461  ;;  %v530_v4 = vmul.f32 %v1729_v36, %v509_v35 }
 0x1dd   : > { %v1731_v37 = vpop.eup %1730  ;;  %1732 = vrcp.f32 %v462_v25 }
 0x1de   : > { %v529_v3 = vmul.f32 %v1731_v37, %v507_v28  ;;  %1734 = vrcp.f32 %v465_v22 }
 0x1df   : > { %v514_v43 = vpop.f32.mrf.mxu1 }
 0x1e0   : > { %v535_v38 = vpack.c.bf16 %v530_v4, %v529_v3 }
 0x1e2   : > { %1560 = vmatmul.msk.bf16.vlgmr.msrb.gmra.mxu3 %vm348_vm0, %v533_v18 }
 0x1e3   : > { %v1733_v40 = vpop.eup %1732 }
 0x1e4   : > { %v1735_v41 = vpop.eup %1734  ;;  %v531_v5 = vmul.f32 %v1733_v40, %v512_v39 }
 0x1e5   : > { %v532_v47 = vmul.f32 %v1735_v41, %v514_v43 }
 0x1e7   : > { %v536_v44 = vpack.c.bf16 %v532_v47, %v531_v5  ;;  %v645_v5 = vsel %vm393_vm1, %v2139_v45, 0.0  ;;  %v639_v47 = vsel %vm393_vm1, %v2130_v1, 0.0  ;;  %v642_v45 = vsel %vm393_vm1, %v2132_v32, 0.0 }
 0x1e8   : > { %v657_v1 = vsel %vm393_vm1, %v2160_v2, 0.0  ;;  %v660_v32 = vsel %vm393_vm1, %v2162_v6, 0.0 }
 0x1ef   : > { %v846_v29 = vpop.permute.xlu0 %845 }
 0x1f0   : > { %v860_v31 = vsel %vm348_vm0, %v846_v29, 0 }
 0x1f1   : > { %869 = vmatpush.bf16.xpose.msrb.mxu0 %v860_v31 }
 0x1f2   : > { %1561 = vmatmul.msk.bf16.gmra.mxu3 %vm348_vm0, %v534_v30 }
 0x1f4   : > { %v1101_v33 = vpop.permute.xlu1 %1100 }
 0x1f5   : > { %v1115_v34 = vsel %vm348_vm0, %v1101_v33, 0 }
 0x1f6   : > { %1124 = vmatpush.bf16.xpose.msra.mxu3 %v1115_v34 }
 0x1f7   : > { %v1095_v51 = vpop.permute.xlu0 %1094 }
 0x1fc   : > { %v838_v0 = vpop.permute.xlu1 %837 }
 0x1fd   : > { %1564 = vmatmul.msk.bf16.vlgmr.msrb.gmra.mxu0 %vm348_vm0, %v838_v0 }
 0x1ff   : > { %v1097_v53 = vpop.permute.xlu0 %1096 }
 0x202   : > { %1562 = vmatmul.msk.bf16.gmra.mxu3 %vm348_vm0, %v535_v38 }
 0x204   : > { %v840_v42 = vpop.permute.xlu1 %839 }
 0x207   : > { %v844_v57 = vpop.permute.xlu0 %843 }
 0x20c   : > { %v1099_v61 = vpop.permute.xlu1 %1098 }
 0x20d   : > { %1565 = vmatmul.msk.bf16.gmra.mxu0 %vm348_vm0, %v840_v42 }
 0x212   : > { %1563 = vmatmul.msk.bf16.gmra.mxu3 %vm348_vm0, %v536_v44 }
 0x21d   : > { %1566 = vmatmul.msk.bf16.gmra.mxu0 %vm348_vm0, %v842_v49  ;;  %v648_v49 = vsel %vm393_vm1, %v2141_v46, 0.0 }
 0x222   : > { %1584 = vmatmul.msk.bf16.vlgmr.msra.gmra.mxu3 %vm348_vm0, %v1093_v48  ;;  %v654_v48 = vsel %vm393_vm1, %v2153_v55, 0.0 }
 0x225   : > { %v2177_v50 = vpop.f32.mrf.mxu3 }
 0x22d   : > { %v2179_v52 = vpop.f32.mrf.mxu3  ;;  %1567 = vmatmul.msk.bf16.gmra.mxu0 %vm348_vm0, %v844_v57  ;;  %v651_v57 = vsel %vm393_vm1, %v2151_v54, 0.0 }
 0x232   : > { %1585 = vmatmul.msk.bf16.gmra.mxu3 %vm348_vm0, %v1095_v51 }
 0x235   : > { %v2182_v56 = vpop.f32.mrf.mxu3 }
 0x23d   : > { %v2185_v58 = vpop.f32.mrf.mxu3 }
 0x242   : > { %1586 = vmatmul.msk.bf16.gmra.mxu3 %vm348_vm0, %v1097_v53 }
 0x245   : > { %v2188_v59 = vpop.f32.mrf.mxu3 }
 0x24d   : > { %v2190_v60 = vpop.f32.mrf.mxu3 }
 0x252   : > { %1587 = vmatmul.msk.bf16.gmra.mxu3 %vm348_vm0, %v1099_v61 }
 0x255   : > { %v2193_v62 = vpop.f32.mrf.mxu3 }
 0x25d   : > { %v2195_v63 = vpop.f32.mrf.mxu3 }
 0x265   : > { %v2197_v7 = vpop.f32.mrf.mxu3 }
 0x26d   : > { %v2199_v8 = vpop.f32.mrf.mxu3 }
 0x275   : > { %v2201_v9 = vpop.f32.mrf.mxu3 }
 0x27a   : > { %v2203_v10 = vpop.f32.mrf.mxu0 }
 0x27b   : > { %v891_v11 = vsel %vm393_vm1, %v2203_v10, -inf }
 0x27c   : > { %892 = vmax.xlane.f32.xlu2 %v891_v11 }
 0x27d   : > { %v2207_v12 = vpop.f32.mrf.mxu3 }
 0x282   : > { %v2209_v13 = vpop.f32.mrf.mxu0 }
 0x283   : > { %v894_v14 = vsel %vm393_vm1, %v2209_v13, -inf }
 0x284   : > { %895 = vmax.xlane.f32.xlu1 %v894_v14 }
 0x285   : > { %v2213_v15 = vpop.f32.mrf.mxu3 }
 0x28a   : > { %v2215_v16 = vpop.f32.mrf.mxu0 }
 0x28b   : > { %v897_v17 = vsel %vm393_vm1, %v2215_v16, -inf }
 0x28c   : > { %898 = vmax.xlane.f32.xlu2 %v897_v17 }
 0x28d   : > { %v2219_v18 = vpop.f32.mrf.mxu3 }
 0x292   : > { %v2221_v20 = vpop.f32.mrf.mxu0 }
 0x293   : > { %v900_v21 = vsel %vm393_vm1, %v2221_v20, -inf }
 0x294   : > { %901 = vmax.xlane.f32.xlu2 %v900_v21 }
 0x295   : > { %v2225_v22 = vpop.f32.mrf.mxu3 }
 0x29a   : > { %v2239_v28 = vpop.f32.mrf.mxu0 }
 0x29b   : > { %v903_v35 = vsel %vm393_vm1, %v2239_v28, -inf }
 0x29d   : > { %967 = vrot.lane.b32.xlu1 %v2043_v19, %s1898_s29  ;;  %v2229_v23 = vpop.f32.mrf.mxu3 }
 0x2a2   : > { %v2245_v31 = vpop.f32.mrf.mxu0 }
 0x2a3   : > { %v906_v33 = vsel %vm393_vm1, %v2245_v31, -inf }
 0x2a5   : > { %v2231_v24 = vpop.f32.mrf.mxu3 }
 0x2a6   : > { %v1146_v25 = vsel %vm393_vm1, %v2231_v24, -inf }
 0x2a7   : > { %1147 = vmax.xlane.f32.xlu0 %v1146_v25 }
 0x2aa   : > { %v2263_v3 = vpop.f32.mrf.mxu0 }
 0x2ab   : > { %v909_v4 = vsel %vm393_vm1, %v2263_v3, -inf }
 0x2ad   : > { %v2235_v26 = vpop.f32.mrf.mxu3 }
 0x2ae   : > { %v1149_v27 = vsel %vm393_vm1, %v2235_v26, -inf }
 0x2af   : > { %1150 = vmax.xlane.f32.xlu2 %v1149_v27 }
 0x2b2   : > { %v2269_v39 = vpop.f32.mrf.mxu0 }
 0x2b3   : > { %v912_v40 = vsel %vm393_vm1, %v2269_v39, -inf }
 0x2b5   : > { %v2241_v29 = vpop.f32.mrf.mxu3 }
 0x2b6   : > { %v1152_v30 = vsel %vm393_vm1, %v2241_v29, -inf }
 0x2b7   : > { %1153 = vmax.xlane.f32.xlu2 %v1152_v30 }
 0x2bb   : > { %1222 = vrot.lane.b32.xlu0 %v2043_v19, %s1897_s27  ;;  %s1832_s27 = scalar_lea.hbm %s1831_s25, 64 }
 0x2bc   : > { %p1833_p12 = scmp.ne.s32.totalorder %s1831_s25, %s1832_s27  ;;  %p1838_p2 = scmp.lt.s32.totalorder %s1836_s9, %s1832_s27 }
 0x2bd   : > { %v2251_v34 = vpop.f32.mrf.mxu3 }
 0x2be   : > { %v1155_v43 = vsel %vm393_vm1, %v2251_v34, -inf  ;;  %p1834_p13 = pnand %p1833_p12, %p1971_p4  ;;  %p1839_p3 = por %p1838_p2, %p1837_p1 }
 0x2bf   : > { %907 = vmax.xlane.f32.xlu2 %v906_v33 }
 0x2c0   : > { %p1835_p0 = pneg %p1834_p13 }
 0x2c2   : > { %p1840_p5 = pnand %p1839_p3, %p1835_p0 }
 0x2c5   : > { %v2255_v36 = vpop.f32.mrf.mxu3 }
 0x2c6   : > { %v1158_v37 = vsel %vm393_vm1, %v2255_v36, -inf }
 0x2c7   : > { %904 = vmax.xlane.f32.xlu1 %v903_v35  ;;  %1159 = vmax.xlane.f32.xlu2 %v1158_v37 }
 0x2cd   : > { %v2259_v0 = vpop.f32.mrf.mxu3 }
 0x2ce   : > { %v1161_v19 = vsel %vm393_vm1, %v2259_v0, -inf }
 0x2cf   : > { %1162 = vmax.xlane.f32.xlu2 %v1161_v19 }
 0x2d5   : > { %v2267_v38 = vpop.f32.mrf.mxu3 }
 0x2d6   : > { %v1164_v44 = vsel %vm393_vm1, %v2267_v38, -inf }
 0x2d7   : > { %910 = vmax.xlane.f32.xlu2 %v909_v4 }
 0x2dd   : > { %v2273_v41 = vpop.f32.mrf.mxu3 }
 0x2de   : > { %v1167_v42 = vsel %vm393_vm1, %v2273_v41, -inf }
 0x2df   : > { %1168 = vmax.xlane.f32.xlu1 %v1167_v42  ;;  %913 = vmax.xlane.f32.xlu2 %v912_v40 }
 0x2e5   : > { %1156 = vmax.xlane.f32.xlu0 %v1155_v43 }
 0x2e7   : > { %646 = vadd.xlane.f32.xlu1 %v645_v5  ;;  %640 = vadd.xlane.f32.xlu2 %v639_v47 }
 0x2ed   : > { %1165 = vmax.xlane.f32.xlu0 %v1164_v44 }
 0x2ef   : > { %655 = vadd.xlane.f32.xlu1 %v654_v48  ;;  %649 = vadd.xlane.f32.xlu2 %v648_v49  ;;  %v893_v51 = vpop.xlane.xlu2 %892 }
 0x2f0   : > { %v915_v53 = vsub.f32 %v2203_v10, %v893_v51 }
 0x2f2   : > { %v923_v61 = vmul.f32 1.442695, %v915_v53 }
 0x2f4   : > { %1736 = vpow2.f32 %v923_v61 }
 0x2f5   : > { %643 = vadd.xlane.f32.xlu0 %v642_v45 }
 0x2f7   : > { %658 = vadd.xlane.f32.xlu2 %v657_v1  ;;  %v896_v55 = vpop.xlane.xlu1 %895 }
 0x2f8   : > { %v916_v46 = vsub.f32 %v2209_v13, %v896_v55 }
 0x2fa   : > { %v925_v14 = vmul.f32 1.442695, %v916_v46  ;;  %v1737_v2 = vpop.eup %1736 }
 0x2fb   : > { %v939_v17 = vsel %vm393_vm1, %v1737_v2, 0.0 }
 0x2fc   : > { %1738 = vpow2.f32 %v925_v14 }
 0x2fd   : > { %652 = vadd.xlane.f32.xlu0 %v651_v57 }
 0x2ff   : > { %v899_v11 = vpop.xlane.xlu2 %898 }
 0x300   : > { %v917_v13 = vsub.f32 %v2215_v16, %v899_v11 }
 0x302   : > { %v1739_v21 = vpop.eup %1738  ;;  %v927_v33 = vmul.f32 1.442695, %v917_v13  ;;  %v1621_v13 = vld [vmem:[%s2453_s3 + $0x18] sm:$0xff] }
 0x303   : > { %v963_v27 = vpack.c.bf16 %v1739_v21, %v1737_v2  ;;  %v942_v1 = vsel %vm393_vm1, %v1739_v21, 0.0  ;;  %761 = vmatpush.bf16.msrb.mxu1 %v1621_v13 }
 0x305   : > { %661 = vadd.xlane.f32.xlu0 %v660_v32 }
 0x307   : > { %v902_v10 = vpop.xlane.xlu2 %901 }
 0x308   : > { %v918_v25 = vsub.f32 %v2221_v20, %v902_v10 }
 0x30a   : > { %v929_v30 = vmul.f32 1.442695, %v918_v25 }
 0x30c   : > { %1740 = vpow2.f32 %v929_v30 }
 0x30d   : > { %940 = vadd.xlane.f32.xlu0 %v939_v17  ;;  %1742 = vpow2.f32 %v927_v33 }
 0x30f   : > { %v968_v54 = vpop.permute.xlu1 %967 }
 0x310   : > { %989 = vmatpush.bf16.msrb.mxu2 %v968_v54 }
 0x312   : > { %v1741_v19 = vpop.eup %1740 }
 0x313   : > { %1568 = vmatmul.msk.bf16.vlgmr.msrb.gmra.mxu2 %vm393_vm1, %v963_v27  ;;  %v1743_v4 = vpop.eup %1742  ;;  %v948_v2 = vsel %vm393_vm1, %v1741_v19, 0.0 }
 0x314   : > { %v964_v40 = vpack.c.bf16 %v1741_v19, %v1743_v4 }
 0x31a   : > { %v1148_v6 = vpop.xlane.xlu0 %1147 }
 0x31b   : > { %v1170_v35 = vsub.f32 %v2231_v24, %v1148_v6  ;;  %v1620_v6 = vld [vmem:[%s2453_s3 + $0x10] sm:$0xff] }
 0x31c   : > { %762 = vmatpush.bf16.msrb.mxu1 %v1620_v6  ;;  %v1623_v6 = vld [vmem:[%s2453_s3 + $0x28] sm:$0xff] }
 0x31d   : > { %v1178_v37 = vmul.f32 1.442695, %v1170_v35 }
 0x31f   : > { %1744 = vpow2.f32 %v1178_v37 }
 0x320   : > { %1061 = vmatpush.bf16.msra.mxu1 %v1623_v6 }
 0x322   : > { %v1151_v42 = vpop.xlane.xlu2 %1150 }
 0x323   : > { %v1171_v20 = vsub.f32 %v2235_v26, %v1151_v42  ;;  %1569 = vmatmul.msk.bf16.gmra.mxu2 %vm393_vm1, %v964_v40 }
 0x325   : > { %v1745_v16 = vpop.eup %1744  ;;  %v1180_v43 = vmul.f32 1.442695, %v1171_v20 }
 0x326   : > { %v1194_v5 = vsel %vm393_vm1, %v1745_v16, 0.0 }
 0x327   : > { %1746 = vpow2.f32 %v1180_v43  ;;  %1195 = vadd.xlane.f32.xlu1 %v1194_v5 }
 0x32a   : > { %v1154_v47 = vpop.xlane.xlu2 %1153 }
 0x32b   : > { %v1172_v44 = vsub.f32 %v2241_v29, %v1154_v47  ;;  %v945_v29 = vsel %vm393_vm1, %v1743_v4, 0.0 }
 0x32d   : > { %v1747_v24 = vpop.eup %1746  ;;  %v1182_v48 = vmul.f32 1.442695, %v1172_v44  ;;  %v1223_v49 = vpop.permute.xlu0 %1222 }
 0x32e   : > { %v1218_v45 = vpack.c.bf16 %v1747_v24, %v1745_v16  ;;  %1244 = vmatpush.bf16.msra.mxu0 %v1223_v49  ;;  %v1197_v26 = vsel %vm393_vm1, %v1747_v24, 0.0 }
 0x32f   : > { %1748 = vpow2.f32 %v1182_v48  ;;  %943 = vadd.xlane.f32.xlu1 %v942_v1  ;;  %1198 = vadd.xlane.f32.xlu2 %v1197_v26 }
 0x331   : > { %1588 = vmatmul.msk.bf16.vlgmr.msra.gmra.mxu0 %vm393_vm1, %v1218_v45 }
 0x332   : > { %v908_v51 = vpop.xlane.xlu2 %907 }
 0x333   : > { %v920_v57 = vsub.f32 %v2245_v31, %v908_v51 }
 0x335   : > { %v2311_v53 = vpop.eup %1748  ;;  %v933_v61 = vmul.f32 1.442695, %v920_v57 }
 0x336   : > { %v1200_v55 = vsel %vm393_vm1, %v2311_v53, 0.0 }
 0x337   : > { %946 = vadd.xlane.f32.xlu1 %v945_v29  ;;  %1201 = vadd.xlane.f32.xlu2 %v1200_v55  ;;  %1750 = vpow2.f32 %v933_v61 }
 0x33a   : > { %v905_v46 = vpop.xlane.xlu1 %904  ;;  %v1160_v11 = vpop.xlane.xlu2 %1159 }
 0x33b   : > { %v919_v14 = vsub.f32 %v2239_v28, %v905_v46  ;;  %v1174_v43 = vsub.f32 %v2255_v36, %v1160_v11 }
 0x33d   : > { %v931_v32 = vmul.f32 1.442695, %v919_v14  ;;  %v2320_v10 = vpop.eup %1750 }
 0x33f   : > { %1752 = vpow2.f32 %v931_v32  ;;  %949 = vadd.xlane.f32.xlu2 %v948_v2 }
 0x342   : > { %v1163_v17 = vpop.xlane.xlu2 %1162 }
 0x343   : > { %v1175_v31 = vsub.f32 %v2259_v0, %v1163_v17 }
 0x345   : > { %v1753_v21 = vpop.eup %1752  ;;  %v1188_v54 = vmul.f32 1.442695, %v1175_v31  ;;  %v954_v31 = vsel %vm393_vm1, %v2320_v10, 0.0 }
 0x346   : > { %v951_v25 = vsel %vm393_vm1, %v1753_v21, 0.0  ;;  %v965_v27 = vpack.c.bf16 %v2320_v10, %v1753_v21 }
 0x347   : > { %1754 = vpow2.f32 %v1188_v54  ;;  %952 = vadd.xlane.f32.xlu2 %v951_v25 }
 0x348   : > { %1570 = vmatmul.msk.bf16.gmra.mxu2 %vm393_vm1, %v965_v27 }
 0x34a   : > { %v911_v28 = vpop.xlane.xlu2 %910 }
 0x34b   : > { %v921_v0 = vsub.f32 %v2263_v3, %v911_v28 }
 0x34d   : > { %v2328_v30 = vpop.eup %1754  ;;  %v935_v35 = vmul.f32 1.442695, %v921_v0 }
 0x34e   : > { %v1209_v33 = vsel %vm393_vm1, %v2328_v30, 0.0 }
 0x34f   : > { %1210 = vadd.xlane.f32.xlu1 %v1209_v33  ;;  %1756 = vpow2.f32 %v935_v35 }
 0x352   : > { %v1169_v37 = vpop.xlane.xlu1 %1168  ;;  %v914_v19 = vpop.xlane.xlu2 %913 }
 0x353   : > { %v1177_v4 = vsub.f32 %v2273_v41, %v1169_v37  ;;  %v922_v40 = vsub.f32 %v2269_v39, %v914_v19  ;;  %v1186_v41 = vmul.f32 1.442695, %v1174_v43 }
 0x355   : > { %v1192_v42 = vmul.f32 1.442695, %v1177_v4  ;;  %v937_v20 = vmul.f32 1.442695, %v922_v40  ;;  %v1757_v47 = vpop.eup %1756  ;;  %v1625_v40 = vld [vmem:[%s2453_s3 + $0x38] sm:$0xff] }
 0x356   : > { %1316 = vmatpush.bf16.msra.mxu2 %v1625_v40 }
 0x357   : > { %1758 = vpow2.f32 %v1192_v42 }
 0x358   : > { %1760 = vpow2.f32 %v937_v20  ;;  %v1157_v3 = vpop.xlane.xlu0 %1156 }
 0x359   : > { %v1173_v16 = vsub.f32 %v2251_v34, %v1157_v3 }
 0x35a   : > { %v641_v26 = vpop.xlane.xlu2 %640  ;;  %v647_v17 = vpop.xlane.xlu1 %646 }
 0x35b   : > { %v1184_v5 = vmul.f32 1.442695, %v1173_v16 }
 0x35d   : > { %v1759_v44 = vpop.eup %1758  ;;  %1762 = vpow2.f32 %v1184_v5 }
 0x35e   : > { %v1761_v24 = vpop.eup %1760  ;;  %v1215_v48 = vsel %vm393_vm1, %v1759_v44, 0.0  ;;  %1764 = vpow2.f32 %v1186_v41 }
 0x35f   : > { %1216 = vadd.xlane.f32.xlu2 %v1215_v48  ;;  %v966_v39 = vpack.c.bf16 %v1761_v24, %v1757_v47  ;;  %v960_v21 = vsel %vm393_vm1, %v1761_v24, 0.0 }
 0x360   : > { %v1166_v49 = vpop.xlane.xlu0 %1165 }
 0x361   : > { %v1176_v45 = vsub.f32 %v2267_v38, %v1166_v49  ;;  %1571 = vmatmul.msk.bf16.gmra.mxu2 %vm393_vm1, %v966_v39 }
 0x362   : > { %v650_v32 = vpop.xlane.xlu2 %649  ;;  %v656_v0 = vpop.xlane.xlu1 %655 }
 0x363   : > { %v1763_v1 = vpop.eup %1762  ;;  %v1190_v34 = vmul.f32 1.442695, %v1176_v45 }
 0x364   : > { %v1203_v36 = vsel %vm393_vm1, %v1763_v1, 0.0  ;;  %v1219_v51 = vpack.c.bf16 %v1763_v1, %v2311_v53  ;;  %v1765_v29 = vpop.eup %1764 }
 0x365   : > { %1766 = vpow2.f32 %v1190_v34  ;;  %1204 = vadd.xlane.f32.xlu0 %v1203_v36  ;;  %v1206_v38 = vsel %vm393_vm1, %v1765_v29, 0.0  ;;  %v1220_v54 = vpack.c.bf16 %v2328_v30, %v1765_v29 }
 0x366   : > { %1589 = vmatmul.msk.bf16.gmra.mxu0 %vm393_vm1, %v1219_v51  ;;  %1768 = vrcp.f32 %v641_v26 }
 0x368   : > { %v644_v57 = vpop.xlane.xlu0 %643 }
 0x369   : > { %1770 = vrcp.f32 %v644_v57 }
 0x36a   : > { %1772 = vrcp.f32 %v650_v32  ;;  %v659_v42 = vpop.xlane.xlu2 %658 }
 0x36b   : > { %v1767_v55 = vpop.eup %1766  ;;  %1774 = vrcp.f32 %v647_v17 }
 0x36c   : > { %v1212_v61 = vsel %vm393_vm1, %v1767_v55, 0.0  ;;  %v1769_v46 = vpop.eup %1768  ;;  %v1221_v30 = vpack.c.bf16 %v1759_v44, %v1767_v55 }
 0x36d   : > { %1207 = vadd.xlane.f32.xlu0 %v1206_v38  ;;  %1213 = vadd.xlane.f32.xlu1 %v1212_v61  ;;  %v719_v14 = vmul.f32 %v1769_v46, %v2177_v50 }
 0x36f   : > { %v1771_v11 = vpop.eup %1770 }
 0x370   : > { %v720_v53 = vmul.f32 %v1771_v11, %v2179_v52  ;;  %v1773_v50 = vpop.eup %1772  ;;  %v957_v52 = vsel %vm393_vm1, %v1757_v47, 0.0  ;;  %v653_v10 = vpop.xlane.xlu0 %652 }
 0x371   : > { %v1775_v25 = vpop.eup %1774  ;;  %v722_v27 = vmul.f32 %v1773_v50, %v2185_v58  ;;  %1776 = vrcp.f32 %v653_v10 }
 0x372   : > { %v727_v2 = vpack.c.bf16 %v720_v53, %v719_v14  ;;  %v721_v28 = vmul.f32 %v1775_v25, %v2182_v56  ;;  %1778 = vrcp.f32 %v656_v0  ;;  %v1622_v56 = vld [vmem:[%s2453_s3 + $0x20] sm:$0xff] }
 0x373   : > { %1062 = vmatpush.bf16.msra.mxu1 %v1622_v56 }
 0x374   : > { %1548 = vmatmul.msk.bf16.vlgmr.msrb.gmra.mxu1 %vm348_vm0, %v727_v2  ;;  %v728_v13 = vpack.c.bf16 %v722_v27, %v721_v28 }
 0x375   : > { %955 = vadd.xlane.f32.xlu0 %v954_v31  ;;  %961 = vadd.xlane.f32.xlu1 %v960_v21 }
 0x376   : > { %1590 = vmatmul.msk.bf16.gmra.mxu0 %vm393_vm1, %v1220_v54 }
 0x377   : > { %v1777_v33 = vpop.eup %1776 }
 0x378   : > { %v1779_v35 = vpop.eup %1778  ;;  %v723_v58 = vmul.f32 %v1777_v33, %v2188_v59  ;;  %v662_v19 = vpop.xlane.xlu0 %661  ;;  %v1624_v59 = vld [vmem:[%s2453_s3 + $0x30] sm:$0xff] }
 0x379   : > { %v724_v37 = vmul.f32 %v1779_v35, %v2190_v60  ;;  %1780 = vrcp.f32 %v662_v19  ;;  %1317 = vmatpush.bf16.msra.mxu2 %v1624_v59 }
 0x37a   : > { %1782 = vrcp.f32 %v659_v42 }
 0x37b   : > { %v729_v4 = vpack.c.bf16 %v724_v37, %v723_v58 }
 0x37d   : > { %958 = vadd.xlane.f32.xlu0 %v957_v52 }
 0x37f   : > { %v1781_v60 = vpop.eup %1780 }
 0x380   : > { %v1783_v3 = vpop.eup %1782  ;;  %v726_v16 = vmul.f32 %v1781_v60, %v2195_v63  ;;  %v941_v48 = vpop.xlane.xlu0 %940 }
 0x381   : > { %v725_v5 = vmul.f32 %v1783_v3, %v2193_v62 }
 0x383   : > { %v730_v24 = vpack.c.bf16 %v726_v16, %v725_v5 }
 0x384   : > { %1549 = vmatmul.msk.bf16.gmra.mxu1 %vm348_vm0, %v728_v13 }
 0x386   : > { %1591 = vmatmul.msk.bf16.gmra.mxu0 %vm393_vm1, %v1221_v30 }
 0x394   : > { %1550 = vmatmul.msk.bf16.gmra.mxu1 %vm348_vm0, %v729_v4 }
 0x396   : > { %v991_v43 = vpop.f32.mrf.mxu2 }
 0x39a   : > { %v1196_v20 = vpop.xlane.xlu1 %1195 }
 0x39e   : > { %v993_v41 = vpop.f32.mrf.mxu2 }
 0x3a2   : > { %v944_v47 = vpop.xlane.xlu1 %943  ;;  %v1199_v44 = vpop.xlane.xlu2 %1198 }
 0x3a3   : > { %1784 = vrcp.f32 %v944_v47 }
 0x3a4   : > { %1551 = vmatmul.msk.bf16.gmra.mxu1 %vm348_vm0, %v730_v24  ;;  %1786 = vrcp.f32 %v941_v48 }
 0x3a5   : > { %1788 = vrcp.f32 %v1196_v20 }
 0x3a6   : > { %1790 = vrcp.f32 %v1199_v44  ;;  %v996_v62 = vpop.f32.mrf.mxu2 }
 0x3a9   : > { %v1785_v49 = vpop.eup %1784 }
 0x3aa   : > { %v1202_v39 = vpop.xlane.xlu2 %1201  ;;  %v1020_v45 = vmul.f32 %v1785_v49, %v993_v41  ;;  %v1787_v34 = vpop.eup %1786 }
 0x3ab   : > { %v1019_v26 = vmul.f32 %v1787_v34, %v991_v43  ;;  %v947_v51 = vpop.xlane.xlu1 %946  ;;  %v1789_v57 = vpop.eup %1788 }
 0x3ac   : > { %v1791_v29 = vpop.eup %1790 }
 0x3ad   : > { %v1027_v63 = vpack.c.bf16 %v1020_v45, %v1019_v26 }
 0x3ae   : > { %v1246_v1 = vpop.f32.mrf.mxu0  ;;  %v998_v53 = vpop.f32.mrf.mxu2 }
 0x3af   : > { %v1274_v38 = vmul.f32 %v1789_v57, %v1246_v1 }
 0x3b2   : > { %v950_v36 = vpop.xlane.xlu2 %949 }
 0x3b3   : > { %1792 = vrcp.f32 %v950_v36 }
 0x3b4   : > { %1580 = vmatmul.msk.bf16.vlgmr.msra.gmra.mxu1 %vm348_vm0, %v1027_v63  ;;  %1794 = vrcp.f32 %v947_v51 }
 0x3b5   : > { %1796 = vrcp.f32 %v1202_v39 }
 0x3b6   : > { %v1248_v55 = vpop.f32.mrf.mxu0 }
 0x3b7   : > { %v1275_v61 = vmul.f32 %v1791_v29, %v1248_v55 }
 0x3b9   : > { %v1282_v46 = vpack.c.bf16 %v1275_v61, %v1274_v38  ;;  %v1793_v11 = vpop.eup %1792 }
 0x3ba   : > { %v1795_v14 = vpop.eup %1794  ;;  %v1022_v32 = vmul.f32 %v1793_v11, %v998_v53  ;;  %v953_v25 = vpop.xlane.xlu2 %952 }
 0x3bb   : > { %1600 = vmatmul.msk.bf16.vlgmr.msra.gmra.mxu2 %vm348_vm0, %v1282_v46  ;;  %v1021_v2 = vmul.f32 %v1795_v14, %v996_v62  ;;  %v1797_v28 = vpop.eup %1796 }
 0x3bd   : > { %v1028_v17 = vpack.c.bf16 %v1022_v32, %v1021_v2 }
 0x3c2   : > { %v1211_v54 = vpop.xlane.xlu1 %1210 }
 0x3c4   : > { %1581 = vmatmul.msk.bf16.gmra.mxu1 %vm348_vm0, %v1028_v17  ;;  %v1687_v17 = vld [vmem:[%s2454_s4] ss:$0 sm:$0xff] }
 0x3cb   : > { %v1001_v50 = vpop.f32.mrf.mxu2 }
 0x3d2   : > { %v1217_v1 = vpop.xlane.xlu2 %1216 }
 0x3d3   : > { %v1003_v6 = vpop.f32.mrf.mxu2 }
 0x3d8   : > { %v1205_v31 = vpop.xlane.xlu0 %1204 }
 0x3d9   : > { %1798 = vrcp.f32 %v1205_v31 }
 0x3da   : > { %1800 = vrcp.f32 %v953_v25 }
 0x3df   : > { %v1799_v13 = vpop.eup %1798 }
 0x3e0   : > { %v1208_v21 = vpop.xlane.xlu0 %1207  ;;  %v1214_v10 = vpop.xlane.xlu1 %1213 }
 0x3e1   : > { %v1801_v35 = vpop.eup %1800 }
 0x3e2   : > { %v1023_v37 = vmul.f32 %v1801_v35, %v1001_v50 }
 0x3e3   : > { %v1251_v52 = vpop.f32.mrf.mxu0 }
 0x3e4   : > { %v1276_v30 = vmul.f32 %v1797_v28, %v1251_v52  ;;  %v1006_v60 = vpop.f32.mrf.mxu2 }
 0x3e8   : > { %v956_v27 = vpop.xlane.xlu0 %955  ;;  %v962_v20 = vpop.xlane.xlu1 %961 }
 0x3e9   : > { %1802 = vrcp.f32 %v956_v27 }
 0x3ea   : > { %1804 = vrcp.f32 %v1211_v54 }
 0x3eb   : > { %v1253_v0 = vpop.f32.mrf.mxu0  ;;  %1806 = vrcp.f32 %v1208_v21 }
 0x3ec   : > { %v1277_v33 = vmul.f32 %v1799_v13, %v1253_v0  ;;  %v1008_v49 = vpop.f32.mrf.mxu2 }
 0x3ee   : > { %v1283_v58 = vpack.c.bf16 %v1277_v33, %v1276_v30 }
 0x3ef   : > { %v1803_v56 = vpop.eup %1802 }
 0x3f0   : > { %1601 = vmatmul.msk.bf16.gmra.mxu2 %vm348_vm0, %v1283_v58  ;;  %v1024_v19 = vmul.f32 %v1803_v56, %v1003_v6  ;;  %v959_v40 = vpop.xlane.xlu0 %958  ;;  %v1805_v3 = vpop.eup %1804 }
 0x3f1   : > { %v764_v4 = vpop.f32.mrf.mxu1  ;;  %1808 = vrcp.f32 %v959_v40  ;;  %v1807_v43 = vpop.eup %1806 }
 0x3f2   : > { %v1029_v42 = vpack.c.bf16 %v1024_v19, %v1023_v37  ;;  %1810 = vrcp.f32 %v962_v20  ;;  %v818_v32 = vadd.f32 %v2197_v7, %v764_v4 }
 0x3f3   : > { %v1256_v59 = vpop.f32.mrf.mxu0  ;;  %1812 = vrcp.f32 %v1217_v1 }
 0x3f4   : > { %1582 = vmatmul.msk.bf16.gmra.mxu1 %vm348_vm0, %v1029_v42  ;;  %v1278_v44 = vmul.f32 %v1807_v43, %v1256_v59  ;;  %1814 = vrcp.f32 %v1214_v10 }
 0x3f7   : > { %v1809_v5 = vpop.eup %1808 }
 0x3f8   : > { %v1811_v48 = vpop.eup %1810  ;;  %v1025_v39 = vmul.f32 %v1809_v5, %v1006_v60 }
 0x3f9   : > { %v766_v16 = vpop.f32.mrf.mxu1  ;;  %v1026_v45 = vmul.f32 %v1811_v48, %v1008_v49  ;;  %v1813_v62 = vpop.eup %1812 }
 0x3fa   : > { %v1815_v51 = vpop.eup %1814  ;;  %v820_v52 = vadd.f32 %v2199_v8, %v766_v16 }
 0x3fb   : > { %v1258_v47 = vpop.f32.mrf.mxu0  ;;  %v1030_v26 = vpack.c.bf16 %v1026_v45, %v1025_v39 }
 0x3fc   : > { %v1279_v24 = vmul.f32 %v1805_v3, %v1258_v47 }
 0x3fe   : > { %v1284_v41 = vpack.c.bf16 %v1279_v24, %v1278_v44 }
 0x400   : > { %1602 = vmatmul.msk.bf16.gmra.mxu2 %vm348_vm0, %v1284_v41 }
 0x401   : > { %v769_v34 = vpop.f32.mrf.mxu1 }
 0x402   : > { %v823_v13 = vadd.f32 %v2201_v9, %v769_v34 }
 0x403   : > { %v1261_v63 = vpop.f32.mrf.mxu0 }
 0x404   : > { %1583 = vmatmul.msk.bf16.gmra.mxu1 %vm348_vm0, %v1030_v26  ;;  %v1280_v29 = vmul.f32 %v1815_v51, %v1261_v63 }
 0x409   : > { %v771_v36 = vpop.f32.mrf.mxu1 }
 0x40a   : > { %v825_v35 = vadd.f32 %v2207_v12, %v771_v36 }
 0x40b   : > { %v1263_v57 = vpop.f32.mrf.mxu0 }
 0x40c   : > { %v1281_v55 = vmul.f32 %v1813_v62, %v1263_v57 }
 0x40e   : > { %v1285_v38 = vpack.c.bf16 %v1281_v55, %v1280_v29 }
 0x410   : > { %1603 = vmatmul.msk.bf16.gmra.mxu2 %vm348_vm0, %v1285_v38 }
 0x411   : > { %v774_v61 = vpop.f32.mrf.mxu1 }
 0x412   : > { %v828_v40 = vadd.f32 %v2213_v15, %v774_v61 }
 0x419   : > { %v776_v46 = vpop.f32.mrf.mxu1 }
 0x41a   : > { %v830_v3 = vadd.f32 %v2219_v18, %v776_v46 }
 0x421   : > { %v779_v11 = vpop.f32.mrf.mxu1 }
 0x422   : > { %v833_v44 = vadd.f32 %v2225_v22, %v779_v11 }
 0x429   : > { %v781_v14 = vpop.f32.mrf.mxu1 }
 0x42a   : > { %v835_v18 = vadd.f32 %v2229_v23, %v781_v14 }
 0x431   : > { %v1064_v53 = vpop.f32.mrf.mxu1 }
 0x432   : > { %v1084_v2 = vadd.f32 %v1064_v53, %v818_v32 }
 0x439   : > { %v1066_v50 = vpop.f32.mrf.mxu1 }
 0x43a   : > { %v1085_v7 = vadd.f32 %v1066_v50, %v820_v52 }
 0x43e   : > { %v1319_v31 = vpop.f32.mrf.mxu2 }
 0x43f   : > { %v1339_v21 = vadd.f32 %v1319_v31, %v1084_v2 }
 0x441   : > { %v1351_v54 = vadd.f32 %v1687_v17, %v1339_v21  ;;  %v1069_v10 = vpop.f32.mrf.mxu1 }
 0x442   : > { %v1086_v30 = vadd.f32 %v1069_v10, %v823_v13 }
 0x443   : > { %1359 = vst [vmem:[%s2395_s12] sm:$0xff] %v1351_v54 }
 0x446   : > { %v1321_v25 = vpop.f32.mrf.mxu2 }
 0x447   : > { %v1340_v27 = vadd.f32 %v1321_v25, %v1085_v7 }
 0x449   : > { %v1352_v28 = vadd.f32 %v1687_v17, %v1340_v27  ;;  %v1071_v0 = vpop.f32.mrf.mxu1 }
 0x44a   : > { %v1087_v56 = vadd.f32 %v1071_v0, %v825_v35 }
 0x44b   : > { %1360 = vst [vmem:[%s2395_s12 + $0x8] sm:$0xff] %v1352_v28 }
 0x471   : > { %v1074_v58 = vpop.f32.mrf.mxu1 }
 0x472   : > { %v1088_v42 = vadd.f32 %v1074_v58, %v828_v40 }
 0x473   : > { %v1324_v33 = vpop.f32.mrf.mxu2 }
 0x474   : > { %v1341_v6 = vadd.f32 %v1324_v33, %v1086_v30 }
 0x476   : > { %v1353_v8 = vadd.f32 %v1687_v17, %v1341_v6 }
 0x478   : > { %1361 = vst [vmem:[%s2395_s12 + $0x10] sm:$0xff] %v1353_v8 }
 0x479   : > { %v1076_v9 = vpop.f32.mrf.mxu1 }
 0x47a   : > { %v1089_v12 = vadd.f32 %v1076_v9, %v830_v3 }
 0x47b   : > { %v1326_v37 = vpop.f32.mrf.mxu2 }
 0x47c   : > { %v1342_v19 = vadd.f32 %v1326_v37, %v1087_v56 }
 0x47e   : > { %v1354_v4 = vadd.f32 %v1687_v17, %v1342_v19 }
 0x480   : > { %1362 = vst [vmem:[%s2395_s12 + $0x18] sm:$0xff] %v1354_v4 }
 0x481   : > { %v1079_v5 = vpop.f32.mrf.mxu1 }
 0x482   : > { %v1090_v15 = vadd.f32 %v1079_v5, %v833_v44 }
 0x483   : > { %v1329_v59 = vpop.f32.mrf.mxu2 }
 0x484   : > { %v1343_v20 = vadd.f32 %v1329_v59, %v1088_v42 }
 0x486   : > { %v1355_v60 = vadd.f32 %v1687_v17, %v1343_v20 }
 0x488   : > { %1363 = vst [vmem:[%s2395_s12 + $0x20] sm:$0xff] %v1355_v60 }
 0x489   : > { %v1081_v39 = vpop.f32.mrf.mxu1 }
 0x48a   : > { %v1091_v49 = vadd.f32 %v1081_v39, %v835_v18 }
 0x48b   : > { %v1331_v16 = vpop.f32.mrf.mxu2 }
 0x48c   : > { %v1344_v43 = vadd.f32 %v1331_v16, %v1089_v12 }
 0x48e   : > { %v1356_v47 = vadd.f32 %v1687_v17, %v1344_v43 }
 0x490   : > { %1364 = vst [vmem:[%s2395_s12 + $0x28] sm:$0xff] %v1356_v47 }
 0x493   : > { %v1334_v24 = vpop.f32.mrf.mxu2 }
 0x494   : > { %v1345_v48 = vadd.f32 %v1334_v24, %v1090_v15 }
 0x496   : > { %v1357_v41 = vadd.f32 %v1687_v17, %v1345_v48 }
 0x498   : > { %1365 = vst [vmem:[%s2395_s12 + $0x30] sm:$0xff] %v1357_v41 }
 0x49b   : > { %v1336_v22 = vpop.f32.mrf.mxu2 }
 0x49c   : > { %v1346_v45 = vadd.f32 %v1336_v22, %v1091_v49 }
 0x49e   : > { %v1358_v1 = vadd.f32 %v1687_v17, %v1346_v45 }
 0x4a0   : > { %1366 = vst [vmem:[%s2395_s12 + $0x38] sm:$0xff] %v1358_v1 }
 0x4a1   : > { %1843 = shalt.err (!%p1840_p5)
}
 0x4a2   : > { %s1899_s8 = smov 128   ;;  %s1900_s12 = smov 8  }
 0x4a3   : > { %1627 = dma.vmem_to_hbm [thread:$0]  (%p1971_p4), %s1383_s17, 1024, %s1385_s24, %s1368_s21, %s1899_s8, %s1899_s8, %s1900_s12  }
 0x4a4 PF: > { %p1633_p6 = scmp.ge.s32.totalorder %s1894_s23, 2  ;;  %s1399_s13 = sand.u32 1, %s1874_s18  }
 0x4a5   : > { %s1400_s14 = scalar_lea.sflag [#allocation3], %s1399_s13 }
 0x4a6   : > { %p1630_p7 = pnand %p1633_p6, %p1978_p8 }
 0x4a8   : > { %p1631_p9 = pneg %p1630_p7 }
 0x4aa   : > { %1869 = dma.done.wait (%p1631_p9), %s1400_s14, 1024  }
 0x4ab   : > { %1871 = vsyncadd (%p1631_p9), %s1400_s14, 4294966272  ;;  %s18_s23 = sadd.s32 1, %s1894_s23   ;;  %s2458_s18 = smov %s1878_s19 }
 0x4ac   : > { %p15_p10 = scmp.ge.s32.totalorder %s18_s23, 4   ;;  %s2459_s19 = smov %s1882_s20 }
 0x4ad   : > { %s2460_s20 = smov %s1984_s6  ;;  %s2461_s21 = smov %s1890_s22 }
 0x4ae   : > { %s2462_s22 = smov %s2464_s26  ;;  %17 = sbr.rel (!%p15_p10) target bundleno = 4 (0x4), region = 81 }
 0x4b3   :  { %1406 = vsyncpa [#allocation3], 1 }
 0x4b4   :  { %1408 = vsyncpa [#allocation3 + $0x1], 1 }

</bundles_post_ra>
